<compile_context>
chip_gen: v7x
topology: tpu7x:2x2x1
jax: 0.10.0
libtpu: 0.0.40
codegen_flags: <defaults>
</compile_context>

<pallas_src>
import functools
import math

import jax
import jax.numpy as jnp
from jax import lax
from jax.experimental import pallas as pl
from jax.experimental.pallas import tpu as pltpu


# ------------------------------ fused kernel -------------------------------

def _meta_kernel(xf_ref, adj_ref, w_fused_ref, w_mk_ref, misc_ref, o_ref,
                 *, his_num, heads):
    T = his_num
    HT = heads * T
    BN = xf_ref.shape[0]
    meta_out = o_ref.shape[1]

    # ---- ONE fused bf16 MXU matmul: GRU input proj (rz|n) + GAT lin + a_dst ----
    big = jnp.dot(xf_ref[...], w_fused_ref[...],
                  preferred_element_type=jnp.float32)         # (BN, 3T+HT+heads) f32

    # ---------------- tp branch: GRU(hidden=1), batch_first -----------------
    g_rz = big[:, 0:2 * T] + misc_ref[0:1, 0:2 * T]           # rz-interleaved preacts
    g_n = big[:, 2 * T:3 * T] + misc_ref[0:1, 2 * T:3 * T]    # n preacts
    w_hrz = misc_ref[4:5, 0:2]                                # (1,2) [w_hr, w_hz]
    b_hrz = misc_ref[4:5, 2:4]                                # (1,2) [b_hr, b_hz]
    w_hn = misc_ref[4:5, 4:5]                                 # (1,1)
    b_hn = misc_ref[4:5, 5:6]                                 # (1,1)

    col_idx = lax.broadcasted_iota(jnp.int32, (BN, T), 1)
    tp_out = jnp.zeros((BN, T), jnp.float32)
    h = jnp.zeros((BN, 1), jnp.float32)                       # h_0 = 0 (PyTorch default)
    for t in range(T):                                        # static unroll, T is small
        rz = jax.nn.sigmoid(g_rz[:, 2 * t:2 * t + 2] + h * w_hrz + b_hrz)  # fused r,z
        r, z = rz[:, 0:1], rz[:, 1:2]
        n = jnp.tanh(g_n[:, t:t + 1] + r * (h * w_hn + b_hn))
        h = (1.0 - z) * n + z * h
        tp_out = jnp.where(col_idx == t, h, tp_out)           # register-resident trajectory

    # ---------------- sp branch: dense GATConv (heads, concat=False) --------
    h_all = big[:, 3 * T:3 * T + HT]                          # (BN, HT) f32
    a_dst = big[:, 3 * T + HT:3 * T + HT + heads]             # (BN, heads), folded at init
    att_src_mat = misc_ref[5:5 + heads, 0:HT]                 # (heads, HT) block-structured
    dn = (((1,), (1,)), ((), ()))                             # contract last dims
    a_src = lax.dot_general(att_src_mat, h_all, dn,
                            preferred_element_type=jnp.float32)   # (heads, BN)
    edge_mask = adj_ref[...] > 0.5                            # adj[i,j]=1 iff edge j->i (+self loops)
    sp_acc = jnp.zeros((BN, T), jnp.float32)
    for hd in range(heads):                                   # static unroll over heads
        e = a_dst[:, hd:hd + 1] + a_src[hd:hd + 1, :]         # (BN, BN)
        e = jnp.where(e >= 0.0, e, 0.2 * e)                   # leaky_relu(0.2)
        e = jnp.where(edge_mask, e, jnp.float32(-1e30))       # single mask (softmax over edges)
        p = jnp.exp(e - jnp.max(e, axis=1, keepdims=True))
        att = p * pl.reciprocal(jnp.sum(p, axis=1, keepdims=True), approx=True)
        sp_acc = sp_acc + jnp.dot(att, h_all[:, hd * T:(hd + 1) * T],
                                  preferred_element_type=jnp.float32)
    sp_out = sp_acc * (1.0 / heads) + misc_ref[1:2, 0:T]      # mean over heads + bias
    # TODO(synk): GATConv attention dropout (p=0.1) is a train-time op; eval mode => identity.

    # ---------------- combine + mk_learner (Linear) -------------------------
    sig_a = jax.nn.sigmoid(misc_ref[2:3, 0:T])                # (1, T)
    mk_in = sig_a * sp_out + (1.0 - sig_a) * tp_out           # (BN, T)
    o_ref[...] = (jnp.dot(mk_in, w_mk_ref[...], preferred_element_type=jnp.float32)
                  + misc_ref[3:4, 0:meta_out])


# ------------------------------ pallas wrapper ------------------------------

def _full_spec(shape):
    nd = len(shape)
    return pl.BlockSpec(shape, lambda i, _nd=nd: (0,) * _nd)


def build_adj(edge_index, num_nodes):
    """Dense mask adj[i,j]=1 iff edge j->i, with forced self-loops (GATConv).
    Built ONCE per graph topology, outside the per-call jitted path."""
    adj = jnp.zeros((num_nodes, num_nodes), jnp.float32)
    adj = adj.at[edge_index[1], edge_index[0]].set(1.0)
    adj = jnp.maximum(adj, jnp.eye(num_nodes, dtype=jnp.float32))
    return adj
    # TODO(synk): for large BN store adj as int8/bool and tile the GAT over
    # destination rows with a "parallel" grid axis (v7x: 2 TCs, 64 MiB VMEM).


def st_meta_forward(x, adj, params, *, heads=3):
    """STMetaLearner_add.forward (tp=True, sp=True): (B,N,T,M) -> (B,N,meta_out)."""
    B, N, T, M = x.shape
    BN = B * N
    meta_out = params['w_mk'].shape[1]

    # reshape(data.x, (B*N, T*M)) -- matches both torch reshapes (row-major).
    # bf16 at the boundary: halves activation DMA, keeps casts out of the kernel.
    xf = x.reshape(BN, T * M).astype(jnp.bfloat16)

    args = (xf, adj, params['w_fused'], params['w_mk'], params['misc'])
    kernel = functools.partial(_meta_kernel, his_num=T, heads=heads)
    out = pl.pallas_call(
        kernel,
        grid=(1,),
        in_specs=[_full_spec(a.shape) for a in args],
        out_specs=_full_spec((BN, meta_out)),
        out_shape=jax.ShapeDtypeStruct((BN, meta_out), jnp.float32),
        compiler_params=pltpu.CompilerParams(dimension_semantics=("arbitrary",)),
    )(*args)
    return out.reshape(B, N, meta_out)


# ------------------------------ parameter init ------------------------------

def _uniform(key, shape, bound):
    return jax.random.uniform(key, shape, jnp.float32, -bound, bound)


def init_params(key, message_dim, his_num, meta_out, heads=3):
    T, M = his_num, message_dim
    HT = heads * T
    assert heads <= 3 and 3 * T <= 128 and HT <= 128 and meta_out <= 128
    ks = jax.random.split(key, 10)

    # --- GRU(message_dim -> hidden=1): PyTorch init U(-1/sqrt(hidden), +) = U(-1, 1)
    w_ih = _uniform(ks[0], (M, 3), 1.0)       # columns [r, z, n] (transposed)
    b_ih = _uniform(ks[1], (3,), 1.0)
    w_hh = _uniform(ks[2], (3,), 1.0)         # [w_hr, w_hz, w_hn]
    b_hh = _uniform(ks[3], (3,), 1.0)

    # --- GATConv(message_dim*his_num -> his_num, heads, concat=False), glorot-style
    fan_in = T * M
    g1 = math.sqrt(6.0 / (fan_in + HT))
    w_gat = _uniform(ks[4], (fan_in, HT), g1)
    g2 = math.sqrt(6.0 / (T + 1))
    att_src = _uniform(ks[5], (heads, T), g2)
    att_dst = _uniform(ks[6], (heads, T), g2)
    b_gat = jnp.zeros((T,), jnp.float32)

    # --- alpha gate (his_num,) and mk_learner Linear(his_num -> meta_out)
    alpha = _uniform(ks[7], (T,), 1.0 / math.sqrt(T))
    w_mk = _uniform(ks[8], (T, meta_out), 1.0 / math.sqrt(T))
    b_mk = _uniform(ks[9], (meta_out,), 1.0 / math.sqrt(T))

    # --- fused bf16 weight: [GRU rz-interleaved | GRU n | GAT lin | folded a_dst]
    w_fused = jnp.zeros((fan_in, 3 * T + HT + heads), jnp.float32)
    for t in range(T):
        rs, re = t * M, (t + 1) * M
        w_fused = w_fused.at[rs:re, 2 * t].set(w_ih[:, 0])        # r_t
        w_fused = w_fused.at[rs:re, 2 * t + 1].set(w_ih[:, 1])    # z_t
        w_fused = w_fused.at[rs:re, 2 * T + t].set(w_ih[:, 2])    # n_t
    w_fused = w_fused.at[:, 3 * T:3 * T + HT].set(w_gat)
    for hd in range(heads):
        w_fused = w_fused.at[:, 3 * T + HT + hd].set(
            w_gat[:, hd * T:(hd + 1) * T] @ att_dst[hd])          # fold att_dst proj
    w_fused = w_fused.astype(jnp.bfloat16)

    # --- pack every tiny parameter into ONE (8,128) f32 VMEM tile (one DMA)
    misc = jnp.zeros((8, 128), jnp.float32)
    misc = misc.at[0, 0:2 * T].set(jnp.tile(b_ih[0:2], (T,)))     # interleaved b_ir,b_iz
    misc = misc.at[0, 2 * T:3 * T].set(jnp.full((T,), b_ih[2]))   # b_in per step
    misc = misc.at[1, 0:T].set(b_gat)
    misc = misc.at[2, 0:T].set(alpha)
    misc = misc.at[3, 0:meta_out].set(b_mk)
    misc = misc.at[4, 0:2].set(w_hh[0:2])
    misc = misc.at[4, 2:4].set(b_hh[0:2])
    misc = misc.at[4, 4].set(w_hh[2])
    misc = misc.at[4, 5].set(b_hh[2])
    for hd in range(heads):
        misc = misc.at[5 + hd, hd * T:(hd + 1) * T].set(att_src[hd])

    return dict(w_fused=w_fused, misc=misc, w_mk=w_mk)


# ---------------------------------- main ------------------------------------

if __name__ == "__main__":
    key = jax.random.PRNGKey(0)
    B, N = 2, 8                               # batch, num_nodes
    message_dim, his_num, meta_out = 4, 16, 32

    kx, kp = jax.random.split(key, 2)
    # data.x: (batch, node_num, his_len, message_dim)
    X = jax.random.normal(kx, (B, N, his_num, message_dim), jnp.float32)

    # Deterministic bidirectional ring inside each of the B graphs
    # (PyG-style batched edge_index over the B*N flattened nodes).
    src, dst = [], []
    for b in range(B):
        for n in range(N):
            u, v = b * N + n, b * N + (n + 1) % N
            src += [u, v]
            dst += [v, u]
    edge_index = jnp.array([src, dst], dtype=jnp.int32)

    params = init_params(kp, message_dim, his_num, meta_out)
    adj = build_adj(edge_index, B * N)        # once per topology, outside jit

    fwd = jax.jit(lambda x, a: st_meta_forward(x, a, params))
    out = fwd(X, adj)
    jax.block_until_ready(out)

    assert out.shape == (B, N, meta_out), out.shape
    assert bool(jnp.all(jnp.isfinite(out)))
    print("KERNEL_OK")
</pallas_src>

<mosaic_0001>
module attributes {stable_mosaic.version = 11 : i64} {
  func.func @_meta_kernel(%arg0: i32, %arg1: memref<16x64xbf16, #tpu.memory_space<vmem>>, %arg2: memref<16x16xf32, #tpu.memory_space<vmem>>, %arg3: memref<64x99xbf16, #tpu.memory_space<vmem>>, %arg4: memref<16x32xf32, #tpu.memory_space<vmem>>, %arg5: memref<8x128xf32, #tpu.memory_space<vmem>>, %arg6: memref<16x32xf32, #tpu.memory_space<vmem>>) attributes {dimension_semantics = [#tpu.dimension_semantics<arbitrary>], iteration_bounds = array<i64: 1>, scalar_prefetch = 0 : i64, scratch_operands = 0 : i64, tpu.core_type = #tpu.core_type<tc>, window_params = [{pipeline_mode = #tpu.pipeline_mode<synchronous>, transform_indices = @transform_0, window_bounds = array<i64: 16, 64>}, {pipeline_mode = #tpu.pipeline_mode<synchronous>, transform_indices = @transform_1, window_bounds = array<i64: 16, 16>}, {pipeline_mode = #tpu.pipeline_mode<synchronous>, transform_indices = @transform_2, window_bounds = array<i64: 64, 99>}, {pipeline_mode = #tpu.pipeline_mode<synchronous>, transform_indices = @transform_3, window_bounds = array<i64: 16, 32>}, {pipeline_mode = #tpu.pipeline_mode<synchronous>, transform_indices = @transform_4, window_bounds = array<i64: 8, 128>}, {pipeline_mode = #tpu.pipeline_mode<synchronous>, transform_indices = @transform_5, window_bounds = array<i64: 16, 32>}]} {
    %c0 = arith.constant 0 : index
    %c0_0 = arith.constant 0 : index
    %0 = vector.load %arg1[%c0, %c0_0] : memref<16x64xbf16, #tpu.memory_space<vmem>>, vector<16x64xbf16>
    %c0_1 = arith.constant 0 : index
    %c0_2 = arith.constant 0 : index
    %1 = vector.load %arg3[%c0_1, %c0_2] : memref<64x99xbf16, #tpu.memory_space<vmem>>, vector<64x99xbf16>
    %cst = arith.constant dense<0.000000e+00> : vector<16x99xf32>
    %2 = tpu.matmul %0, %1, %cst {dimension_numbers = #tpu.dot_dimension_numbers<[1], [0], [0], [1], [0, 0, 1, 1], [], []>} : vector<16x64xbf16>, vector<64x99xbf16>, vector<16x99xf32> -> vector<16x99xf32>
    %3 = vector.extract_strided_slice %2 {offsets = [0, 0], sizes = [16, 32], strides = [1, 1]} : vector<16x99xf32> to vector<16x32xf32>
    %c0_3 = arith.constant 0 : index
    %c0_4 = arith.constant 0 : index
    %4 = vector.load %arg5[%c0_3, %c0_4] : memref<8x128xf32, #tpu.memory_space<vmem>>, vector<1x32xf32>
    %5 = vector.broadcast %4 : vector<1x32xf32> to vector<16x32xf32>
    %6 = arith.addf %3, %5 : vector<16x32xf32>
    %7 = vector.extract_strided_slice %2 {offsets = [0, 32], sizes = [16, 16], strides = [1, 1]} : vector<16x99xf32> to vector<16x16xf32>
    %c0_5 = arith.constant 0 : index
    %c32 = arith.constant 32 : index
    %8 = vector.load %arg5[%c0_5, %c32] : memref<8x128xf32, #tpu.memory_space<vmem>>, vector<1x16xf32>
    %9 = vector.broadcast %8 : vector<1x16xf32> to vector<16x16xf32>
    %10 = arith.addf %7, %9 : vector<16x16xf32>
    %c4 = arith.constant 4 : index
    %c0_6 = arith.constant 0 : index
    %11 = vector.load %arg5[%c4, %c0_6] : memref<8x128xf32, #tpu.memory_space<vmem>>, vector<1x2xf32>
    %c4_7 = arith.constant 4 : index
    %c2 = arith.constant 2 : index
    %12 = vector.load %arg5[%c4_7, %c2] : memref<8x128xf32, #tpu.memory_space<vmem>>, vector<1x2xf32>
    %c4_8 = arith.constant 4 : index
    %c4_9 = arith.constant 4 : index
    %13 = vector.load %arg5[%c4_8, %c4_9] : memref<8x128xf32, #tpu.memory_space<vmem>>, vector<1x1xf32>
    %c4_10 = arith.constant 4 : index
    %c5 = arith.constant 5 : index
    %14 = vector.load %arg5[%c4_10, %c5] : memref<8x128xf32, #tpu.memory_space<vmem>>, vector<1x1xf32>
    %15 = tpu.iota {dimensions = array<i32: 1>} : vector<16x16xi32>
    %cst_11 = arith.constant 0.000000e+00 : f32
    %16 = vector.broadcast %cst_11 : f32 to vector<16x16xf32>
    %cst_12 = arith.constant 0.000000e+00 : f32
    %17 = vector.broadcast %cst_12 : f32 to vector<16x1xf32>
    %18 = vector.extract_strided_slice %6 {offsets = [0, 0], sizes = [16, 2], strides = [1, 1]} : vector<16x32xf32> to vector<16x2xf32>
    %19 = vector.broadcast %17 : vector<16x1xf32> to vector<16x2xf32>
    %20 = vector.broadcast %11 : vector<1x2xf32> to vector<16x2xf32>
    %21 = arith.mulf %19, %20 : vector<16x2xf32>
    %22 = arith.addf %18, %21 : vector<16x2xf32>
    %23 = vector.broadcast %12 : vector<1x2xf32> to vector<16x2xf32>
    %24 = arith.addf %22, %23 : vector<16x2xf32>
    %25 = arith.negf %24 : vector<16x2xf32>
    %26 = math.exp %25 : vector<16x2xf32>
    %cst_13 = arith.constant 1.000000e+00 : f32
    %27 = vector.broadcast %cst_13 : f32 to vector<16x2xf32>
    %28 = arith.addf %27, %26 : vector<16x2xf32>
    %29 = arith.divf %27, %28 : vector<16x2xf32>
    %30 = vector.extract_strided_slice %29 {offsets = [0, 0], sizes = [16, 1], strides = [1, 1]} : vector<16x2xf32> to vector<16x1xf32>
    %31 = vector.extract_strided_slice %29 {offsets = [0, 1], sizes = [16, 1], strides = [1, 1]} : vector<16x2xf32> to vector<16x1xf32>
    %32 = vector.extract_strided_slice %10 {offsets = [0, 0], sizes = [16, 1], strides = [1, 1]} : vector<16x16xf32> to vector<16x1xf32>
    %33 = vector.broadcast %13 : vector<1x1xf32> to vector<16x1xf32>
    %34 = arith.mulf %17, %33 : vector<16x1xf32>
    %35 = vector.broadcast %14 : vector<1x1xf32> to vector<16x1xf32>
    %36 = arith.addf %34, %35 : vector<16x1xf32>
    %37 = arith.mulf %30, %36 : vector<16x1xf32>
    %38 = arith.addf %32, %37 : vector<16x1xf32>
    %39 = math.tanh %38 : vector<16x1xf32>
    %cst_14 = arith.constant 1.000000e+00 : f32
    %40 = vector.broadcast %cst_14 : f32 to vector<16x1xf32>
    %41 = arith.subf %40, %31 : vector<16x1xf32>
    %42 = arith.mulf %41, %39 : vector<16x1xf32>
    %43 = arith.mulf %31, %17 : vector<16x1xf32>
    %44 = arith.addf %42, %43 : vector<16x1xf32>
    %c0_i32 = arith.constant 0 : i32
    %45 = vector.broadcast %c0_i32 : i32 to vector<16x16xi32>
    %46 = arith.cmpi eq, %15, %45 : vector<16x16xi32>
    %47 = vector.shape_cast %44 : vector<16x1xf32> to vector<16x1xf32>
    %48 = vector.broadcast %47 : vector<16x1xf32> to vector<16x16xf32>
    %49 = arith.select %46, %48, %16 : vector<16x16xi1>, vector<16x16xf32>
    %50 = vector.extract_strided_slice %6 {offsets = [0, 2], sizes = [16, 2], strides = [1, 1]} : vector<16x32xf32> to vector<16x2xf32>
    %51 = vector.broadcast %44 : vector<16x1xf32> to vector<16x2xf32>
    %52 = vector.broadcast %11 : vector<1x2xf32> to vector<16x2xf32>
    %53 = arith.mulf %51, %52 : vector<16x2xf32>
    %54 = arith.addf %50, %53 : vector<16x2xf32>
    %55 = vector.broadcast %12 : vector<1x2xf32> to vector<16x2xf32>
    %56 = arith.addf %54, %55 : vector<16x2xf32>
    %57 = arith.negf %56 : vector<16x2xf32>
    %58 = math.exp %57 : vector<16x2xf32>
    %cst_15 = arith.constant 1.000000e+00 : f32
    %59 = vector.broadcast %cst_15 : f32 to vector<16x2xf32>
    %60 = arith.addf %59, %58 : vector<16x2xf32>
    %61 = arith.divf %59, %60 : vector<16x2xf32>
    %62 = vector.extract_strided_slice %61 {offsets = [0, 0], sizes = [16, 1], strides = [1, 1]} : vector<16x2xf32> to vector<16x1xf32>
    %63 = vector.extract_strided_slice %61 {offsets = [0, 1], sizes = [16, 1], strides = [1, 1]} : vector<16x2xf32> to vector<16x1xf32>
    %64 = vector.extract_strided_slice %10 {offsets = [0, 1], sizes = [16, 1], strides = [1, 1]} : vector<16x16xf32> to vector<16x1xf32>
    %65 = vector.broadcast %13 : vector<1x1xf32> to vector<16x1xf32>
    %66 = arith.mulf %44, %65 : vector<16x1xf32>
    %67 = vector.broadcast %14 : vector<1x1xf32> to vector<16x1xf32>
    %68 = arith.addf %66, %67 : vector<16x1xf32>
    %69 = arith.mulf %62, %68 : vector<16x1xf32>
    %70 = arith.addf %64, %69 : vector<16x1xf32>
    %71 = math.tanh %70 : vector<16x1xf32>
    %cst_16 = arith.constant 1.000000e+00 : f32
    %72 = vector.broadcast %cst_16 : f32 to vector<16x1xf32>
    %73 = arith.subf %72, %63 : vector<16x1xf32>
    %74 = arith.mulf %73, %71 : vector<16x1xf32>
    %75 = arith.mulf %63, %44 : vector<16x1xf32>
    %76 = arith.addf %74, %75 : vector<16x1xf32>
    %c1_i32 = arith.constant 1 : i32
    %77 = vector.broadcast %c1_i32 : i32 to vector<16x16xi32>
    %78 = arith.cmpi eq, %15, %77 : vector<16x16xi32>
    %79 = vector.shape_cast %76 : vector<16x1xf32> to vector<16x1xf32>
    %80 = vector.broadcast %79 : vector<16x1xf32> to vector<16x16xf32>
    %81 = arith.select %78, %80, %49 : vector<16x16xi1>, vector<16x16xf32>
    %82 = vector.extract_strided_slice %6 {offsets = [0, 4], sizes = [16, 2], strides = [1, 1]} : vector<16x32xf32> to vector<16x2xf32>
    %83 = vector.broadcast %76 : vector<16x1xf32> to vector<16x2xf32>
    %84 = vector.broadcast %11 : vector<1x2xf32> to vector<16x2xf32>
    %85 = arith.mulf %83, %84 : vector<16x2xf32>
    %86 = arith.addf %82, %85 : vector<16x2xf32>
    %87 = vector.broadcast %12 : vector<1x2xf32> to vector<16x2xf32>
    %88 = arith.addf %86, %87 : vector<16x2xf32>
    %89 = arith.negf %88 : vector<16x2xf32>
    %90 = math.exp %89 : vector<16x2xf32>
    %cst_17 = arith.constant 1.000000e+00 : f32
    %91 = vector.broadcast %cst_17 : f32 to vector<16x2xf32>
    %92 = arith.addf %91, %90 : vector<16x2xf32>
    %93 = arith.divf %91, %92 : vector<16x2xf32>
    %94 = vector.extract_strided_slice %93 {offsets = [0, 0], sizes = [16, 1], strides = [1, 1]} : vector<16x2xf32> to vector<16x1xf32>
    %95 = vector.extract_strided_slice %93 {offsets = [0, 1], sizes = [16, 1], strides = [1, 1]} : vector<16x2xf32> to vector<16x1xf32>
    %96 = vector.extract_strided_slice %10 {offsets = [0, 2], sizes = [16, 1], strides = [1, 1]} : vector<16x16xf32> to vector<16x1xf32>
    %97 = vector.broadcast %13 : vector<1x1xf32> to vector<16x1xf32>
    %98 = arith.mulf %76, %97 : vector<16x1xf32>
    %99 = vector.broadcast %14 : vector<1x1xf32> to vector<16x1xf32>
    %100 = arith.addf %98, %99 : vector<16x1xf32>
    %101 = arith.mulf %94, %100 : vector<16x1xf32>
    %102 = arith.addf %96, %101 : vector<16x1xf32>
    %103 = math.tanh %102 : vector<16x1xf32>
    %cst_18 = arith.constant 1.000000e+00 : f32
    %104 = vector.broadcast %cst_18 : f32 to vector<16x1xf32>
    %105 = arith.subf %104, %95 : vector<16x1xf32>
    %106 = arith.mulf %105, %103 : vector<16x1xf32>
    %107 = arith.mulf %95, %76 : vector<16x1xf32>
    %108 = arith.addf %106, %107 : vector<16x1xf32>
    %c2_i32 = arith.constant 2 : i32
    %109 = vector.broadcast %c2_i32 : i32 to vector<16x16xi32>
    %110 = arith.cmpi eq, %15, %109 : vector<16x16xi32>
    %111 = vector.shape_cast %108 : vector<16x1xf32> to vector<16x1xf32>
    %112 = vector.broadcast %111 : vector<16x1xf32> to vector<16x16xf32>
    %113 = arith.select %110, %112, %81 : vector<16x16xi1>, vector<16x16xf32>
    %114 = vector.extract_strided_slice %6 {offsets = [0, 6], sizes = [16, 2], strides = [1, 1]} : vector<16x32xf32> to vector<16x2xf32>
    %115 = vector.broadcast %108 : vector<16x1xf32> to vector<16x2xf32>
    %116 = vector.broadcast %11 : vector<1x2xf32> to vector<16x2xf32>
    %117 = arith.mulf %115, %116 : vector<16x2xf32>
    %118 = arith.addf %114, %117 : vector<16x2xf32>
    %119 = vector.broadcast %12 : vector<1x2xf32> to vector<16x2xf32>
    %120 = arith.addf %118, %119 : vector<16x2xf32>
    %121 = arith.negf %120 : vector<16x2xf32>
    %122 = math.exp %121 : vector<16x2xf32>
    %cst_19 = arith.constant 1.000000e+00 : f32
    %123 = vector.broadcast %cst_19 : f32 to vector<16x2xf32>
    %124 = arith.addf %123, %122 : vector<16x2xf32>
    %125 = arith.divf %123, %124 : vector<16x2xf32>
    %126 = vector.extract_strided_slice %125 {offsets = [0, 0], sizes = [16, 1], strides = [1, 1]} : vector<16x2xf32> to vector<16x1xf32>
    %127 = vector.extract_strided_slice %125 {offsets = [0, 1], sizes = [16, 1], strides = [1, 1]} : vector<16x2xf32> to vector<16x1xf32>
    %128 = vector.extract_strided_slice %10 {offsets = [0, 3], sizes = [16, 1], strides = [1, 1]} : vector<16x16xf32> to vector<16x1xf32>
    %129 = vector.broadcast %13 : vector<1x1xf32> to vector<16x1xf32>
    %130 = arith.mulf %108, %129 : vector<16x1xf32>
    %131 = vector.broadcast %14 : vector<1x1xf32> to vector<16x1xf32>
    %132 = arith.addf %130, %131 : vector<16x1xf32>
    %133 = arith.mulf %126, %132 : vector<16x1xf32>
    %134 = arith.addf %128, %133 : vector<16x1xf32>
    %135 = math.tanh %134 : vector<16x1xf32>
    %cst_20 = arith.constant 1.000000e+00 : f32
    %136 = vector.broadcast %cst_20 : f32 to vector<16x1xf32>
    %137 = arith.subf %136, %127 : vector<16x1xf32>
    %138 = arith.mulf %137, %135 : vector<16x1xf32>
    %139 = arith.mulf %127, %108 : vector<16x1xf32>
    %140 = arith.addf %138, %139 : vector<16x1xf32>
    %c3_i32 = arith.constant 3 : i32
    %141 = vector.broadcast %c3_i32 : i32 to vector<16x16xi32>
    %142 = arith.cmpi eq, %15, %141 : vector<16x16xi32>
    %143 = vector.shape_cast %140 : vector<16x1xf32> to vector<16x1xf32>
    %144 = vector.broadcast %143 : vector<16x1xf32> to vector<16x16xf32>
    %145 = arith.select %142, %144, %113 : vector<16x16xi1>, vector<16x16xf32>
    %146 = vector.extract_strided_slice %6 {offsets = [0, 8], sizes = [16, 2], strides = [1, 1]} : vector<16x32xf32> to vector<16x2xf32>
    %147 = vector.broadcast %140 : vector<16x1xf32> to vector<16x2xf32>
    %148 = vector.broadcast %11 : vector<1x2xf32> to vector<16x2xf32>
    %149 = arith.mulf %147, %148 : vector<16x2xf32>
    %150 = arith.addf %146, %149 : vector<16x2xf32>
    %151 = vector.broadcast %12 : vector<1x2xf32> to vector<16x2xf32>
    %152 = arith.addf %150, %151 : vector<16x2xf32>
    %153 = arith.negf %152 : vector<16x2xf32>
    %154 = math.exp %153 : vector<16x2xf32>
    %cst_21 = arith.constant 1.000000e+00 : f32
    %155 = vector.broadcast %cst_21 : f32 to vector<16x2xf32>
    %156 = arith.addf %155, %154 : vector<16x2xf32>
    %157 = arith.divf %155, %156 : vector<16x2xf32>
    %158 = vector.extract_strided_slice %157 {offsets = [0, 0], sizes = [16, 1], strides = [1, 1]} : vector<16x2xf32> to vector<16x1xf32>
    %159 = vector.extract_strided_slice %157 {offsets = [0, 1], sizes = [16, 1], strides = [1, 1]} : vector<16x2xf32> to vector<16x1xf32>
    %160 = vector.extract_strided_slice %10 {offsets = [0, 4], sizes = [16, 1], strides = [1, 1]} : vector<16x16xf32> to vector<16x1xf32>
    %161 = vector.broadcast %13 : vector<1x1xf32> to vector<16x1xf32>
    %162 = arith.mulf %140, %161 : vector<16x1xf32>
    %163 = vector.broadcast %14 : vector<1x1xf32> to vector<16x1xf32>
    %164 = arith.addf %162, %163 : vector<16x1xf32>
    %165 = arith.mulf %158, %164 : vector<16x1xf32>
    %166 = arith.addf %160, %165 : vector<16x1xf32>
    %167 = math.tanh %166 : vector<16x1xf32>
    %cst_22 = arith.constant 1.000000e+00 : f32
    %168 = vector.broadcast %cst_22 : f32 to vector<16x1xf32>
    %169 = arith.subf %168, %159 : vector<16x1xf32>
    %170 = arith.mulf %169, %167 : vector<16x1xf32>
    %171 = arith.mulf %159, %140 : vector<16x1xf32>
    %172 = arith.addf %170, %171 : vector<16x1xf32>
    %c4_i32 = arith.constant 4 : i32
    %173 = vector.broadcast %c4_i32 : i32 to vector<16x16xi32>
    %174 = arith.cmpi eq, %15, %173 : vector<16x16xi32>
    %175 = vector.shape_cast %172 : vector<16x1xf32> to vector<16x1xf32>
    %176 = vector.broadcast %175 : vector<16x1xf32> to vector<16x16xf32>
    %177 = arith.select %174, %176, %145 : vector<16x16xi1>, vector<16x16xf32>
    %178 = vector.extract_strided_slice %6 {offsets = [0, 10], sizes = [16, 2], strides = [1, 1]} : vector<16x32xf32> to vector<16x2xf32>
    %179 = vector.broadcast %172 : vector<16x1xf32> to vector<16x2xf32>
    %180 = vector.broadcast %11 : vector<1x2xf32> to vector<16x2xf32>
    %181 = arith.mulf %179, %180 : vector<16x2xf32>
    %182 = arith.addf %178, %181 : vector<16x2xf32>
    %183 = vector.broadcast %12 : vector<1x2xf32> to vector<16x2xf32>
    %184 = arith.addf %182, %183 : vector<16x2xf32>
    %185 = arith.negf %184 : vector<16x2xf32>
    %186 = math.exp %185 : vector<16x2xf32>
    %cst_23 = arith.constant 1.000000e+00 : f32
    %187 = vector.broadcast %cst_23 : f32 to vector<16x2xf32>
    %188 = arith.addf %187, %186 : vector<16x2xf32>
    %189 = arith.divf %187, %188 : vector<16x2xf32>
    %190 = vector.extract_strided_slice %189 {offsets = [0, 0], sizes = [16, 1], strides = [1, 1]} : vector<16x2xf32> to vector<16x1xf32>
    %191 = vector.extract_strided_slice %189 {offsets = [0, 1], sizes = [16, 1], strides = [1, 1]} : vector<16x2xf32> to vector<16x1xf32>
    %192 = vector.extract_strided_slice %10 {offsets = [0, 5], sizes = [16, 1], strides = [1, 1]} : vector<16x16xf32> to vector<16x1xf32>
    %193 = vector.broadcast %13 : vector<1x1xf32> to vector<16x1xf32>
    %194 = arith.mulf %172, %193 : vector<16x1xf32>
    %195 = vector.broadcast %14 : vector<1x1xf32> to vector<16x1xf32>
    %196 = arith.addf %194, %195 : vector<16x1xf32>
    %197 = arith.mulf %190, %196 : vector<16x1xf32>
    %198 = arith.addf %192, %197 : vector<16x1xf32>
    %199 = math.tanh %198 : vector<16x1xf32>
    %cst_24 = arith.constant 1.000000e+00 : f32
    %200 = vector.broadcast %cst_24 : f32 to vector<16x1xf32>
    %201 = arith.subf %200, %191 : vector<16x1xf32>
    %202 = arith.mulf %201, %199 : vector<16x1xf32>
    %203 = arith.mulf %191, %172 : vector<16x1xf32>
    %204 = arith.addf %202, %203 : vector<16x1xf32>
    %c5_i32 = arith.constant 5 : i32
    %205 = vector.broadcast %c5_i32 : i32 to vector<16x16xi32>
    %206 = arith.cmpi eq, %15, %205 : vector<16x16xi32>
    %207 = vector.shape_cast %204 : vector<16x1xf32> to vector<16x1xf32>
    %208 = vector.broadcast %207 : vector<16x1xf32> to vector<16x16xf32>
    %209 = arith.select %206, %208, %177 : vector<16x16xi1>, vector<16x16xf32>
    %210 = vector.extract_strided_slice %6 {offsets = [0, 12], sizes = [16, 2], strides = [1, 1]} : vector<16x32xf32> to vector<16x2xf32>
    %211 = vector.broadcast %204 : vector<16x1xf32> to vector<16x2xf32>
    %212 = vector.broadcast %11 : vector<1x2xf32> to vector<16x2xf32>
    %213 = arith.mulf %211, %212 : vector<16x2xf32>
    %214 = arith.addf %210, %213 : vector<16x2xf32>
    %215 = vector.broadcast %12 : vector<1x2xf32> to vector<16x2xf32>
    %216 = arith.addf %214, %215 : vector<16x2xf32>
    %217 = arith.negf %216 : vector<16x2xf32>
    %218 = math.exp %217 : vector<16x2xf32>
    %cst_25 = arith.constant 1.000000e+00 : f32
    %219 = vector.broadcast %cst_25 : f32 to vector<16x2xf32>
    %220 = arith.addf %219, %218 : vector<16x2xf32>
    %221 = arith.divf %219, %220 : vector<16x2xf32>
    %222 = vector.extract_strided_slice %221 {offsets = [0, 0], sizes = [16, 1], strides = [1, 1]} : vector<16x2xf32> to vector<16x1xf32>
    %223 = vector.extract_strided_slice %221 {offsets = [0, 1], sizes = [16, 1], strides = [1, 1]} : vector<16x2xf32> to vector<16x1xf32>
    %224 = vector.extract_strided_slice %10 {offsets = [0, 6], sizes = [16, 1], strides = [1, 1]} : vector<16x16xf32> to vector<16x1xf32>
    %225 = vector.broadcast %13 : vector<1x1xf32> to vector<16x1xf32>
    %226 = arith.mulf %204, %225 : vector<16x1xf32>
    %227 = vector.broadcast %14 : vector<1x1xf32> to vector<16x1xf32>
    %228 = arith.addf %226, %227 : vector<16x1xf32>
    %229 = arith.mulf %222, %228 : vector<16x1xf32>
    %230 = arith.addf %224, %229 : vector<16x1xf32>
    %231 = math.tanh %230 : vector<16x1xf32>
    %cst_26 = arith.constant 1.000000e+00 : f32
    %232 = vector.broadcast %cst_26 : f32 to vector<16x1xf32>
    %233 = arith.subf %232, %223 : vector<16x1xf32>
    %234 = arith.mulf %233, %231 : vector<16x1xf32>
    %235 = arith.mulf %223, %204 : vector<16x1xf32>
    %236 = arith.addf %234, %235 : vector<16x1xf32>
    %c6_i32 = arith.constant 6 : i32
    %237 = vector.broadcast %c6_i32 : i32 to vector<16x16xi32>
    %238 = arith.cmpi eq, %15, %237 : vector<16x16xi32>
    %239 = vector.shape_cast %236 : vector<16x1xf32> to vector<16x1xf32>
    %240 = vector.broadcast %239 : vector<16x1xf32> to vector<16x16xf32>
    %241 = arith.select %238, %240, %209 : vector<16x16xi1>, vector<16x16xf32>
    %242 = vector.extract_strided_slice %6 {offsets = [0, 14], sizes = [16, 2], strides = [1, 1]} : vector<16x32xf32> to vector<16x2xf32>
    %243 = vector.broadcast %236 : vector<16x1xf32> to vector<16x2xf32>
    %244 = vector.broadcast %11 : vector<1x2xf32> to vector<16x2xf32>
    %245 = arith.mulf %243, %244 : vector<16x2xf32>
    %246 = arith.addf %242, %245 : vector<16x2xf32>
    %247 = vector.broadcast %12 : vector<1x2xf32> to vector<16x2xf32>
    %248 = arith.addf %246, %247 : vector<16x2xf32>
    %249 = arith.negf %248 : vector<16x2xf32>
    %250 = math.exp %249 : vector<16x2xf32>
    %cst_27 = arith.constant 1.000000e+00 : f32
    %251 = vector.broadcast %cst_27 : f32 to vector<16x2xf32>
    %252 = arith.addf %251, %250 : vector<16x2xf32>
    %253 = arith.divf %251, %252 : vector<16x2xf32>
    %254 = vector.extract_strided_slice %253 {offsets = [0, 0], sizes = [16, 1], strides = [1, 1]} : vector<16x2xf32> to vector<16x1xf32>
    %255 = vector.extract_strided_slice %253 {offsets = [0, 1], sizes = [16, 1], strides = [1, 1]} : vector<16x2xf32> to vector<16x1xf32>
    %256 = vector.extract_strided_slice %10 {offsets = [0, 7], sizes = [16, 1], strides = [1, 1]} : vector<16x16xf32> to vector<16x1xf32>
    %257 = vector.broadcast %13 : vector<1x1xf32> to vector<16x1xf32>
    %258 = arith.mulf %236, %257 : vector<16x1xf32>
    %259 = vector.broadcast %14 : vector<1x1xf32> to vector<16x1xf32>
    %260 = arith.addf %258, %259 : vector<16x1xf32>
    %261 = arith.mulf %254, %260 : vector<16x1xf32>
    %262 = arith.addf %256, %261 : vector<16x1xf32>
    %263 = math.tanh %262 : vector<16x1xf32>
    %cst_28 = arith.constant 1.000000e+00 : f32
    %264 = vector.broadcast %cst_28 : f32 to vector<16x1xf32>
    %265 = arith.subf %264, %255 : vector<16x1xf32>
    %266 = arith.mulf %265, %263 : vector<16x1xf32>
    %267 = arith.mulf %255, %236 : vector<16x1xf32>
    %268 = arith.addf %266, %267 : vector<16x1xf32>
    %c7_i32 = arith.constant 7 : i32
    %269 = vector.broadcast %c7_i32 : i32 to vector<16x16xi32>
    %270 = arith.cmpi eq, %15, %269 : vector<16x16xi32>
    %271 = vector.shape_cast %268 : vector<16x1xf32> to vector<16x1xf32>
    %272 = vector.broadcast %271 : vector<16x1xf32> to vector<16x16xf32>
    %273 = arith.select %270, %272, %241 : vector<16x16xi1>, vector<16x16xf32>
    %274 = vector.extract_strided_slice %6 {offsets = [0, 16], sizes = [16, 2], strides = [1, 1]} : vector<16x32xf32> to vector<16x2xf32>
    %275 = vector.broadcast %268 : vector<16x1xf32> to vector<16x2xf32>
    %276 = vector.broadcast %11 : vector<1x2xf32> to vector<16x2xf32>
    %277 = arith.mulf %275, %276 : vector<16x2xf32>
    %278 = arith.addf %274, %277 : vector<16x2xf32>
    %279 = vector.broadcast %12 : vector<1x2xf32> to vector<16x2xf32>
    %280 = arith.addf %278, %279 : vector<16x2xf32>
    %281 = arith.negf %280 : vector<16x2xf32>
    %282 = math.exp %281 : vector<16x2xf32>
    %cst_29 = arith.constant 1.000000e+00 : f32
    %283 = vector.broadcast %cst_29 : f32 to vector<16x2xf32>
    %284 = arith.addf %283, %282 : vector<16x2xf32>
    %285 = arith.divf %283, %284 : vector<16x2xf32>
    %286 = vector.extract_strided_slice %285 {offsets = [0, 0], sizes = [16, 1], strides = [1, 1]} : vector<16x2xf32> to vector<16x1xf32>
    %287 = vector.extract_strided_slice %285 {offsets = [0, 1], sizes = [16, 1], strides = [1, 1]} : vector<16x2xf32> to vector<16x1xf32>
    %288 = vector.extract_strided_slice %10 {offsets = [0, 8], sizes = [16, 1], strides = [1, 1]} : vector<16x16xf32> to vector<16x1xf32>
    %289 = vector.broadcast %13 : vector<1x1xf32> to vector<16x1xf32>
    %290 = arith.mulf %268, %289 : vector<16x1xf32>
    %291 = vector.broadcast %14 : vector<1x1xf32> to vector<16x1xf32>
    %292 = arith.addf %290, %291 : vector<16x1xf32>
    %293 = arith.mulf %286, %292 : vector<16x1xf32>
    %294 = arith.addf %288, %293 : vector<16x1xf32>
    %295 = math.tanh %294 : vector<16x1xf32>
    %cst_30 = arith.constant 1.000000e+00 : f32
    %296 = vector.broadcast %cst_30 : f32 to vector<16x1xf32>
    %297 = arith.subf %296, %287 : vector<16x1xf32>
    %298 = arith.mulf %297, %295 : vector<16x1xf32>
    %299 = arith.mulf %287, %268 : vector<16x1xf32>
    %300 = arith.addf %298, %299 : vector<16x1xf32>
    %c8_i32 = arith.constant 8 : i32
    %301 = vector.broadcast %c8_i32 : i32 to vector<16x16xi32>
    %302 = arith.cmpi eq, %15, %301 : vector<16x16xi32>
    %303 = vector.shape_cast %300 : vector<16x1xf32> to vector<16x1xf32>
    %304 = vector.broadcast %303 : vector<16x1xf32> to vector<16x16xf32>
    %305 = arith.select %302, %304, %273 : vector<16x16xi1>, vector<16x16xf32>
    %306 = vector.extract_strided_slice %6 {offsets = [0, 18], sizes = [16, 2], strides = [1, 1]} : vector<16x32xf32> to vector<16x2xf32>
    %307 = vector.broadcast %300 : vector<16x1xf32> to vector<16x2xf32>
    %308 = vector.broadcast %11 : vector<1x2xf32> to vector<16x2xf32>
    %309 = arith.mulf %307, %308 : vector<16x2xf32>
    %310 = arith.addf %306, %309 : vector<16x2xf32>
    %311 = vector.broadcast %12 : vector<1x2xf32> to vector<16x2xf32>
    %312 = arith.addf %310, %311 : vector<16x2xf32>
    %313 = arith.negf %312 : vector<16x2xf32>
    %314 = math.exp %313 : vector<16x2xf32>
    %cst_31 = arith.constant 1.000000e+00 : f32
    %315 = vector.broadcast %cst_31 : f32 to vector<16x2xf32>
    %316 = arith.addf %315, %314 : vector<16x2xf32>
    %317 = arith.divf %315, %316 : vector<16x2xf32>
    %318 = vector.extract_strided_slice %317 {offsets = [0, 0], sizes = [16, 1], strides = [1, 1]} : vector<16x2xf32> to vector<16x1xf32>
    %319 = vector.extract_strided_slice %317 {offsets = [0, 1], sizes = [16, 1], strides = [1, 1]} : vector<16x2xf32> to vector<16x1xf32>
    %320 = vector.extract_strided_slice %10 {offsets = [0, 9], sizes = [16, 1], strides = [1, 1]} : vector<16x16xf32> to vector<16x1xf32>
    %321 = vector.broadcast %13 : vector<1x1xf32> to vector<16x1xf32>
    %322 = arith.mulf %300, %321 : vector<16x1xf32>
    %323 = vector.broadcast %14 : vector<1x1xf32> to vector<16x1xf32>
    %324 = arith.addf %322, %323 : vector<16x1xf32>
    %325 = arith.mulf %318, %324 : vector<16x1xf32>
    %326 = arith.addf %320, %325 : vector<16x1xf32>
    %327 = math.tanh %326 : vector<16x1xf32>
    %cst_32 = arith.constant 1.000000e+00 : f32
    %328 = vector.broadcast %cst_32 : f32 to vector<16x1xf32>
    %329 = arith.subf %328, %319 : vector<16x1xf32>
    %330 = arith.mulf %329, %327 : vector<16x1xf32>
    %331 = arith.mulf %319, %300 : vector<16x1xf32>
    %332 = arith.addf %330, %331 : vector<16x1xf32>
    %c9_i32 = arith.constant 9 : i32
    %333 = vector.broadcast %c9_i32 : i32 to vector<16x16xi32>
    %334 = arith.cmpi eq, %15, %333 : vector<16x16xi32>
    %335 = vector.shape_cast %332 : vector<16x1xf32> to vector<16x1xf32>
    %336 = vector.broadcast %335 : vector<16x1xf32> to vector<16x16xf32>
    %337 = arith.select %334, %336, %305 : vector<16x16xi1>, vector<16x16xf32>
    %338 = vector.extract_strided_slice %6 {offsets = [0, 20], sizes = [16, 2], strides = [1, 1]} : vector<16x32xf32> to vector<16x2xf32>
    %339 = vector.broadcast %332 : vector<16x1xf32> to vector<16x2xf32>
    %340 = vector.broadcast %11 : vector<1x2xf32> to vector<16x2xf32>
    %341 = arith.mulf %339, %340 : vector<16x2xf32>
    %342 = arith.addf %338, %341 : vector<16x2xf32>
    %343 = vector.broadcast %12 : vector<1x2xf32> to vector<16x2xf32>
    %344 = arith.addf %342, %343 : vector<16x2xf32>
    %345 = arith.negf %344 : vector<16x2xf32>
    %346 = math.exp %345 : vector<16x2xf32>
    %cst_33 = arith.constant 1.000000e+00 : f32
    %347 = vector.broadcast %cst_33 : f32 to vector<16x2xf32>
    %348 = arith.addf %347, %346 : vector<16x2xf32>
    %349 = arith.divf %347, %348 : vector<16x2xf32>
    %350 = vector.extract_strided_slice %349 {offsets = [0, 0], sizes = [16, 1], strides = [1, 1]} : vector<16x2xf32> to vector<16x1xf32>
    %351 = vector.extract_strided_slice %349 {offsets = [0, 1], sizes = [16, 1], strides = [1, 1]} : vector<16x2xf32> to vector<16x1xf32>
    %352 = vector.extract_strided_slice %10 {offsets = [0, 10], sizes = [16, 1], strides = [1, 1]} : vector<16x16xf32> to vector<16x1xf32>
    %353 = vector.broadcast %13 : vector<1x1xf32> to vector<16x1xf32>
    %354 = arith.mulf %332, %353 : vector<16x1xf32>
    %355 = vector.broadcast %14 : vector<1x1xf32> to vector<16x1xf32>
    %356 = arith.addf %354, %355 : vector<16x1xf32>
    %357 = arith.mulf %350, %356 : vector<16x1xf32>
    %358 = arith.addf %352, %357 : vector<16x1xf32>
    %359 = math.tanh %358 : vector<16x1xf32>
    %cst_34 = arith.constant 1.000000e+00 : f32
    %360 = vector.broadcast %cst_34 : f32 to vector<16x1xf32>
    %361 = arith.subf %360, %351 : vector<16x1xf32>
    %362 = arith.mulf %361, %359 : vector<16x1xf32>
    %363 = arith.mulf %351, %332 : vector<16x1xf32>
    %364 = arith.addf %362, %363 : vector<16x1xf32>
    %c10_i32 = arith.constant 10 : i32
    %365 = vector.broadcast %c10_i32 : i32 to vector<16x16xi32>
    %366 = arith.cmpi eq, %15, %365 : vector<16x16xi32>
    %367 = vector.shape_cast %364 : vector<16x1xf32> to vector<16x1xf32>
    %368 = vector.broadcast %367 : vector<16x1xf32> to vector<16x16xf32>
    %369 = arith.select %366, %368, %337 : vector<16x16xi1>, vector<16x16xf32>
    %370 = vector.extract_strided_slice %6 {offsets = [0, 22], sizes = [16, 2], strides = [1, 1]} : vector<16x32xf32> to vector<16x2xf32>
    %371 = vector.broadcast %364 : vector<16x1xf32> to vector<16x2xf32>
    %372 = vector.broadcast %11 : vector<1x2xf32> to vector<16x2xf32>
    %373 = arith.mulf %371, %372 : vector<16x2xf32>
    %374 = arith.addf %370, %373 : vector<16x2xf32>
    %375 = vector.broadcast %12 : vector<1x2xf32> to vector<16x2xf32>
    %376 = arith.addf %374, %375 : vector<16x2xf32>
    %377 = arith.negf %376 : vector<16x2xf32>
    %378 = math.exp %377 : vector<16x2xf32>
    %cst_35 = arith.constant 1.000000e+00 : f32
    %379 = vector.broadcast %cst_35 : f32 to vector<16x2xf32>
    %380 = arith.addf %379, %378 : vector<16x2xf32>
    %381 = arith.divf %379, %380 : vector<16x2xf32>
    %382 = vector.extract_strided_slice %381 {offsets = [0, 0], sizes = [16, 1], strides = [1, 1]} : vector<16x2xf32> to vector<16x1xf32>
    %383 = vector.extract_strided_slice %381 {offsets = [0, 1], sizes = [16, 1], strides = [1, 1]} : vector<16x2xf32> to vector<16x1xf32>
    %384 = vector.extract_strided_slice %10 {offsets = [0, 11], sizes = [16, 1], strides = [1, 1]} : vector<16x16xf32> to vector<16x1xf32>
    %385 = vector.broadcast %13 : vector<1x1xf32> to vector<16x1xf32>
    %386 = arith.mulf %364, %385 : vector<16x1xf32>
    %387 = vector.broadcast %14 : vector<1x1xf32> to vector<16x1xf32>
    %388 = arith.addf %386, %387 : vector<16x1xf32>
    %389 = arith.mulf %382, %388 : vector<16x1xf32>
    %390 = arith.addf %384, %389 : vector<16x1xf32>
    %391 = math.tanh %390 : vector<16x1xf32>
    %cst_36 = arith.constant 1.000000e+00 : f32
    %392 = vector.broadcast %cst_36 : f32 to vector<16x1xf32>
    %393 = arith.subf %392, %383 : vector<16x1xf32>
    %394 = arith.mulf %393, %391 : vector<16x1xf32>
    %395 = arith.mulf %383, %364 : vector<16x1xf32>
    %396 = arith.addf %394, %395 : vector<16x1xf32>
    %c11_i32 = arith.constant 11 : i32
    %397 = vector.broadcast %c11_i32 : i32 to vector<16x16xi32>
    %398 = arith.cmpi eq, %15, %397 : vector<16x16xi32>
    %399 = vector.shape_cast %396 : vector<16x1xf32> to vector<16x1xf32>
    %400 = vector.broadcast %399 : vector<16x1xf32> to vector<16x16xf32>
    %401 = arith.select %398, %400, %369 : vector<16x16xi1>, vector<16x16xf32>
    %402 = vector.extract_strided_slice %6 {offsets = [0, 24], sizes = [16, 2], strides = [1, 1]} : vector<16x32xf32> to vector<16x2xf32>
    %403 = vector.broadcast %396 : vector<16x1xf32> to vector<16x2xf32>
    %404 = vector.broadcast %11 : vector<1x2xf32> to vector<16x2xf32>
    %405 = arith.mulf %403, %404 : vector<16x2xf32>
    %406 = arith.addf %402, %405 : vector<16x2xf32>
    %407 = vector.broadcast %12 : vector<1x2xf32> to vector<16x2xf32>
    %408 = arith.addf %406, %407 : vector<16x2xf32>
    %409 = arith.negf %408 : vector<16x2xf32>
    %410 = math.exp %409 : vector<16x2xf32>
    %cst_37 = arith.constant 1.000000e+00 : f32
    %411 = vector.broadcast %cst_37 : f32 to vector<16x2xf32>
    %412 = arith.addf %411, %410 : vector<16x2xf32>
    %413 = arith.divf %411, %412 : vector<16x2xf32>
    %414 = vector.extract_strided_slice %413 {offsets = [0, 0], sizes = [16, 1], strides = [1, 1]} : vector<16x2xf32> to vector<16x1xf32>
    %415 = vector.extract_strided_slice %413 {offsets = [0, 1], sizes = [16, 1], strides = [1, 1]} : vector<16x2xf32> to vector<16x1xf32>
    %416 = vector.extract_strided_slice %10 {offsets = [0, 12], sizes = [16, 1], strides = [1, 1]} : vector<16x16xf32> to vector<16x1xf32>
    %417 = vector.broadcast %13 : vector<1x1xf32> to vector<16x1xf32>
    %418 = arith.mulf %396, %417 : vector<16x1xf32>
    %419 = vector.broadcast %14 : vector<1x1xf32> to vector<16x1xf32>
    %420 = arith.addf %418, %419 : vector<16x1xf32>
    %421 = arith.mulf %414, %420 : vector<16x1xf32>
    %422 = arith.addf %416, %421 : vector<16x1xf32>
    %423 = math.tanh %422 : vector<16x1xf32>
    %cst_38 = arith.constant 1.000000e+00 : f32
    %424 = vector.broadcast %cst_38 : f32 to vector<16x1xf32>
    %425 = arith.subf %424, %415 : vector<16x1xf32>
    %426 = arith.mulf %425, %423 : vector<16x1xf32>
    %427 = arith.mulf %415, %396 : vector<16x1xf32>
    %428 = arith.addf %426, %427 : vector<16x1xf32>
    %c12_i32 = arith.constant 12 : i32
    %429 = vector.broadcast %c12_i32 : i32 to vector<16x16xi32>
    %430 = arith.cmpi eq, %15, %429 : vector<16x16xi32>
    %431 = vector.shape_cast %428 : vector<16x1xf32> to vector<16x1xf32>
    %432 = vector.broadcast %431 : vector<16x1xf32> to vector<16x16xf32>
    %433 = arith.select %430, %432, %401 : vector<16x16xi1>, vector<16x16xf32>
    %434 = vector.extract_strided_slice %6 {offsets = [0, 26], sizes = [16, 2], strides = [1, 1]} : vector<16x32xf32> to vector<16x2xf32>
    %435 = vector.broadcast %428 : vector<16x1xf32> to vector<16x2xf32>
    %436 = vector.broadcast %11 : vector<1x2xf32> to vector<16x2xf32>
    %437 = arith.mulf %435, %436 : vector<16x2xf32>
    %438 = arith.addf %434, %437 : vector<16x2xf32>
    %439 = vector.broadcast %12 : vector<1x2xf32> to vector<16x2xf32>
    %440 = arith.addf %438, %439 : vector<16x2xf32>
    %441 = arith.negf %440 : vector<16x2xf32>
    %442 = math.exp %441 : vector<16x2xf32>
    %cst_39 = arith.constant 1.000000e+00 : f32
    %443 = vector.broadcast %cst_39 : f32 to vector<16x2xf32>
    %444 = arith.addf %443, %442 : vector<16x2xf32>
    %445 = arith.divf %443, %444 : vector<16x2xf32>
    %446 = vector.extract_strided_slice %445 {offsets = [0, 0], sizes = [16, 1], strides = [1, 1]} : vector<16x2xf32> to vector<16x1xf32>
    %447 = vector.extract_strided_slice %445 {offsets = [0, 1], sizes = [16, 1], strides = [1, 1]} : vector<16x2xf32> to vector<16x1xf32>
    %448 = vector.extract_strided_slice %10 {offsets = [0, 13], sizes = [16, 1], strides = [1, 1]} : vector<16x16xf32> to vector<16x1xf32>
    %449 = vector.broadcast %13 : vector<1x1xf32> to vector<16x1xf32>
    %450 = arith.mulf %428, %449 : vector<16x1xf32>
    %451 = vector.broadcast %14 : vector<1x1xf32> to vector<16x1xf32>
    %452 = arith.addf %450, %451 : vector<16x1xf32>
    %453 = arith.mulf %446, %452 : vector<16x1xf32>
    %454 = arith.addf %448, %453 : vector<16x1xf32>
    %455 = math.tanh %454 : vector<16x1xf32>
    %cst_40 = arith.constant 1.000000e+00 : f32
    %456 = vector.broadcast %cst_40 : f32 to vector<16x1xf32>
    %457 = arith.subf %456, %447 : vector<16x1xf32>
    %458 = arith.mulf %457, %455 : vector<16x1xf32>
    %459 = arith.mulf %447, %428 : vector<16x1xf32>
    %460 = arith.addf %458, %459 : vector<16x1xf32>
    %c13_i32 = arith.constant 13 : i32
    %461 = vector.broadcast %c13_i32 : i32 to vector<16x16xi32>
    %462 = arith.cmpi eq, %15, %461 : vector<16x16xi32>
    %463 = vector.shape_cast %460 : vector<16x1xf32> to vector<16x1xf32>
    %464 = vector.broadcast %463 : vector<16x1xf32> to vector<16x16xf32>
    %465 = arith.select %462, %464, %433 : vector<16x16xi1>, vector<16x16xf32>
    %466 = vector.extract_strided_slice %6 {offsets = [0, 28], sizes = [16, 2], strides = [1, 1]} : vector<16x32xf32> to vector<16x2xf32>
    %467 = vector.broadcast %460 : vector<16x1xf32> to vector<16x2xf32>
    %468 = vector.broadcast %11 : vector<1x2xf32> to vector<16x2xf32>
    %469 = arith.mulf %467, %468 : vector<16x2xf32>
    %470 = arith.addf %466, %469 : vector<16x2xf32>
    %471 = vector.broadcast %12 : vector<1x2xf32> to vector<16x2xf32>
    %472 = arith.addf %470, %471 : vector<16x2xf32>
    %473 = arith.negf %472 : vector<16x2xf32>
    %474 = math.exp %473 : vector<16x2xf32>
    %cst_41 = arith.constant 1.000000e+00 : f32
    %475 = vector.broadcast %cst_41 : f32 to vector<16x2xf32>
    %476 = arith.addf %475, %474 : vector<16x2xf32>
    %477 = arith.divf %475, %476 : vector<16x2xf32>
    %478 = vector.extract_strided_slice %477 {offsets = [0, 0], sizes = [16, 1], strides = [1, 1]} : vector<16x2xf32> to vector<16x1xf32>
    %479 = vector.extract_strided_slice %477 {offsets = [0, 1], sizes = [16, 1], strides = [1, 1]} : vector<16x2xf32> to vector<16x1xf32>
    %480 = vector.extract_strided_slice %10 {offsets = [0, 14], sizes = [16, 1], strides = [1, 1]} : vector<16x16xf32> to vector<16x1xf32>
    %481 = vector.broadcast %13 : vector<1x1xf32> to vector<16x1xf32>
    %482 = arith.mulf %460, %481 : vector<16x1xf32>
    %483 = vector.broadcast %14 : vector<1x1xf32> to vector<16x1xf32>
    %484 = arith.addf %482, %483 : vector<16x1xf32>
    %485 = arith.mulf %478, %484 : vector<16x1xf32>
    %486 = arith.addf %480, %485 : vector<16x1xf32>
    %487 = math.tanh %486 : vector<16x1xf32>
    %cst_42 = arith.constant 1.000000e+00 : f32
    %488 = vector.broadcast %cst_42 : f32 to vector<16x1xf32>
    %489 = arith.subf %488, %479 : vector<16x1xf32>
    %490 = arith.mulf %489, %487 : vector<16x1xf32>
    %491 = arith.mulf %479, %460 : vector<16x1xf32>
    %492 = arith.addf %490, %491 : vector<16x1xf32>
    %c14_i32 = arith.constant 14 : i32
    %493 = vector.broadcast %c14_i32 : i32 to vector<16x16xi32>
    %494 = arith.cmpi eq, %15, %493 : vector<16x16xi32>
    %495 = vector.shape_cast %492 : vector<16x1xf32> to vector<16x1xf32>
    %496 = vector.broadcast %495 : vector<16x1xf32> to vector<16x16xf32>
    %497 = arith.select %494, %496, %465 : vector<16x16xi1>, vector<16x16xf32>
    %498 = vector.extract_strided_slice %6 {offsets = [0, 30], sizes = [16, 2], strides = [1, 1]} : vector<16x32xf32> to vector<16x2xf32>
    %499 = vector.broadcast %492 : vector<16x1xf32> to vector<16x2xf32>
    %500 = vector.broadcast %11 : vector<1x2xf32> to vector<16x2xf32>
    %501 = arith.mulf %499, %500 : vector<16x2xf32>
    %502 = arith.addf %498, %501 : vector<16x2xf32>
    %503 = vector.broadcast %12 : vector<1x2xf32> to vector<16x2xf32>
    %504 = arith.addf %502, %503 : vector<16x2xf32>
    %505 = arith.negf %504 : vector<16x2xf32>
    %506 = math.exp %505 : vector<16x2xf32>
    %cst_43 = arith.constant 1.000000e+00 : f32
    %507 = vector.broadcast %cst_43 : f32 to vector<16x2xf32>
    %508 = arith.addf %507, %506 : vector<16x2xf32>
    %509 = arith.divf %507, %508 : vector<16x2xf32>
    %510 = vector.extract_strided_slice %509 {offsets = [0, 0], sizes = [16, 1], strides = [1, 1]} : vector<16x2xf32> to vector<16x1xf32>
    %511 = vector.extract_strided_slice %509 {offsets = [0, 1], sizes = [16, 1], strides = [1, 1]} : vector<16x2xf32> to vector<16x1xf32>
    %512 = vector.extract_strided_slice %10 {offsets = [0, 15], sizes = [16, 1], strides = [1, 1]} : vector<16x16xf32> to vector<16x1xf32>
    %513 = vector.broadcast %13 : vector<1x1xf32> to vector<16x1xf32>
    %514 = arith.mulf %492, %513 : vector<16x1xf32>
    %515 = vector.broadcast %14 : vector<1x1xf32> to vector<16x1xf32>
    %516 = arith.addf %514, %515 : vector<16x1xf32>
    %517 = arith.mulf %510, %516 : vector<16x1xf32>
    %518 = arith.addf %512, %517 : vector<16x1xf32>
    %519 = math.tanh %518 : vector<16x1xf32>
    %cst_44 = arith.constant 1.000000e+00 : f32
    %520 = vector.broadcast %cst_44 : f32 to vector<16x1xf32>
    %521 = arith.subf %520, %511 : vector<16x1xf32>
    %522 = arith.mulf %521, %519 : vector<16x1xf32>
    %523 = arith.mulf %511, %492 : vector<16x1xf32>
    %524 = arith.addf %522, %523 : vector<16x1xf32>
    %c15_i32 = arith.constant 15 : i32
    %525 = vector.broadcast %c15_i32 : i32 to vector<16x16xi32>
    %526 = arith.cmpi eq, %15, %525 : vector<16x16xi32>
    %527 = vector.shape_cast %524 : vector<16x1xf32> to vector<16x1xf32>
    %528 = vector.broadcast %527 : vector<16x1xf32> to vector<16x16xf32>
    %529 = arith.select %526, %528, %497 : vector<16x16xi1>, vector<16x16xf32>
    %530 = vector.extract_strided_slice %2 {offsets = [0, 48], sizes = [16, 48], strides = [1, 1]} : vector<16x99xf32> to vector<16x48xf32>
    %531 = vector.extract_strided_slice %2 {offsets = [0, 96], sizes = [16, 3], strides = [1, 1]} : vector<16x99xf32> to vector<16x3xf32>
    %c5_45 = arith.constant 5 : index
    %c0_46 = arith.constant 0 : index
    %532 = vector.load %arg5[%c5_45, %c0_46] : memref<8x128xf32, #tpu.memory_space<vmem>>, vector<3x48xf32>
    %cst_47 = arith.constant dense<0.000000e+00> : vector<3x16xf32>
    %533 = tpu.matmul %532, %530, %cst_47 {dimension_numbers = #tpu.dot_dimension_numbers<[1], [1], [0], [0], [0, 0, 1, 0], [], []>} : vector<3x48xf32>, vector<16x48xf32>, vector<3x16xf32> -> vector<3x16xf32>
    %c0_48 = arith.constant 0 : index
    %c0_49 = arith.constant 0 : index
    %534 = vector.load %arg2[%c0_48, %c0_49] : memref<16x16xf32, #tpu.memory_space<vmem>>, vector<16x16xf32>
    %cst_50 = arith.constant 5.000000e-01 : f32
    %535 = vector.broadcast %cst_50 : f32 to vector<16x16xf32>
    %536 = arith.cmpf ogt, %534, %535 : vector<16x16xf32>
    %cst_51 = arith.constant 0.000000e+00 : f32
    %537 = vector.broadcast %cst_51 : f32 to vector<16x16xf32>
    %538 = vector.extract_strided_slice %531 {offsets = [0, 0], sizes = [16, 1], strides = [1, 1]} : vector<16x3xf32> to vector<16x1xf32>
    %539 = vector.extract_strided_slice %533 {offsets = [0, 0], sizes = [1, 16], strides = [1, 1]} : vector<3x16xf32> to vector<1x16xf32>
    %540 = vector.broadcast %538 : vector<16x1xf32> to vector<16x16xf32>
    %541 = vector.broadcast %539 : vector<1x16xf32> to vector<16x16xf32>
    %542 = arith.addf %540, %541 : vector<16x16xf32>
    %cst_52 = arith.constant 0.000000e+00 : f32
    %543 = vector.broadcast %cst_52 : f32 to vector<16x16xf32>
    %544 = arith.cmpf oge, %542, %543 : vector<16x16xf32>
    %cst_53 = arith.constant 2.000000e-01 : f32
    %545 = vector.broadcast %cst_53 : f32 to vector<16x16xf32>
    %546 = arith.mulf %545, %542 : vector<16x16xf32>
    %547 = arith.select %544, %542, %546 : vector<16x16xi1>, vector<16x16xf32>
    %cst_54 = arith.constant -1.000000e+30 : f32
    %548 = vector.broadcast %cst_54 : f32 to vector<16x16xf32>
    %549 = arith.select %536, %547, %548 : vector<16x16xi1>, vector<16x16xf32>
    %cst_55 = arith.constant dense<0xFF800000> : vector<16xf32>
    %550 = vector.multi_reduction <maximumf>, %549, %cst_55 [1] : vector<16x16xf32> to vector<16xf32>
    %551 = vector.shape_cast %550 : vector<16xf32> to vector<16x1xf32>
    %552 = vector.broadcast %551 : vector<16x1xf32> to vector<16x16xf32>
    %553 = arith.subf %549, %552 : vector<16x16xf32>
    %554 = math.exp %553 : vector<16x16xf32>
    %cst_56 = arith.constant dense<0.000000e+00> : vector<16xf32>
    %555 = vector.multi_reduction <add>, %554, %cst_56 [1] : vector<16x16xf32> to vector<16xf32>
    %556 = vector.shape_cast %555 : vector<16xf32> to vector<16x1xf32>
    %557 = tpu.reciprocal %556 {approx = true} : vector<16x1xf32> -> vector<16x1xf32>
    %558 = vector.broadcast %557 : vector<16x1xf32> to vector<16x16xf32>
    %559 = arith.mulf %554, %558 : vector<16x16xf32>
    %560 = vector.extract_strided_slice %530 {offsets = [0, 0], sizes = [16, 16], strides = [1, 1]} : vector<16x48xf32> to vector<16x16xf32>
    %cst_57 = arith.constant dense<0.000000e+00> : vector<16x16xf32>
    %561 = tpu.matmul %559, %560, %cst_57 {dimension_numbers = #tpu.dot_dimension_numbers<[1], [0], [0], [1], [0, 0, 1, 1], [], []>} : vector<16x16xf32>, vector<16x16xf32>, vector<16x16xf32> -> vector<16x16xf32>
    %562 = arith.addf %537, %561 : vector<16x16xf32>
    %563 = vector.extract_strided_slice %531 {offsets = [0, 1], sizes = [16, 1], strides = [1, 1]} : vector<16x3xf32> to vector<16x1xf32>
    %564 = vector.extract_strided_slice %533 {offsets = [1, 0], sizes = [1, 16], strides = [1, 1]} : vector<3x16xf32> to vector<1x16xf32>
    %565 = vector.broadcast %563 : vector<16x1xf32> to vector<16x16xf32>
    %566 = vector.broadcast %564 : vector<1x16xf32> to vector<16x16xf32>
    %567 = arith.addf %565, %566 : vector<16x16xf32>
    %cst_58 = arith.constant 0.000000e+00 : f32
    %568 = vector.broadcast %cst_58 : f32 to vector<16x16xf32>
    %569 = arith.cmpf oge, %567, %568 : vector<16x16xf32>
    %cst_59 = arith.constant 2.000000e-01 : f32
    %570 = vector.broadcast %cst_59 : f32 to vector<16x16xf32>
    %571 = arith.mulf %570, %567 : vector<16x16xf32>
    %572 = arith.select %569, %567, %571 : vector<16x16xi1>, vector<16x16xf32>
    %cst_60 = arith.constant -1.000000e+30 : f32
    %573 = vector.broadcast %cst_60 : f32 to vector<16x16xf32>
    %574 = arith.select %536, %572, %573 : vector<16x16xi1>, vector<16x16xf32>
    %cst_61 = arith.constant dense<0xFF800000> : vector<16xf32>
    %575 = vector.multi_reduction <maximumf>, %574, %cst_61 [1] : vector<16x16xf32> to vector<16xf32>
    %576 = vector.shape_cast %575 : vector<16xf32> to vector<16x1xf32>
    %577 = vector.broadcast %576 : vector<16x1xf32> to vector<16x16xf32>
    %578 = arith.subf %574, %577 : vector<16x16xf32>
    %579 = math.exp %578 : vector<16x16xf32>
    %cst_62 = arith.constant dense<0.000000e+00> : vector<16xf32>
    %580 = vector.multi_reduction <add>, %579, %cst_62 [1] : vector<16x16xf32> to vector<16xf32>
    %581 = vector.shape_cast %580 : vector<16xf32> to vector<16x1xf32>
    %582 = tpu.reciprocal %581 {approx = true} : vector<16x1xf32> -> vector<16x1xf32>
    %583 = vector.broadcast %582 : vector<16x1xf32> to vector<16x16xf32>
    %584 = arith.mulf %579, %583 : vector<16x16xf32>
    %585 = vector.extract_strided_slice %530 {offsets = [0, 16], sizes = [16, 16], strides = [1, 1]} : vector<16x48xf32> to vector<16x16xf32>
    %cst_63 = arith.constant dense<0.000000e+00> : vector<16x16xf32>
    %586 = tpu.matmul %584, %585, %cst_63 {dimension_numbers = #tpu.dot_dimension_numbers<[1], [0], [0], [1], [0, 0, 1, 1], [], []>} : vector<16x16xf32>, vector<16x16xf32>, vector<16x16xf32> -> vector<16x16xf32>
    %587 = arith.addf %562, %586 : vector<16x16xf32>
    %588 = vector.extract_strided_slice %531 {offsets = [0, 2], sizes = [16, 1], strides = [1, 1]} : vector<16x3xf32> to vector<16x1xf32>
    %589 = vector.extract_strided_slice %533 {offsets = [2, 0], sizes = [1, 16], strides = [1, 1]} : vector<3x16xf32> to vector<1x16xf32>
    %590 = vector.broadcast %588 : vector<16x1xf32> to vector<16x16xf32>
    %591 = vector.broadcast %589 : vector<1x16xf32> to vector<16x16xf32>
    %592 = arith.addf %590, %591 : vector<16x16xf32>
    %cst_64 = arith.constant 0.000000e+00 : f32
    %593 = vector.broadcast %cst_64 : f32 to vector<16x16xf32>
    %594 = arith.cmpf oge, %592, %593 : vector<16x16xf32>
    %cst_65 = arith.constant 2.000000e-01 : f32
    %595 = vector.broadcast %cst_65 : f32 to vector<16x16xf32>
    %596 = arith.mulf %595, %592 : vector<16x16xf32>
    %597 = arith.select %594, %592, %596 : vector<16x16xi1>, vector<16x16xf32>
    %cst_66 = arith.constant -1.000000e+30 : f32
    %598 = vector.broadcast %cst_66 : f32 to vector<16x16xf32>
    %599 = arith.select %536, %597, %598 : vector<16x16xi1>, vector<16x16xf32>
    %cst_67 = arith.constant dense<0xFF800000> : vector<16xf32>
    %600 = vector.multi_reduction <maximumf>, %599, %cst_67 [1] : vector<16x16xf32> to vector<16xf32>
    %601 = vector.shape_cast %600 : vector<16xf32> to vector<16x1xf32>
    %602 = vector.broadcast %601 : vector<16x1xf32> to vector<16x16xf32>
    %603 = arith.subf %599, %602 : vector<16x16xf32>
    %604 = math.exp %603 : vector<16x16xf32>
    %cst_68 = arith.constant dense<0.000000e+00> : vector<16xf32>
    %605 = vector.multi_reduction <add>, %604, %cst_68 [1] : vector<16x16xf32> to vector<16xf32>
    %606 = vector.shape_cast %605 : vector<16xf32> to vector<16x1xf32>
    %607 = tpu.reciprocal %606 {approx = true} : vector<16x1xf32> -> vector<16x1xf32>
    %608 = vector.broadcast %607 : vector<16x1xf32> to vector<16x16xf32>
    %609 = arith.mulf %604, %608 : vector<16x16xf32>
    %610 = vector.extract_strided_slice %530 {offsets = [0, 32], sizes = [16, 16], strides = [1, 1]} : vector<16x48xf32> to vector<16x16xf32>
    %cst_69 = arith.constant dense<0.000000e+00> : vector<16x16xf32>
    %611 = tpu.matmul %609, %610, %cst_69 {dimension_numbers = #tpu.dot_dimension_numbers<[1], [0], [0], [1], [0, 0, 1, 1], [], []>} : vector<16x16xf32>, vector<16x16xf32>, vector<16x16xf32> -> vector<16x16xf32>
    %612 = arith.addf %587, %611 : vector<16x16xf32>
    %cst_70 = arith.constant 0.333333343 : f32
    %613 = vector.broadcast %cst_70 : f32 to vector<16x16xf32>
    %614 = arith.mulf %612, %613 : vector<16x16xf32>
    %c1 = arith.constant 1 : index
    %c0_71 = arith.constant 0 : index
    %615 = vector.load %arg5[%c1, %c0_71] : memref<8x128xf32, #tpu.memory_space<vmem>>, vector<1x16xf32>
    %616 = vector.broadcast %615 : vector<1x16xf32> to vector<16x16xf32>
    %617 = arith.addf %614, %616 : vector<16x16xf32>
    %c2_72 = arith.constant 2 : index
    %c0_73 = arith.constant 0 : index
    %618 = vector.load %arg5[%c2_72, %c0_73] : memref<8x128xf32, #tpu.memory_space<vmem>>, vector<1x16xf32>
    %619 = arith.negf %618 : vector<1x16xf32>
    %620 = math.exp %619 : vector<1x16xf32>
    %cst_74 = arith.constant 1.000000e+00 : f32
    %621 = vector.broadcast %cst_74 : f32 to vector<1x16xf32>
    %622 = arith.addf %621, %620 : vector<1x16xf32>
    %623 = arith.divf %621, %622 : vector<1x16xf32>
    %624 = vector.broadcast %623 : vector<1x16xf32> to vector<16x16xf32>
    %625 = arith.mulf %624, %617 : vector<16x16xf32>
    %cst_75 = arith.constant 1.000000e+00 : f32
    %626 = vector.broadcast %cst_75 : f32 to vector<1x16xf32>
    %627 = arith.subf %626, %623 : vector<1x16xf32>
    %628 = vector.broadcast %627 : vector<1x16xf32> to vector<16x16xf32>
    %629 = arith.mulf %628, %529 : vector<16x16xf32>
    %630 = arith.addf %625, %629 : vector<16x16xf32>
    %c0_76 = arith.constant 0 : index
    %c0_77 = arith.constant 0 : index
    %631 = vector.load %arg4[%c0_76, %c0_77] : memref<16x32xf32, #tpu.memory_space<vmem>>, vector<16x32xf32>
    %cst_78 = arith.constant dense<0.000000e+00> : vector<16x32xf32>
    %632 = tpu.matmul %630, %631, %cst_78 {dimension_numbers = #tpu.dot_dimension_numbers<[1], [0], [0], [1], [0, 0, 1, 1], [], []>} : vector<16x16xf32>, vector<16x32xf32>, vector<16x32xf32> -> vector<16x32xf32>
    %c3 = arith.constant 3 : index
    %c0_79 = arith.constant 0 : index
    %633 = vector.load %arg5[%c3, %c0_79] : memref<8x128xf32, #tpu.memory_space<vmem>>, vector<1x32xf32>
    %634 = vector.broadcast %633 : vector<1x32xf32> to vector<16x32xf32>
    %635 = arith.addf %632, %634 : vector<16x32xf32>
    %c0_80 = arith.constant 0 : index
    %c0_81 = arith.constant 0 : index
    %636 = vector.load %arg6[%c0_80, %c0_81] : memref<16x32xf32, #tpu.memory_space<vmem>>, vector<16x32xf32>
    tpu.vector_store %arg6[%c0_80, %c0_81], %635 {strides = array<i32>} : memref<16x32xf32, #tpu.memory_space<vmem>>, vector<16x32xf32>,
    return
  }
  func.func @transform_0(%arg0: i32) -> (i32, i32) {
    %c0_i32 = arith.constant 0 : i32
    %c0_i32_0 = arith.constant 0 : i32
    %c0_i32_1 = arith.constant 0 : i32
    return %c0_i32, %c0_i32_0 : i32, i32
  }
  func.func @transform_1(%arg0: i32) -> (i32, i32) {
    %c0_i32 = arith.constant 0 : i32
    %c0_i32_0 = arith.constant 0 : i32
    %c0_i32_1 = arith.constant 0 : i32
    return %c0_i32, %c0_i32_0 : i32, i32
  }
  func.func @transform_2(%arg0: i32) -> (i32, i32) {
    %c0_i32 = arith.constant 0 : i32
    %c0_i32_0 = arith.constant 0 : i32
    %c0_i32_1 = arith.constant 0 : i32
    return %c0_i32, %c0_i32_0 : i32, i32
  }
  func.func @transform_3(%arg0: i32) -> (i32, i32) {
    %c0_i32 = arith.constant 0 : i32
    %c0_i32_0 = arith.constant 0 : i32
    %c0_i32_1 = arith.constant 0 : i32
    return %c0_i32, %c0_i32_0 : i32, i32
  }
  func.func @transform_4(%arg0: i32) -> (i32, i32) {
    %c0_i32 = arith.constant 0 : i32
    %c0_i32_0 = arith.constant 0 : i32
    %c0_i32_1 = arith.constant 0 : i32
    return %c0_i32, %c0_i32_0 : i32, i32
  }
  func.func @transform_5(%arg0: i32) -> (i32, i32) {
    %c0_i32 = arith.constant 0 : i32
    %c0_i32_0 = arith.constant 0 : i32
    %c0_i32_1 = arith.constant 0 : i32
    return %c0_i32, %c0_i32_0 : i32, i32
  }
}

</mosaic_0001>

<bundles_post_ra>
// kernel: _lambda_.1
= control target key start
LH: loop header
LB: loop body
LE: loop exit
PB: predicated region body
PF: predicated region fallthrough
CT: control target
= control target key end

     0   :  { %v2735_v1 = vmov 0.0   ;;  %vm2736_vm0 = vmmov 0   ;;  %s3588_s0 = inlined_call_operand.vmem [shape: bf16[16,64], index: 0, kind: input, shape index: {}]   ;;  %s3589_s1 = inlined_call_operand.vmem [shape: f32[16,16], index: 1, kind: input, shape index: {}]   ;;  %s3590_s2 = inlined_call_operand.vmem [shape: bf16[64,99], index: 2, kind: input, shape index: {}]   ;;  %s3591_s3 = inlined_call_operand.vmem [shape: f32[16,32], index: 3, kind: input, shape index: {}]   ;;  %s3592_s4 = inlined_call_operand.vmem [shape: f32[8,128], index: 4, kind: input, shape index: {}]   ;;  %s3593_s5 = inlined_call_operand.hbm [shape: f32[16,32], index: 5, kind: output, shape index: {}]  }
   0x1   :  { %v2484_v0 = vld [vmem:[%s3590_s2] sm:$0xff]   ;;  %2281 = vmatprep.subr.bf16.mxu0 %v2735_v1  ;;  %v2485_v2 = vld [vmem:[%s3590_s2 + $0x8] sm:$0xff]   ;;  %2289 = vmatprep.mubr.msk.bf16.mxu0 %vm2736_vm0, %v2735_v1 }
   0x2   :  { %2282 = vmatpush3.bf16.msra.mxu0 %v2484_v0  ;;  %2297 = vmatprep.mubr.msk.f32.mxu1 %vm2736_vm0, %v2735_v1  ;;  %v2853_v3 = vld [vmem:[%s3592_s4 + $0x4] ss:$0 sm:$0xff] }
   0x3   :  { %2283 = vmatprep.subr.bf16.mxu0 %v2735_v1 }
   0x4   :  { %10 = vsyncpa [#allocation3], 0  ;;  %v2486_v4 = vld [vmem:[%s3590_s2 + $0x10] sm:$0xff]   ;;  %s2737_s26 = smov 127   ;;  %v2487_v5 = vld [vmem:[%s3590_s2 + $0x18] sm:$0xff]   ;;  %s2738_s29 = smov 126  }
   0x5   :  { %141 = vrot.lane.b32.xlu0 %v2853_v3, %s2737_s26  ;;  %v2488_v6 = vld [vmem:[%s3588_s0] sm:$0xff]   ;;  %vm61_vm1 = vcmask 523264   ;;  %v120_v7 = vmul.f32 0.0, %v2853_v3  ;;  %s2739_s7 = smov 124   ;;  %s2740_s0 = smov 32   ;;  %v2741_v38 = vmov 1  }
   0x6   :  { %2284 = vmatpush3.bf16.msra.mxu0 %v2485_v2  ;;  %v2209_v10 = vld [vmem:[%s3592_s4] ss:$0 sm:$0xff]  ;;  %2431 = vset.pattern.permute.xlu1 %v2741_v38  ;;  %s2742_s9 = smov 97   ;;  %s2743_s10 = smov 125   ;;  %vm1591_vm2 = vcmask 392192  }
   0x7   :  { %2285 = vmatprep.subr.bf16.mxu0 %v2735_v1  ;;  %2432 = vset.pattern.permute.xlu0 %v2741_v38  ;;  %s2744_s11 = smov 2   ;;  %s2745_s12 = smov 1   ;;  %vm2330_vm3 = vmpackc.low %vm1591_vm2, %vm1591_vm2 }
   0x8   :  { %s2746_s13 = smov 31   ;;  %s2748_s14 = smov 98  }
   0x9   :  { %124 = vrot.lane.b32.xlu0 %v2853_v3, %s2738_s29  ;;  %s2749_s15 = smov 4   ;;  %s2750_s16 = smov 30  }
   0xa   :  { %2286 = vmatpush3.bf16.msra.mxu0 %v2486_v4  ;;  %s2752_s17 = smov 99   ;;  %s2753_s18 = smov 6  }
   0xb   :  { %2287 = vmatprep.subr.bf16.mxu0 %v2735_v1  ;;  %s2754_s19 = smov 29   ;;  %s2756_s20 = smov 100  }
   0xc   :  { %s2757_s21 = smov 3   ;;  %s2758_s22 = smov 8  }
   0xd   :  { %s2759_s23 = smov 28   ;;  %s2761_s24 = smov 101  }
   0xe   :  { %2288 = vmatpush3.bf16.msra.mxu0 %v2487_v5  ;;  %s2762_s25 = smov 5   ;;  %s2763_s26 = smov 10  }
   0xf   :  { %s2764_s27 = smov 27   ;;  %s2766_s28 = smov 102  }
  0x10   :  { %s2767_s29 = smov 7   ;;  %s2768_s30 = smov 12  }
  0x11   :  { %2290 = vmatmul.mubr.msk.bf16.vlgmr.msra.gmra.mrb[0].mxu0 %vm61_vm1, %v2488_v6  ;;  %s2769_s6 = smov 26   ;;  %s2796_s2 = smov 19  }
  0x12   :  { %s2798_s8 = smov 109  }
  0x77   :  { %v2867_v8 = vpop.permute.xlu0 %141 }
  0x78   :  { %v144_v9 = vadd.f32 %v2867_v8, %v120_v7 }
  0x7a   :  { %146 = vrot.lane.b32.xlu1 %v144_v9, %s2739_s7 }
  0x7b   :  { %v2881_v15 = vpop.permute.xlu0 %124 }
  0xe4   :  { %v2874_v11 = vpop.f32.mrb[0].mxu0 }
  0xe5   :  { %v2877_v12 = vadd.f32 %v2209_v10, %v2874_v11  ;;  %v2291_v13 = vpop.f32.mrb[1].mxu0 }
  0xe6   :  { %v2879_v14 = vpop.f32.mrb[2].mxu0 }
  0xe7   :  { %v2884_v16 = vadd.f32 %v2209_v10, %v2879_v14  ;;  %v2292_v17 = vpop.f32.mrb[3].mxu0  ;;  %v121_v18 = vadd.f32 %v120_v7, %v2877_v12  ;;  %v2889_v19 = vpack.i.bf16 %v2879_v14, %v2874_v11 }
  0xe9   :  { %v122_v20 = vadd.f32 %v120_v7, %v2884_v16  ;;  %v127_v21 = vadd.f32 %v2881_v15, %v121_v18 }
  0xeb   :  { %v128_v22 = vadd.f32 %v2881_v15, %v122_v20  ;;  %v2211_v23 = vmul.f32 -1.442695, %v127_v21 }
  0xec   :  { %v147_v29 = vpop.permute.xlu1 %146 }
  0xed   :  { %2489 = vpow2.f32 %v2211_v23  ;;  %v2212_v24 = vmul.f32 -1.442695, %v128_v22 }
  0xef   :  { %2491 = vpow2.f32 %v2212_v24 }
  0xf7   :  { %v2490_v25 = vpop.eup %2489 }
  0xf8   :  { %v135_v26 = vadd.f32 1.0, %v2490_v25 }
  0xf9   :  { %v2492_v27 = vpop.eup %2491 }
  0xfa   :  { %v136_v28 = vadd.f32 1.0, %v2492_v27  ;;  %2493 = vrcp.f32 %v135_v26  ;;  %v2747_v27 = vmov 3  }
  0xfc   :  { %2495 = vrcp.f32 %v136_v28 }
 0x104   :  { %v2494_v30 = vpop.eup %2493 }
 0x105   :  { %v149_v31 = vmul.f32 %v2494_v30, %v147_v29  ;;  %v163_v41 = vsub.f32 1.0, %v2494_v30  ;;  %v175_v43 = vmul.f32 0.0, %v2494_v30 }
 0x106   :  { %v2496_v32 = vpop.eup %2495 }
 0x107   :  { %v150_v33 = vmul.f32 %v2496_v32, %v147_v29  ;;  %153 = vrot.lane.b32.xlu1 %v149_v31, %s2740_s0  ;;  %v164_v45 = vsub.f32 1.0, %v2496_v32  ;;  %v176_v48 = vmul.f32 0.0, %v2496_v32 }
 0x109   :  { %155 = vrot.lane.b32.xlu0 %v150_v33, %s2740_s0  ;;  %s2772_s0 = smov 9  }
 0x179   :  { %v154_v34 = vpop.permute.xlu1 %153 }
 0x17a   :  { %v159_v35 = vadd.f32 %v154_v34, %v2877_v12 }
 0x17b   :  { %v156_v36 = vpop.permute.xlu0 %155 }
 0x17c   :  { %2497 = vtanh.f32 %v159_v35  ;;  %v160_v37 = vadd.f32 %v156_v36, %v2884_v16 }
 0x17e   :  { %2499 = vtanh.f32 %v160_v37 }
 0x186   :  { %v2498_v39 = vpop.eup %2497 }
 0x187   :  { %167 = vrot.lane.b32.xlu1 %v2498_v39, %s2742_s9 }
 0x188   :  { %v2500_v40 = vpop.eup %2499 }
 0x189   :  { %169 = vrot.lane.b32.xlu0 %v2500_v40, %s2742_s9  ;;  %s2773_s9 = smov 14  }
 0x1f9   :  { %v168_v42 = vpop.permute.xlu1 %167 }
 0x1fa   :  { %v173_v44 = vmul.f32 %v168_v42, %v163_v41 }
 0x1fb   :  { %v170_v46 = vpop.permute.xlu0 %169 }
 0x1fc   :  { %v177_v47 = vadd.f32 %v175_v43, %v173_v44  ;;  %v174_v49 = vmul.f32 %v170_v46, %v164_v45 }
 0x1fe   :  { %v178_v50 = vadd.f32 %v176_v48, %v174_v49  ;;  %182 = vperm.xlu1 %2431, %v177_v47  }
 0x200   :  { %187 = vperm.xlu0 %2432, %v178_v50  }
 0x202   :  { %218 = vrot.lane.b32.xlu1 %v2853_v3, %s2743_s10  ;;  %s2774_s10 = smov 25  }
 0x203   :  { %2434 = vset.pattern.permute.xlu1 %v2747_v27 }
 0x204   :  { %2433 = vset.pattern.permute.xlu0 %v2747_v27 }
 0x206   :  { %223 = vrot.lane.b32.xlu1 %v2853_v3, %s2739_s7  ;;  %s2771_s7 = smov 103  }
 0x27d   :  { %v2899_v51 = vpop.permute.xlu1 %182 }
 0x27e   :  { %v192_v52 = vmul.f32 %v2853_v3, %v2899_v51 }
 0x27f   :  { %v2903_v53 = vpop.permute.xlu0 %187 }
 0x280   :  { %v193_v54 = vmul.f32 %v2853_v3, %v2903_v53  ;;  %196 = vrot.lane.b32.xlu0 %v192_v52, %s2744_s11 }
 0x281   :  { %v219_v55 = vpop.permute.xlu1 %218 }
 0x282   :  { %198 = vrot.lane.b32.xlu1 %v193_v54, %s2744_s11  ;;  %v221_v56 = vmul.f32 %v219_v55, %v177_v47  ;;  %v222_v57 = vmul.f32 %v219_v55, %v178_v50 }
 0x285   :  { %v224_v58 = vpop.permute.xlu1 %223 }
 0x286   :  { %v226_v59 = vadd.f32 %v224_v58, %v221_v56  ;;  %v227_v60 = vadd.f32 %v224_v58, %v222_v57 }
 0x288   :  { %230 = vrot.lane.b32.xlu0 %v226_v59, %s2745_s12  ;;  %232 = vrot.lane.b32.xlu1 %v227_v60, %s2745_s12 }
 0x2f2   :  { %v197_v61 = vpop.permute.xlu0 %196 }
 0x2f3   :  { %v202_v62 = vadd.f32 %v197_v61, %v2877_v12 }
 0x2f4   :  { %v199_v63 = vpop.permute.xlu1 %198 }
 0x2f5   :  { %v204_v0 = vadd.f32 %v2853_v3, %v202_v62  ;;  %v203_v1 = vadd.f32 %v199_v63, %v2884_v16 }
 0x2f7   :  { %v2213_v2 = vmul.f32 -1.442695, %v204_v0  ;;  %v205_v4 = vadd.f32 %v2853_v3, %v203_v1 }
 0x2f9   :  { %2501 = vpow2.f32 %v2213_v2  ;;  %v2214_v5 = vmul.f32 -1.442695, %v205_v4 }
 0x2fa   :  { %v231_v17 = vpop.permute.xlu0 %230  ;;  %v233_v21 = vpop.permute.xlu1 %232 }
 0x2fb   :  { %2503 = vpow2.f32 %v2214_v5 }
 0x303   :  { %v2502_v6 = vpop.eup %2501 }
 0x304   :  { %v212_v7 = vadd.f32 1.0, %v2502_v6 }
 0x305   :  { %v2504_v9 = vpop.eup %2503 }
 0x306   :  { %2505 = vrcp.f32 %v212_v7  ;;  %v213_v10 = vadd.f32 1.0, %v2504_v9 }
 0x308   :  { %2507 = vrcp.f32 %v213_v10 }
 0x310   :  { %v2506_v13 = vpop.eup %2505 }
 0x311   :  { %v236_v18 = vmul.f32 %v2506_v13, %v231_v17  ;;  %v250_v31 = vsub.f32 1.0, %v2506_v13 }
 0x312   :  { %v2508_v20 = vpop.eup %2507 }
 0x313   :  { %v237_v22 = vmul.f32 %v2508_v20, %v233_v21  ;;  %240 = vrot.lane.b32.xlu0 %v236_v18, %s2746_s13  ;;  %v251_v37 = vsub.f32 1.0, %v2508_v20 }
 0x315   :  { %242 = vrot.lane.b32.xlu1 %v237_v22, %s2746_s13  ;;  %s2776_s13 = smov 104  }
 0x319   :  { %262 = vrot.lane.b32.xlu1 %v177_v47, %s2744_s11 }
 0x31d   :  { %264 = vrot.lane.b32.xlu1 %v178_v50, %s2744_s11 }
 0x385   :  { %v241_v23 = vpop.permute.xlu0 %240 }
 0x386   :  { %v246_v24 = vadd.f32 %v241_v23, %v2877_v12 }
 0x387   :  { %v243_v25 = vpop.permute.xlu1 %242 }
 0x388   :  { %2509 = vtanh.f32 %v246_v24  ;;  %v247_v26 = vadd.f32 %v243_v25, %v2884_v16 }
 0x38a   :  { %2511 = vtanh.f32 %v247_v26 }
 0x38b   :  { %v263_v30 = vpop.permute.xlu1 %262 }
 0x38c   :  { %v268_v33 = vmul.f32 %v2506_v13, %v263_v30  ;;  %v2751_v13 = vmov 5  }
 0x38f   :  { %v265_v35 = vpop.permute.xlu1 %264 }
 0x390   :  { %v269_v39 = vmul.f32 %v2508_v20, %v265_v35 }
 0x392   :  { %v2510_v28 = vpop.eup %2509 }
 0x393   :  { %254 = vrot.lane.b32.xlu0 %v2510_v28, %s2748_s14 }
 0x394   :  { %v2512_v29 = vpop.eup %2511 }
 0x397   :  { %256 = vrot.lane.b32.xlu0 %v2512_v29, %s2748_s14  ;;  %s2777_s14 = smov 11  }
 0x405   :  { %v255_v32 = vpop.permute.xlu0 %254 }
 0x406   :  { %v260_v34 = vmul.f32 %v255_v32, %v250_v31 }
 0x408   :  { %v270_v36 = vadd.f32 %v268_v33, %v260_v34 }
 0x409   :  { %v257_v38 = vpop.permute.xlu0 %256 }
 0x40a   :  { %v261_v40 = vmul.f32 %v257_v38, %v251_v37  ;;  %275 = vperm.xlu0 %2433, %v270_v36   ;;  %v314_v46 = vmul.f32 %v270_v36, %v2867_v8 }
 0x40c   :  { %v271_v41 = vadd.f32 %v269_v39, %v261_v40  ;;  %v316_v48 = vadd.f32 %v314_v46, %v2881_v15 }
 0x40e   :  { %280 = vperm.xlu1 %2434, %v271_v41   ;;  %v315_v47 = vmul.f32 %v271_v41, %v2867_v8  ;;  %2435 = vset.pattern.permute.xlu0 %v2751_v13 }
 0x410   :  { %v317_v49 = vadd.f32 %v315_v47, %v2881_v15 }
 0x412   :  { %2436 = vset.pattern.permute.xlu1 %v2751_v13 }
 0x489   :  { %v2919_v42 = vpop.permute.xlu0 %275 }
 0x48a   :  { %v285_v43 = vmul.f32 %v2853_v3, %v2919_v42 }
 0x48c   :  { %289 = vrot.lane.b32.xlu1 %v285_v43, %s2749_s15 }
 0x48d   :  { %v2924_v44 = vpop.permute.xlu1 %280 }
 0x48e   :  { %v286_v45 = vmul.f32 %v2853_v3, %v2924_v44 }
 0x490   :  { %297 = vrot.lane.b32.xlu1 %v2853_v3, %s2744_s11  ;;  %291 = vrot.lane.b32.xlu0 %v286_v45, %s2749_s15 }
 0x494   :  { %320 = vrot.lane.b32.xlu0 %v316_v48, %s2745_s12  ;;  %322 = vrot.lane.b32.xlu1 %v317_v49, %s2745_s12 }
 0x4fe   :  { %v290_v50 = vpop.permute.xlu1 %289 }
 0x4ff   :  { %v295_v52 = vadd.f32 %v290_v50, %v2877_v12 }
 0x502   :  { %v292_v54 = vpop.permute.xlu0 %291  ;;  %v2938_v55 = vpop.permute.xlu1 %297 }
 0x503   :  { %v296_v8 = vadd.f32 %v292_v54, %v2884_v16  ;;  %v300_v56 = vadd.f32 %v2938_v55, %v295_v52 }
 0x505   :  { %v301_v57 = vadd.f32 %v2938_v55, %v296_v8  ;;  %v2215_v58 = vmul.f32 -1.442695, %v300_v56 }
 0x506   :  { %v321_v0 = vpop.permute.xlu0 %320  ;;  %v323_v4 = vpop.permute.xlu1 %322 }
 0x507   :  { %2513 = vpow2.f32 %v2215_v58  ;;  %v2216_v59 = vmul.f32 -1.442695, %v301_v57 }
 0x509   :  { %2515 = vpow2.f32 %v2216_v59 }
 0x511   :  { %v2514_v15 = vpop.eup %2513 }
 0x512   :  { %v308_v60 = vadd.f32 1.0, %v2514_v15 }
 0x513   :  { %v2516_v61 = vpop.eup %2515 }
 0x514   :  { %v309_v62 = vadd.f32 1.0, %v2516_v61  ;;  %2517 = vrcp.f32 %v308_v60 }
 0x516   :  { %2519 = vrcp.f32 %v309_v62 }
 0x51e   :  { %v2518_v63 = vpop.eup %2517 }
 0x51f   :  { %v326_v1 = vmul.f32 %v2518_v63, %v321_v0  ;;  %v340_v21 = vsub.f32 1.0, %v2518_v63 }
 0x520   :  { %v2520_v2 = vpop.eup %2519 }
 0x521   :  { %v327_v5 = vmul.f32 %v2520_v2, %v323_v4  ;;  %330 = vrot.lane.b32.xlu0 %v326_v1, %s2750_s16  ;;  %v341_v27 = vsub.f32 1.0, %v2520_v2  ;;  %v2755_v4 = vmov 7  }
 0x523   :  { %332 = vrot.lane.b32.xlu1 %v327_v5, %s2750_s16 }
 0x527   :  { %352 = vrot.lane.b32.xlu1 %v270_v36, %s2744_s11 }
 0x52b   :  { %354 = vrot.lane.b32.xlu1 %v271_v41, %s2744_s11 }
 0x593   :  { %v331_v6 = vpop.permute.xlu0 %330 }
 0x594   :  { %v336_v7 = vadd.f32 %v331_v6, %v2877_v12 }
 0x595   :  { %v333_v9 = vpop.permute.xlu1 %332 }
 0x596   :  { %2521 = vtanh.f32 %v336_v7  ;;  %v337_v10 = vadd.f32 %v333_v9, %v2884_v16 }
 0x598   :  { %2523 = vtanh.f32 %v337_v10 }
 0x599   :  { %v353_v20 = vpop.permute.xlu1 %352 }
 0x59a   :  { %v358_v23 = vmul.f32 %v2518_v63, %v353_v20 }
 0x59d   :  { %v355_v25 = vpop.permute.xlu1 %354 }
 0x59e   :  { %v359_v29 = vmul.f32 %v2520_v2, %v355_v25 }
 0x5a0   :  { %v2522_v17 = vpop.eup %2521 }
 0x5a1   :  { %344 = vrot.lane.b32.xlu0 %v2522_v17, %s2752_s17 }
 0x5a2   :  { %v2524_v18 = vpop.eup %2523 }
 0x5a5   :  { %346 = vrot.lane.b32.xlu0 %v2524_v18, %s2752_s17  ;;  %s2779_s17 = smov 24  }
 0x613   :  { %v345_v22 = vpop.permute.xlu0 %344 }
 0x614   :  { %v350_v24 = vmul.f32 %v345_v22, %v340_v21 }
 0x616   :  { %v360_v26 = vadd.f32 %v358_v23, %v350_v24 }
 0x617   :  { %v347_v28 = vpop.permute.xlu0 %346 }
 0x618   :  { %v351_v30 = vmul.f32 %v347_v28, %v341_v27  ;;  %365 = vperm.xlu0 %2435, %v360_v26  }
 0x61a   :  { %v361_v31 = vadd.f32 %v359_v29, %v351_v30 }
 0x61c   :  { %370 = vperm.xlu1 %2436, %v361_v31   ;;  %2438 = vset.pattern.permute.xlu0 %v2755_v4 }
 0x620   :  { %404 = vrot.lane.b32.xlu1 %v2853_v3, %s2745_s12 }
 0x621   :  { %2437 = vset.pattern.permute.xlu1 %v2755_v4 }
 0x697   :  { %v2951_v32 = vpop.permute.xlu0 %365 }
 0x698   :  { %v375_v33 = vmul.f32 %v2853_v3, %v2951_v32 }
 0x69a   :  { %379 = vrot.lane.b32.xlu0 %v375_v33, %s2753_s18 }
 0x69b   :  { %v2956_v34 = vpop.permute.xlu1 %370 }
 0x69c   :  { %v376_v35 = vmul.f32 %v2853_v3, %v2956_v34 }
 0x69e   :  { %387 = vrot.lane.b32.xlu0 %v2853_v3, %s2749_s15  ;;  %381 = vrot.lane.b32.xlu1 %v376_v35, %s2753_s18  ;;  %s2778_s15 = smov 16  }
 0x69f   :  { %v405_v36 = vpop.permute.xlu1 %404 }
 0x6a0   :  { %v407_v37 = vmul.f32 %v405_v36, %v360_v26  ;;  %v408_v38 = vmul.f32 %v405_v36, %v361_v31 }
 0x6a2   :  { %v410_v39 = vadd.f32 %v2853_v3, %v408_v38  ;;  %v409_v40 = vadd.f32 %v2853_v3, %v407_v37 }
 0x6a4   :  { %415 = vrot.lane.b32.xlu0 %v410_v39, %s2745_s12  ;;  %413 = vrot.lane.b32.xlu1 %v409_v40, %s2745_s12 }
 0x70c   :  { %v380_v41 = vpop.permute.xlu0 %379 }
 0x70d   :  { %v385_v43 = vadd.f32 %v380_v41, %v2877_v12 }
 0x710   :  { %v2968_v45 = vpop.permute.xlu0 %387  ;;  %v382_v46 = vpop.permute.xlu1 %381 }
 0x711   :  { %v390_v47 = vadd.f32 %v2968_v45, %v385_v43  ;;  %v386_v48 = vadd.f32 %v382_v46, %v2884_v16 }
 0x713   :  { %v2217_v49 = vmul.f32 -1.442695, %v390_v47  ;;  %v391_v50 = vadd.f32 %v2968_v45, %v386_v48 }
 0x715   :  { %2525 = vpow2.f32 %v2217_v49  ;;  %v2218_v52 = vmul.f32 -1.442695, %v391_v50 }
 0x716   :  { %v414_v59 = vpop.permute.xlu1 %413  ;;  %v416_v61 = vpop.permute.xlu0 %415 }
 0x717   :  { %2527 = vpow2.f32 %v2218_v52 }
 0x71f   :  { %v2526_v54 = vpop.eup %2525 }
 0x720   :  { %v398_v8 = vadd.f32 1.0, %v2526_v54 }
 0x721   :  { %v2528_v56 = vpop.eup %2527 }
 0x722   :  { %2529 = vrcp.f32 %v398_v8  ;;  %v399_v57 = vadd.f32 1.0, %v2528_v56 }
 0x724   :  { %2531 = vrcp.f32 %v399_v57 }
 0x72c   :  { %v2530_v58 = vpop.eup %2529 }
 0x72d   :  { %v419_v15 = vmul.f32 %v2530_v58, %v414_v59  ;;  %v433_v9 = vsub.f32 1.0, %v2530_v58 }
 0x72e   :  { %v2532_v60 = vpop.eup %2531 }
 0x72f   :  { %v420_v62 = vmul.f32 %v2532_v60, %v416_v61  ;;  %423 = vrot.lane.b32.xlu1 %v419_v15, %s2754_s19  ;;  %v434_v21 = vsub.f32 1.0, %v2532_v60 }
 0x731   :  { %425 = vrot.lane.b32.xlu0 %v420_v62, %s2754_s19  ;;  %s2782_s19 = smov 13  }
 0x735   :  { %445 = vrot.lane.b32.xlu0 %v360_v26, %s2744_s11 }
 0x739   :  { %447 = vrot.lane.b32.xlu0 %v361_v31, %s2744_s11 }
 0x7a1   :  { %v424_v63 = vpop.permute.xlu1 %423 }
 0x7a2   :  { %v429_v0 = vadd.f32 %v424_v63, %v2877_v12  ;;  %v2760_v63 = vmov 9  }
 0x7a3   :  { %v426_v1 = vpop.permute.xlu0 %425 }
 0x7a4   :  { %2533 = vtanh.f32 %v429_v0  ;;  %v430_v2 = vadd.f32 %v426_v1, %v2884_v16 }
 0x7a6   :  { %2535 = vtanh.f32 %v430_v2 }
 0x7a7   :  { %v446_v7 = vpop.permute.xlu0 %445 }
 0x7a8   :  { %v451_v13 = vmul.f32 %v2530_v58, %v446_v7 }
 0x7ab   :  { %v448_v18 = vpop.permute.xlu0 %447 }
 0x7ac   :  { %v452_v23 = vmul.f32 %v2532_v60, %v448_v18 }
 0x7ae   :  { %v2534_v5 = vpop.eup %2533 }
 0x7af   :  { %437 = vrot.lane.b32.xlu1 %v2534_v5, %s2756_s20 }
 0x7b0   :  { %v2536_v6 = vpop.eup %2535 }
 0x7b3   :  { %439 = vrot.lane.b32.xlu1 %v2536_v6, %s2756_s20  ;;  %s2783_s20 = smov 18  }
 0x821   :  { %v438_v10 = vpop.permute.xlu1 %437 }
 0x822   :  { %v443_v17 = vmul.f32 %v438_v10, %v433_v9 }
 0x824   :  { %v453_v20 = vadd.f32 %v451_v13, %v443_v17 }
 0x825   :  { %v440_v22 = vpop.permute.xlu1 %439 }
 0x826   :  { %v444_v24 = vmul.f32 %v440_v22, %v434_v21  ;;  %458 = vperm.xlu1 %2437, %v453_v20  }
 0x828   :  { %v454_v25 = vadd.f32 %v452_v23, %v444_v24 }
 0x82a   :  { %463 = vperm.xlu0 %2438, %v454_v25   ;;  %497 = vrot.lane.b32.xlu1 %v2853_v3, %s2757_s21  ;;  %s2784_s21 = smov 23  }
 0x82b   :  { %2440 = vset.pattern.permute.xlu1 %v2760_v63 }
 0x82e   :  { %2439 = vset.pattern.permute.xlu0 %v2760_v63 }
 0x8a5   :  { %v2978_v26 = vpop.permute.xlu1 %458 }
 0x8a6   :  { %v468_v27 = vmul.f32 %v2853_v3, %v2978_v26 }
 0x8a8   :  { %472 = vrot.lane.b32.xlu1 %v468_v27, %s2758_s22 }
 0x8a9   :  { %v2983_v28 = vpop.permute.xlu0 %463  ;;  %v498_v29 = vpop.permute.xlu1 %497 }
 0x8aa   :  { %v469_v30 = vmul.f32 %v2853_v3, %v2983_v28  ;;  %v500_v31 = vmul.f32 %v498_v29, %v453_v20  ;;  %v501_v33 = vmul.f32 %v498_v29, %v454_v25 }
 0x8ac   :  { %474 = vrot.lane.b32.xlu0 %v469_v30, %s2758_s22  ;;  %480 = vrot.lane.b32.xlu1 %v2853_v3, %s2753_s18  ;;  %v503_v35 = vadd.f32 %v501_v33, %v2938_v55  ;;  %v502_v36 = vadd.f32 %v500_v31, %v2938_v55  ;;  %s2781_s18 = smov 105  }
 0x8b0   :  { %508 = vrot.lane.b32.xlu1 %v503_v35, %s2745_s12  ;;  %506 = vrot.lane.b32.xlu0 %v502_v36, %s2745_s12 }
 0x91a   :  { %v473_v37 = vpop.permute.xlu1 %472 }
 0x91b   :  { %v478_v38 = vadd.f32 %v473_v37, %v2877_v12 }
 0x91e   :  { %v475_v39 = vpop.permute.xlu0 %474  ;;  %v2995_v40 = vpop.permute.xlu1 %480 }
 0x91f   :  { %v479_v41 = vadd.f32 %v475_v39, %v2884_v16  ;;  %v483_v43 = vadd.f32 %v2995_v40, %v478_v38 }
 0x921   :  { %v484_v46 = vadd.f32 %v2995_v40, %v479_v41  ;;  %v2219_v47 = vmul.f32 -1.442695, %v483_v43 }
 0x922   :  { %v507_v8 = vpop.permute.xlu0 %506  ;;  %v509_v58 = vpop.permute.xlu1 %508 }
 0x923   :  { %2537 = vpow2.f32 %v2219_v47  ;;  %v2220_v48 = vmul.f32 -1.442695, %v484_v46 }
 0x925   :  { %2539 = vpow2.f32 %v2220_v48 }
 0x92d   :  { %v2538_v55 = vpop.eup %2537 }
 0x92e   :  { %v491_v49 = vadd.f32 1.0, %v2538_v55 }
 0x92f   :  { %v2540_v50 = vpop.eup %2539 }
 0x930   :  { %v492_v52 = vadd.f32 1.0, %v2540_v50  ;;  %2541 = vrcp.f32 %v491_v49 }
 0x932   :  { %2543 = vrcp.f32 %v492_v52 }
 0x93a   :  { %v2542_v54 = vpop.eup %2541 }
 0x93b   :  { %v512_v56 = vmul.f32 %v2542_v54, %v507_v8  ;;  %v526_v4 = vsub.f32 1.0, %v2542_v54 }
 0x93c   :  { %v2544_v57 = vpop.eup %2543 }
 0x93d   :  { %v513_v59 = vmul.f32 %v2544_v57, %v509_v58  ;;  %516 = vrot.lane.b32.xlu0 %v512_v56, %s2759_s23  ;;  %v527_v13 = vsub.f32 1.0, %v2544_v57 }
 0x93f   :  { %518 = vrot.lane.b32.xlu1 %v513_v59, %s2759_s23 }
 0x943   :  { %538 = vrot.lane.b32.xlu1 %v453_v20, %s2744_s11 }
 0x947   :  { %540 = vrot.lane.b32.xlu1 %v454_v25, %s2744_s11 }
 0x9af   :  { %v517_v15 = vpop.permute.xlu0 %516 }
 0x9b0   :  { %v522_v60 = vadd.f32 %v517_v15, %v2877_v12 }
 0x9b1   :  { %v519_v61 = vpop.permute.xlu1 %518 }
 0x9b2   :  { %2545 = vtanh.f32 %v522_v60  ;;  %v523_v62 = vadd.f32 %v519_v61, %v2884_v16  ;;  %v2765_v61 = vmov 11  }
 0x9b4   :  { %2547 = vtanh.f32 %v523_v62 }
 0x9b5   :  { %v539_v2 = vpop.permute.xlu1 %538 }
 0x9b6   :  { %v544_v6 = vmul.f32 %v2542_v54, %v539_v2 }
 0x9b9   :  { %v541_v9 = vpop.permute.xlu1 %540 }
 0x9ba   :  { %v545_v18 = vmul.f32 %v2544_v57, %v541_v9 }
 0x9bc   :  { %v2546_v0 = vpop.eup %2545 }
 0x9bd   :  { %530 = vrot.lane.b32.xlu0 %v2546_v0, %s2761_s24 }
 0x9be   :  { %v2548_v1 = vpop.eup %2547 }
 0x9c1   :  { %532 = vrot.lane.b32.xlu0 %v2548_v1, %s2761_s24  ;;  %s2786_s24 = smov 106  }
 0xa2f   :  { %v531_v5 = vpop.permute.xlu0 %530 }
 0xa30   :  { %v536_v7 = vmul.f32 %v531_v5, %v526_v4 }
 0xa32   :  { %v546_v10 = vadd.f32 %v544_v6, %v536_v7 }
 0xa33   :  { %v533_v17 = vpop.permute.xlu0 %532 }
 0xa34   :  { %v537_v20 = vmul.f32 %v533_v17, %v527_v13  ;;  %551 = vperm.xlu0 %2439, %v546_v10  }
 0xa36   :  { %v547_v21 = vadd.f32 %v545_v18, %v537_v20 }
 0xa38   :  { %556 = vperm.xlu1 %2440, %v547_v21   ;;  %2442 = vset.pattern.permute.xlu0 %v2765_v61 }
 0xa3c   :  { %590 = vrot.lane.b32.xlu1 %v2853_v3, %s2762_s25  ;;  %s2787_s25 = smov 15  }
 0xa3d   :  { %2441 = vset.pattern.permute.xlu1 %v2765_v61 }
 0xab3   :  { %v3007_v22 = vpop.permute.xlu0 %551 }
 0xab4   :  { %v561_v23 = vmul.f32 %v2853_v3, %v3007_v22 }
 0xab6   :  { %565 = vrot.lane.b32.xlu0 %v561_v23, %s2763_s26 }
 0xab7   :  { %v3012_v24 = vpop.permute.xlu1 %556 }
 0xab8   :  { %v562_v25 = vmul.f32 %v2853_v3, %v3012_v24 }
 0xaba   :  { %573 = vrot.lane.b32.xlu0 %v2853_v3, %s2758_s22  ;;  %567 = vrot.lane.b32.xlu1 %v562_v25, %s2763_s26 }
 0xabb   :  { %v591_v27 = vpop.permute.xlu1 %590 }
 0xabc   :  { %v593_v29 = vmul.f32 %v591_v27, %v546_v10  ;;  %v594_v30 = vmul.f32 %v591_v27, %v547_v21 }
 0xabe   :  { %v596_v31 = vadd.f32 %v594_v30, %v2968_v45  ;;  %v595_v33 = vadd.f32 %v593_v29, %v2968_v45 }
 0xac0   :  { %601 = vrot.lane.b32.xlu0 %v596_v31, %s2745_s12  ;;  %599 = vrot.lane.b32.xlu1 %v595_v33, %s2745_s12 }
 0xb28   :  { %v566_v35 = vpop.permute.xlu0 %565 }
 0xb29   :  { %v571_v36 = vadd.f32 %v566_v35, %v2877_v12 }
 0xb2c   :  { %v3024_v37 = vpop.permute.xlu0 %573  ;;  %v568_v38 = vpop.permute.xlu1 %567 }
 0xb2d   :  { %v576_v39 = vadd.f32 %v3024_v37, %v571_v36  ;;  %v572_v41 = vadd.f32 %v568_v38, %v2884_v16 }
 0xb2f   :  { %v2221_v43 = vmul.f32 -1.442695, %v576_v39  ;;  %v577_v46 = vadd.f32 %v3024_v37, %v572_v41 }
 0xb31   :  { %2549 = vpow2.f32 %v2221_v43  ;;  %v2222_v47 = vmul.f32 -1.442695, %v577_v46 }
 0xb32   :  { %v600_v52 = vpop.permute.xlu1 %599  ;;  %v602_v56 = vpop.permute.xlu0 %601 }
 0xb33   :  { %2551 = vpow2.f32 %v2222_v47 }
 0xb3b   :  { %v2550_v45 = vpop.eup %2549 }
 0xb3c   :  { %v584_v48 = vadd.f32 1.0, %v2550_v45 }
 0xb3d   :  { %v2552_v55 = vpop.eup %2551 }
 0xb3e   :  { %2553 = vrcp.f32 %v584_v48  ;;  %v585_v49 = vadd.f32 1.0, %v2552_v55 }
 0xb40   :  { %2555 = vrcp.f32 %v585_v49 }
 0xb48   :  { %v2554_v50 = vpop.eup %2553 }
 0xb49   :  { %v605_v54 = vmul.f32 %v2554_v50, %v600_v52  ;;  %v619_v1 = vsub.f32 1.0, %v2554_v50 }
 0xb4a   :  { %v2556_v8 = vpop.eup %2555 }
 0xb4b   :  { %v606_v57 = vmul.f32 %v2556_v8, %v602_v56  ;;  %609 = vrot.lane.b32.xlu1 %v605_v54, %s2764_s27  ;;  %v620_v9 = vsub.f32 1.0, %v2556_v8 }
 0xb4d   :  { %611 = vrot.lane.b32.xlu0 %v606_v57, %s2764_s27  ;;  %s2789_s27 = smov 22  }
 0xb51   :  { %631 = vrot.lane.b32.xlu0 %v546_v10, %s2744_s11 }
 0xb55   :  { %633 = vrot.lane.b32.xlu0 %v547_v21, %s2744_s11 }
 0xbbd   :  { %v610_v58 = vpop.permute.xlu1 %609 }
 0xbbe   :  { %v615_v59 = vadd.f32 %v610_v58, %v2877_v12 }
 0xbbf   :  { %v612_v15 = vpop.permute.xlu0 %611 }
 0xbc0   :  { %2557 = vtanh.f32 %v615_v59  ;;  %v616_v60 = vadd.f32 %v612_v15, %v2884_v16 }
 0xbc2   :  { %2559 = vtanh.f32 %v616_v60  ;;  %v2770_v60 = vmov 13  }
 0xbc3   :  { %v632_v0 = vpop.permute.xlu0 %631 }
 0xbc4   :  { %v637_v4 = vmul.f32 %v2554_v50, %v632_v0 }
 0xbc7   :  { %v634_v6 = vpop.permute.xlu0 %633 }
 0xbc8   :  { %v638_v13 = vmul.f32 %v2556_v8, %v634_v6 }
 0xbca   :  { %v2558_v62 = vpop.eup %2557 }
 0xbcb   :  { %623 = vrot.lane.b32.xlu1 %v2558_v62, %s2766_s28 }
 0xbcc   :  { %v2560_v63 = vpop.eup %2559 }
 0xbcf   :  { %625 = vrot.lane.b32.xlu1 %v2560_v63, %s2766_s28  ;;  %s2791_s28 = smov 107  }
 0xc3d   :  { %v624_v2 = vpop.permute.xlu1 %623 }
 0xc3e   :  { %v629_v5 = vmul.f32 %v624_v2, %v619_v1 }
 0xc40   :  { %v639_v7 = vadd.f32 %v637_v4, %v629_v5 }
 0xc41   :  { %v626_v10 = vpop.permute.xlu1 %625 }
 0xc42   :  { %v630_v17 = vmul.f32 %v626_v10, %v620_v9  ;;  %644 = vperm.xlu1 %2441, %v639_v7  }
 0xc44   :  { %v640_v18 = vadd.f32 %v638_v13, %v630_v17 }
 0xc46   :  { %649 = vperm.xlu0 %2442, %v640_v18   ;;  %683 = vrot.lane.b32.xlu1 %v2853_v3, %s2767_s29  ;;  %s2792_s29 = smov 17  }
 0xc47   :  { %2444 = vset.pattern.permute.xlu1 %v2770_v60 }
 0xc4a   :  { %2443 = vset.pattern.permute.xlu0 %v2770_v60 }
 0xcc1   :  { %v3034_v20 = vpop.permute.xlu1 %644 }
 0xcc2   :  { %v654_v21 = vmul.f32 %v2853_v3, %v3034_v20 }
 0xcc4   :  { %658 = vrot.lane.b32.xlu1 %v654_v21, %s2768_s30 }
 0xcc5   :  { %v3039_v23 = vpop.permute.xlu0 %649  ;;  %v684_v25 = vpop.permute.xlu1 %683 }
 0xcc6   :  { %v655_v27 = vmul.f32 %v2853_v3, %v3039_v23  ;;  %v686_v29 = vmul.f32 %v684_v25, %v639_v7  ;;  %v687_v30 = vmul.f32 %v684_v25, %v640_v18 }
 0xcc8   :  { %660 = vrot.lane.b32.xlu0 %v655_v27, %s2768_s30  ;;  %666 = vrot.lane.b32.xlu1 %v2853_v3, %s2763_s26  ;;  %v689_v31 = vadd.f32 %v687_v30, %v2995_v40  ;;  %v688_v33 = vadd.f32 %v686_v29, %v2995_v40  ;;  %s2788_s26 = smov 20  }
 0xccc   :  { %694 = vrot.lane.b32.xlu1 %v689_v31, %s2745_s12  ;;  %692 = vrot.lane.b32.xlu0 %v688_v33, %s2745_s12 }
 0xd36   :  { %v659_v35 = vpop.permute.xlu1 %658 }
 0xd37   :  { %v664_v36 = vadd.f32 %v659_v35, %v2877_v12 }
 0xd3a   :  { %v661_v38 = vpop.permute.xlu0 %660  ;;  %v3051_v39 = vpop.permute.xlu1 %666 }
 0xd3b   :  { %v665_v41 = vadd.f32 %v661_v38, %v2884_v16  ;;  %v669_v43 = vadd.f32 %v3051_v39, %v664_v36 }
 0xd3d   :  { %v670_v3 = vadd.f32 %v3051_v39, %v665_v41  ;;  %v2223_v46 = vmul.f32 -1.442695, %v669_v43 }
 0xd3e   :  { %v693_v50 = vpop.permute.xlu0 %692  ;;  %v695_v8 = vpop.permute.xlu1 %694 }
 0xd3f   :  { %2561 = vpow2.f32 %v2223_v46  ;;  %v2224_v47 = vmul.f32 -1.442695, %v670_v3 }
 0xd41   :  { %2563 = vpow2.f32 %v2224_v47 }
 0xd49   :  { %v2562_v40 = vpop.eup %2561 }
 0xd4a   :  { %v677_v45 = vadd.f32 1.0, %v2562_v40 }
 0xd4b   :  { %v2564_v48 = vpop.eup %2563 }
 0xd4c   :  { %v678_v55 = vadd.f32 1.0, %v2564_v48  ;;  %2565 = vrcp.f32 %v677_v45 }
 0xd4e   :  { %2567 = vrcp.f32 %v678_v55 }
 0xd56   :  { %v2566_v49 = vpop.eup %2565 }
 0xd57   :  { %v698_v52 = vmul.f32 %v2566_v49, %v693_v50  ;;  %v712_v0 = vsub.f32 1.0, %v2566_v49 }
 0xd58   :  { %v2568_v54 = vpop.eup %2567 }
 0xd59   :  { %v699_v56 = vmul.f32 %v2568_v54, %v695_v8  ;;  %702 = vrot.lane.b32.xlu0 %v698_v52, %s2769_s6 }
 0xd5b   :  { %704 = vrot.lane.b32.xlu1 %v699_v56, %s2769_s6 }
 0xd5f   :  { %724 = vrot.lane.b32.xlu1 %v639_v7, %s2744_s11  ;;  %v713_v7 = vsub.f32 1.0, %v2568_v54 }
 0xd63   :  { %726 = vrot.lane.b32.xlu1 %v640_v18, %s2744_s11  ;;  %v3065_v18 = vld [vmem:[%s3592_s4 + $0x4] ss:$0 sm:$0xff] }
 0xdcb   :  { %v703_v57 = vpop.permute.xlu0 %702 }
 0xdcc   :  { %v708_v58 = vadd.f32 %v703_v57, %v2877_v12 }
 0xdcd   :  { %v705_v59 = vpop.permute.xlu1 %704 }
 0xdce   :  { %2569 = vtanh.f32 %v708_v58  ;;  %v709_v15 = vadd.f32 %v705_v59, %v2884_v16 }
 0xdd0   :  { %2571 = vtanh.f32 %v709_v15 }
 0xdd1   :  { %v725_v63 = vpop.permute.xlu1 %724 }
 0xdd2   :  { %v730_v2 = vmul.f32 %v2566_v49, %v725_v63 }
 0xdd5   :  { %v727_v5 = vpop.permute.xlu1 %726 }
 0xdd6   :  { %v731_v10 = vmul.f32 %v2568_v54, %v727_v5 }
 0xdd8   :  { %v2570_v61 = vpop.eup %2569 }
 0xdd9   :  { %716 = vrot.lane.b32.xlu0 %v2570_v61, %s2771_s7 }
 0xdda   :  { %v2572_v62 = vpop.eup %2571 }
 0xddd   :  { %718 = vrot.lane.b32.xlu0 %v2572_v62, %s2771_s7  ;;  %v2775_v62 = vmov 15   ;;  %s2795_s7 = smov 108  }
 0xe4b   :  { %v717_v1 = vpop.permute.xlu0 %716 }
 0xe4c   :  { %v722_v4 = vmul.f32 %v717_v1, %v712_v0 }
 0xe4e   :  { %v732_v6 = vadd.f32 %v730_v2, %v722_v4 }
 0xe4f   :  { %v719_v9 = vpop.permute.xlu0 %718 }
 0xe50   :  { %v723_v13 = vmul.f32 %v719_v9, %v713_v7  ;;  %737 = vperm.xlu0 %2443, %v732_v6  }
 0xe52   :  { %v733_v17 = vadd.f32 %v731_v10, %v723_v13 }
 0xe54   :  { %742 = vperm.xlu1 %2444, %v733_v17   ;;  %2446 = vset.pattern.permute.xlu0 %v2775_v62 }
 0xe58   :  { %776 = vrot.lane.b32.xlu1 %v3065_v18, %s2772_s0  ;;  %s2801_s0 = smov 110  }
 0xe59   :  { %2445 = vset.pattern.permute.xlu1 %v2775_v62 }
 0xecf   :  { %v3068_v21 = vpop.permute.xlu0 %737 }
 0xed0   :  { %v747_v25 = vmul.f32 %v3065_v18, %v3068_v21 }
 0xed2   :  { %751 = vrot.lane.b32.xlu0 %v747_v25, %s2773_s9 }
 0xed3   :  { %v3073_v27 = vpop.permute.xlu1 %742 }
 0xed4   :  { %v748_v29 = vmul.f32 %v3065_v18, %v3073_v27 }
 0xed6   :  { %759 = vrot.lane.b32.xlu0 %v3065_v18, %s2768_s30  ;;  %753 = vrot.lane.b32.xlu1 %v748_v29, %s2773_s9  ;;  %s2793_s30 = smov 21  }
 0xed7   :  { %v777_v30 = vpop.permute.xlu1 %776 }
 0xed8   :  { %v779_v31 = vmul.f32 %v777_v30, %v732_v6  ;;  %v780_v33 = vmul.f32 %v777_v30, %v733_v17 }
 0xeda   :  { %v781_v35 = vadd.f32 %v779_v31, %v3024_v37  ;;  %v782_v36 = vadd.f32 %v780_v33, %v3024_v37 }
 0xedc   :  { %787 = vrot.lane.b32.xlu0 %v782_v36, %s2745_s12  ;;  %785 = vrot.lane.b32.xlu1 %v781_v35, %s2745_s12 }
 0xf44   :  { %v752_v38 = vpop.permute.xlu0 %751 }
 0xf45   :  { %v757_v41 = vadd.f32 %v752_v38, %v2877_v12 }
 0xf48   :  { %v3085_v43 = vpop.permute.xlu0 %759  ;;  %v754_v3 = vpop.permute.xlu1 %753 }
 0xf49   :  { %v762_v46 = vadd.f32 %v3085_v43, %v757_v41  ;;  %v758_v47 = vadd.f32 %v754_v3, %v2884_v16 }
 0xf4b   :  { %v2225_v40 = vmul.f32 -1.442695, %v762_v46  ;;  %v763_v45 = vadd.f32 %v3085_v43, %v758_v47 }
 0xf4d   :  { %2573 = vpow2.f32 %v2225_v40  ;;  %v2226_v48 = vmul.f32 -1.442695, %v763_v45 }
 0xf4e   :  { %v786_v54 = vpop.permute.xlu1 %785  ;;  %v788_v57 = vpop.permute.xlu0 %787 }
 0xf4f   :  { %2575 = vpow2.f32 %v2226_v48 }
 0xf57   :  { %v2574_v37 = vpop.eup %2573 }
 0xf58   :  { %v770_v55 = vadd.f32 1.0, %v2574_v37 }
 0xf59   :  { %v2576_v49 = vpop.eup %2575 }
 0xf5a   :  { %2577 = vrcp.f32 %v770_v55  ;;  %v771_v50 = vadd.f32 1.0, %v2576_v49 }
 0xf5c   :  { %2579 = vrcp.f32 %v771_v50 }
 0xf64   :  { %v2578_v52 = vpop.eup %2577 }
 0xf65   :  { %v791_v8 = vmul.f32 %v2578_v52, %v786_v54  ;;  %v805_v2 = vsub.f32 1.0, %v2578_v52 }
 0xf66   :  { %v2580_v56 = vpop.eup %2579 }
 0xf67   :  { %v792_v58 = vmul.f32 %v2580_v56, %v788_v57  ;;  %795 = vrot.lane.b32.xlu1 %v791_v8, %s2774_s10  ;;  %v806_v10 = vsub.f32 1.0, %v2580_v56 }
 0xf69   :  { %797 = vrot.lane.b32.xlu0 %v792_v58, %s2774_s10 }
 0xf6d   :  { %817 = vrot.lane.b32.xlu0 %v732_v6, %s2744_s11 }
 0xf71   :  { %819 = vrot.lane.b32.xlu0 %v733_v17, %s2744_s11 }
 0xfd9   :  { %v796_v59 = vpop.permute.xlu1 %795 }
 0xfda   :  { %v801_v15 = vadd.f32 %v796_v59, %v2877_v12 }
 0xfdb   :  { %v798_v60 = vpop.permute.xlu0 %797 }
 0xfdc   :  { %2581 = vtanh.f32 %v801_v15  ;;  %v802_v61 = vadd.f32 %v798_v60, %v2884_v16 }
 0xfde   :  { %2583 = vtanh.f32 %v802_v61 }
 0xfdf   :  { %v818_v1 = vpop.permute.xlu0 %817 }
 0xfe0   :  { %v823_v5 = vmul.f32 %v2578_v52, %v818_v1 }
 0xfe3   :  { %v820_v7 = vpop.permute.xlu0 %819 }
 0xfe4   :  { %v824_v17 = vmul.f32 %v2580_v56, %v820_v7 }
 0xfe6   :  { %v2582_v63 = vpop.eup %2581 }
 0xfe7   :  { %809 = vrot.lane.b32.xlu1 %v2582_v63, %s2776_s13 }
 0xfe8   :  { %v2584_v0 = vpop.eup %2583 }
 0xfeb   :  { %811 = vrot.lane.b32.xlu1 %v2584_v0, %s2776_s13 }
0x1059   :  { %v810_v4 = vpop.permute.xlu1 %809 }
0x105a   :  { %v815_v6 = vmul.f32 %v810_v4, %v805_v2  ;;  %v2780_v2 = vmov 17  }
0x105c   :  { %v825_v9 = vadd.f32 %v823_v5, %v815_v6 }
0x105d   :  { %v812_v13 = vpop.permute.xlu1 %811 }
0x105e   :  { %v816_v25 = vmul.f32 %v812_v13, %v806_v10  ;;  %830 = vperm.xlu1 %2445, %v825_v9  }
0x1060   :  { %v826_v29 = vadd.f32 %v824_v17, %v816_v25 }
0x1062   :  { %835 = vperm.xlu0 %2446, %v826_v29   ;;  %869 = vrot.lane.b32.xlu1 %v3065_v18, %s2777_s14 }
0x1063   :  { %2448 = vset.pattern.permute.xlu1 %v2780_v2 }
0x1066   :  { %2447 = vset.pattern.permute.xlu0 %v2780_v2 }
0x10dd   :  { %v3097_v30 = vpop.permute.xlu1 %830 }
0x10de   :  { %v840_v31 = vmul.f32 %v3065_v18, %v3097_v30 }
0x10e0   :  { %844 = vrot.lane.b32.xlu1 %v840_v31, %s2778_s15 }
0x10e1   :  { %v3102_v33 = vpop.permute.xlu0 %835  ;;  %v870_v35 = vpop.permute.xlu1 %869 }
0x10e2   :  { %v841_v36 = vmul.f32 %v3065_v18, %v3102_v33  ;;  %v872_v38 = vmul.f32 %v870_v35, %v825_v9  ;;  %v873_v41 = vmul.f32 %v870_v35, %v826_v29 }
0x10e4   :  { %846 = vrot.lane.b32.xlu0 %v841_v36, %s2778_s15  ;;  %852 = vrot.lane.b32.xlu1 %v3065_v18, %s2773_s9  ;;  %v874_v3 = vadd.f32 %v872_v38, %v3051_v39  ;;  %v875_v46 = vadd.f32 %v873_v41, %v3051_v39  ;;  %s2802_s9 = smov 80  }
0x10e8   :  { %880 = vrot.lane.b32.xlu1 %v875_v46, %s2745_s12  ;;  %878 = vrot.lane.b32.xlu0 %v874_v3, %s2745_s12 }
0x1152   :  { %v845_v47 = vpop.permute.xlu1 %844 }
0x1153   :  { %v850_v40 = vadd.f32 %v845_v47, %v2877_v12 }
0x1156   :  { %v847_v45 = vpop.permute.xlu0 %846  ;;  %v3114_v48 = vpop.permute.xlu1 %852 }
0x1157   :  { %v851_v37 = vadd.f32 %v847_v45, %v2884_v16  ;;  %v855_v55 = vadd.f32 %v3114_v48, %v850_v40 }
0x1159   :  { %v856_v49 = vadd.f32 %v3114_v48, %v851_v37  ;;  %v2227_v50 = vmul.f32 -1.442695, %v855_v55 }
0x115a   :  { %v879_v58 = vpop.permute.xlu0 %878  ;;  %v881_v60 = vpop.permute.xlu1 %880 }
0x115b   :  { %2585 = vpow2.f32 %v2227_v50  ;;  %v2228_v52 = vmul.f32 -1.442695, %v856_v49 }
0x115d   :  { %2587 = vpow2.f32 %v2228_v52 }
0x1165   :  { %v2586_v39 = vpop.eup %2585 }
0x1166   :  { %v863_v54 = vadd.f32 1.0, %v2586_v39 }
0x1167   :  { %v2588_v8 = vpop.eup %2587 }
0x1168   :  { %v864_v56 = vadd.f32 1.0, %v2588_v8  ;;  %2589 = vrcp.f32 %v863_v54 }
0x116a   :  { %2591 = vrcp.f32 %v864_v56 }
0x1172   :  { %v2590_v57 = vpop.eup %2589 }
0x1173   :  { %v884_v59 = vmul.f32 %v2590_v57, %v879_v58  ;;  %v898_v7 = vsub.f32 1.0, %v2590_v57 }
0x1174   :  { %v2592_v15 = vpop.eup %2591 }
0x1175   :  { %v885_v61 = vmul.f32 %v2592_v15, %v881_v60  ;;  %888 = vrot.lane.b32.xlu0 %v884_v59, %s2779_s17 }
0x1177   :  { %890 = vrot.lane.b32.xlu1 %v885_v61, %s2779_s17 }
0x117b   :  { %910 = vrot.lane.b32.xlu1 %v825_v9, %s2744_s11 }
0x117f   :  { %912 = vrot.lane.b32.xlu1 %v826_v29, %s2744_s11  ;;  %v899_v29 = vsub.f32 1.0, %v2592_v15 }
0x11e7   :  { %v889_v62 = vpop.permute.xlu0 %888 }
0x11e8   :  { %v894_v63 = vadd.f32 %v889_v62, %v2877_v12 }
0x11e9   :  { %v891_v0 = vpop.permute.xlu1 %890 }
0x11ea   :  { %2593 = vtanh.f32 %v894_v63  ;;  %v895_v1 = vadd.f32 %v891_v0, %v2884_v16 }
0x11ec   :  { %2595 = vtanh.f32 %v895_v1 }
0x11ed   :  { %v911_v6 = vpop.permute.xlu1 %910 }
0x11ee   :  { %v916_v10 = vmul.f32 %v2590_v57, %v911_v6 }
0x11f1   :  { %v913_v17 = vpop.permute.xlu1 %912 }
0x11f2   :  { %v917_v35 = vmul.f32 %v2592_v15, %v913_v17 }
0x11f4   :  { %v2594_v4 = vpop.eup %2593 }
0x11f5   :  { %902 = vrot.lane.b32.xlu0 %v2594_v4, %s2781_s18 }
0x11f6   :  { %v2596_v5 = vpop.eup %2595 }
0x11f9   :  { %904 = vrot.lane.b32.xlu0 %v2596_v5, %s2781_s18 }
0x1267   :  { %v903_v9 = vpop.permute.xlu0 %902 }
0x1268   :  { %v908_v13 = vmul.f32 %v903_v9, %v898_v7 }
0x126a   :  { %v918_v25 = vadd.f32 %v916_v10, %v908_v13  ;;  %v2785_v10 = vmov 19  }
0x126b   :  { %v905_v31 = vpop.permute.xlu0 %904 }
0x126c   :  { %v909_v36 = vmul.f32 %v905_v31, %v899_v29  ;;  %923 = vperm.xlu0 %2447, %v918_v25  }
0x126e   :  { %v919_v38 = vadd.f32 %v917_v35, %v909_v36 }
0x1270   :  { %928 = vperm.xlu1 %2448, %v919_v38   ;;  %2450 = vset.pattern.permute.xlu0 %v2785_v10 }
0x1274   :  { %962 = vrot.lane.b32.xlu1 %v3065_v18, %s2782_s19 }
0x1275   :  { %2449 = vset.pattern.permute.xlu1 %v2785_v10 }
0x12eb   :  { %v3126_v41 = vpop.permute.xlu0 %923 }
0x12ec   :  { %v933_v3 = vmul.f32 %v3065_v18, %v3126_v41 }
0x12ee   :  { %937 = vrot.lane.b32.xlu0 %v933_v3, %s2783_s20 }
0x12ef   :  { %v3131_v46 = vpop.permute.xlu1 %928 }
0x12f0   :  { %v934_v47 = vmul.f32 %v3065_v18, %v3131_v46 }
0x12f2   :  { %945 = vrot.lane.b32.xlu0 %v3065_v18, %s2778_s15  ;;  %939 = vrot.lane.b32.xlu1 %v934_v47, %s2783_s20 }
0x12f3   :  { %v963_v40 = vpop.permute.xlu1 %962 }
0x12f4   :  { %v965_v45 = vmul.f32 %v963_v40, %v918_v25  ;;  %v966_v37 = vmul.f32 %v963_v40, %v919_v38 }
0x12f6   :  { %v967_v55 = vadd.f32 %v965_v45, %v3085_v43  ;;  %v968_v49 = vadd.f32 %v966_v37, %v3085_v43 }
0x12f8   :  { %973 = vrot.lane.b32.xlu0 %v968_v49, %s2745_s12  ;;  %971 = vrot.lane.b32.xlu1 %v967_v55, %s2745_s12 }
0x1360   :  { %v938_v50 = vpop.permute.xlu0 %937 }
0x1361   :  { %v943_v52 = vadd.f32 %v938_v50, %v2877_v12 }
0x1364   :  { %v3143_v39 = vpop.permute.xlu0 %945  ;;  %v940_v54 = vpop.permute.xlu1 %939 }
0x1365   :  { %v948_v8 = vadd.f32 %v3143_v39, %v943_v52  ;;  %v944_v56 = vadd.f32 %v940_v54, %v2884_v16 }
0x1367   :  { %v2229_v57 = vmul.f32 -1.442695, %v948_v8  ;;  %v949_v58 = vadd.f32 %v3143_v39, %v944_v56 }
0x1369   :  { %2597 = vpow2.f32 %v2229_v57  ;;  %v2230_v59 = vmul.f32 -1.442695, %v949_v58 }
0x136a   :  { %v972_v63 = vpop.permute.xlu1 %971  ;;  %v974_v2 = vpop.permute.xlu0 %973 }
0x136b   :  { %2599 = vpow2.f32 %v2230_v59 }
0x1373   :  { %v2598_v43 = vpop.eup %2597 }
0x1374   :  { %v956_v15 = vadd.f32 1.0, %v2598_v43 }
0x1375   :  { %v2600_v60 = vpop.eup %2599 }
0x1376   :  { %2601 = vrcp.f32 %v956_v15  ;;  %v957_v61 = vadd.f32 1.0, %v2600_v60 }
0x1378   :  { %2603 = vrcp.f32 %v957_v61 }
0x1380   :  { %v2602_v62 = vpop.eup %2601 }
0x1381   :  { %v977_v0 = vmul.f32 %v2602_v62, %v972_v63 }
0x1382   :  { %v2604_v1 = vpop.eup %2603 }
0x1383   :  { %v978_v4 = vmul.f32 %v2604_v1, %v974_v2  ;;  %981 = vrot.lane.b32.xlu1 %v977_v0, %s2784_s21  ;;  %v992_v47 = vsub.f32 1.0, %v2604_v1 }
0x1385   :  { %983 = vrot.lane.b32.xlu0 %v978_v4, %s2784_s21 }
0x1389   :  { %1003 = vrot.lane.b32.xlu0 %v918_v25, %s2744_s11  ;;  %v991_v25 = vsub.f32 1.0, %v2602_v62 }
0x138d   :  { %1005 = vrot.lane.b32.xlu0 %v919_v38, %s2744_s11 }
0x13f5   :  { %v982_v5 = vpop.permute.xlu1 %981 }
0x13f6   :  { %v987_v6 = vadd.f32 %v982_v5, %v2877_v12 }
0x13f7   :  { %v984_v7 = vpop.permute.xlu0 %983 }
0x13f8   :  { %2605 = vtanh.f32 %v987_v6  ;;  %v988_v9 = vadd.f32 %v984_v7, %v2884_v16 }
0x13fa   :  { %2607 = vtanh.f32 %v988_v9 }
0x13fb   :  { %v1004_v29 = vpop.permute.xlu0 %1003 }
0x13fc   :  { %v1009_v35 = vmul.f32 %v2602_v62, %v1004_v29 }
0x13ff   :  { %v1006_v38 = vpop.permute.xlu0 %1005 }
0x1400   :  { %v1010_v45 = vmul.f32 %v2604_v1, %v1006_v38  ;;  %v2790_v38 = vmov 21  }
0x1402   :  { %v2606_v13 = vpop.eup %2605 }
0x1403   :  { %995 = vrot.lane.b32.xlu1 %v2606_v13, %s2786_s24 }
0x1404   :  { %v2608_v17 = vpop.eup %2607 }
0x1407   :  { %997 = vrot.lane.b32.xlu1 %v2608_v17, %s2786_s24 }
0x1475   :  { %v996_v31 = vpop.permute.xlu1 %995 }
0x1476   :  { %v1001_v36 = vmul.f32 %v996_v31, %v991_v25 }
0x1478   :  { %v1011_v3 = vadd.f32 %v1009_v35, %v1001_v36 }
0x1479   :  { %v998_v40 = vpop.permute.xlu1 %997 }
0x147a   :  { %v1002_v37 = vmul.f32 %v998_v40, %v992_v47  ;;  %1016 = vperm.xlu1 %2449, %v1011_v3  }
0x147c   :  { %v1012_v55 = vadd.f32 %v1010_v45, %v1002_v37 }
0x147e   :  { %1021 = vperm.xlu0 %2450, %v1012_v55   ;;  %1055 = vrot.lane.b32.xlu1 %v3065_v18, %s2787_s25 }
0x147f   :  { %2452 = vset.pattern.permute.xlu1 %v2790_v38 }
0x1482   :  { %2451 = vset.pattern.permute.xlu0 %v2790_v38 }
0x14f9   :  { %v3155_v49 = vpop.permute.xlu1 %1016 }
0x14fa   :  { %v1026_v50 = vmul.f32 %v3065_v18, %v3155_v49 }
0x14fc   :  { %1030 = vrot.lane.b32.xlu1 %v1026_v50, %s2788_s26 }
0x14fd   :  { %v3160_v52 = vpop.permute.xlu0 %1021  ;;  %v1056_v54 = vpop.permute.xlu1 %1055 }
0x14fe   :  { %v1027_v8 = vmul.f32 %v3065_v18, %v3160_v52  ;;  %v1058_v56 = vmul.f32 %v1056_v54, %v1011_v3  ;;  %v1059_v57 = vmul.f32 %v1056_v54, %v1012_v55 }
0x1500   :  { %1032 = vrot.lane.b32.xlu0 %v1027_v8, %s2788_s26  ;;  %1038 = vrot.lane.b32.xlu1 %v3065_v18, %s2783_s20  ;;  %v1060_v58 = vadd.f32 %v1058_v56, %v3114_v48  ;;  %v1061_v59 = vadd.f32 %v1059_v57, %v3114_v48 }
0x1504   :  { %1066 = vrot.lane.b32.xlu1 %v1061_v59, %s2745_s12  ;;  %1064 = vrot.lane.b32.xlu0 %v1060_v58, %s2745_s12 }
0x156e   :  { %v1031_v43 = vpop.permute.xlu1 %1030 }
0x156f   :  { %v1036_v15 = vadd.f32 %v1031_v43, %v2877_v12 }
0x1572   :  { %v1033_v60 = vpop.permute.xlu0 %1032  ;;  %v3172_v61 = vpop.permute.xlu1 %1038 }
0x1573   :  { %v1037_v62 = vadd.f32 %v1033_v60, %v2884_v16  ;;  %v1041_v63 = vadd.f32 %v3172_v61, %v1036_v15 }
0x1575   :  { %v1042_v0 = vadd.f32 %v3172_v61, %v1037_v62  ;;  %v2231_v1 = vmul.f32 -1.442695, %v1041_v63 }
0x1576   :  { %v1065_v9 = vpop.permute.xlu0 %1064  ;;  %v1067_v17 = vpop.permute.xlu1 %1066 }
0x1577   :  { %2609 = vpow2.f32 %v2231_v1  ;;  %v2232_v2 = vmul.f32 -1.442695, %v1042_v0 }
0x1579   :  { %2611 = vpow2.f32 %v2232_v2 }
0x1581   :  { %v2610_v48 = vpop.eup %2609 }
0x1582   :  { %v1049_v4 = vadd.f32 1.0, %v2610_v48 }
0x1583   :  { %v2612_v5 = vpop.eup %2611 }
0x1584   :  { %v1050_v6 = vadd.f32 1.0, %v2612_v5  ;;  %2613 = vrcp.f32 %v1049_v4 }
0x1586   :  { %2615 = vrcp.f32 %v1050_v6 }
0x158e   :  { %v2614_v7 = vpop.eup %2613 }
0x158f   :  { %v1070_v10 = vmul.f32 %v2614_v7, %v1065_v9 }
0x1590   :  { %v2616_v13 = vpop.eup %2615 }
0x1591   :  { %v1071_v29 = vmul.f32 %v2616_v13, %v1067_v17  ;;  %1074 = vrot.lane.b32.xlu0 %v1070_v10, %s2789_s27  ;;  %v1085_v56 = vsub.f32 1.0, %v2616_v13 }
0x1593   :  { %1076 = vrot.lane.b32.xlu1 %v1071_v29, %s2789_s27 }
0x1597   :  { %1096 = vrot.lane.b32.xlu1 %v1011_v3, %s2744_s11  ;;  %v1084_v3 = vsub.f32 1.0, %v2614_v7 }
0x159b   :  { %1098 = vrot.lane.b32.xlu1 %v1012_v55, %s2744_s11 }
0x1603   :  { %v1075_v25 = vpop.permute.xlu0 %1074 }
0x1604   :  { %v1080_v31 = vadd.f32 %v1075_v25, %v2877_v12 }
0x1605   :  { %v1077_v35 = vpop.permute.xlu1 %1076 }
0x1606   :  { %2617 = vtanh.f32 %v1080_v31  ;;  %v1081_v36 = vadd.f32 %v1077_v35, %v2884_v16 }
0x1608   :  { %2619 = vtanh.f32 %v1081_v36 }
0x1609   :  { %v1097_v45 = vpop.permute.xlu1 %1096 }
0x160a   :  { %v1102_v55 = vmul.f32 %v2614_v7, %v1097_v45 }
0x160d   :  { %v1099_v54 = vpop.permute.xlu1 %1098 }
0x160e   :  { %v1103_v58 = vmul.f32 %v2616_v13, %v1099_v54 }
0x1610   :  { %v2618_v47 = vpop.eup %2617 }
0x1611   :  { %1088 = vrot.lane.b32.xlu0 %v2618_v47, %s2791_s28 }
0x1612   :  { %v2620_v40 = vpop.eup %2619 }
0x1615   :  { %1090 = vrot.lane.b32.xlu0 %v2620_v40, %s2791_s28 }
0x1683   :  { %v1089_v37 = vpop.permute.xlu0 %1088 }
0x1684   :  { %v1094_v50 = vmul.f32 %v1089_v37, %v1084_v3 }
0x1686   :  { %v1104_v8 = vadd.f32 %v1102_v55, %v1094_v50 }
0x1687   :  { %v1091_v57 = vpop.permute.xlu0 %1090 }
0x1688   :  { %v1095_v59 = vmul.f32 %v1091_v57, %v1085_v56  ;;  %1109 = vperm.xlu0 %2451, %v1104_v8   ;;  %v2794_v57 = vmov 23  }
0x168a   :  { %v1105_v43 = vadd.f32 %v1103_v58, %v1095_v59 }
0x168c   :  { %1114 = vperm.xlu1 %2452, %v1105_v43   ;;  %2454 = vset.pattern.permute.xlu0 %v2794_v57 }
0x1690   :  { %1148 = vrot.lane.b32.xlu1 %v3065_v18, %s2792_s29 }
0x1691   :  { %2453 = vset.pattern.permute.xlu1 %v2794_v57 }
0x1707   :  { %v3185_v15 = vpop.permute.xlu0 %1109 }
0x1708   :  { %v1119_v60 = vmul.f32 %v3065_v18, %v3185_v15 }
0x170a   :  { %1123 = vrot.lane.b32.xlu0 %v1119_v60, %s2789_s27 }
0x170b   :  { %v3190_v62 = vpop.permute.xlu1 %1114 }
0x170c   :  { %v1120_v63 = vmul.f32 %v3065_v18, %v3190_v62 }
0x170e   :  { %1131 = vrot.lane.b32.xlu0 %v3065_v18, %s2788_s26  ;;  %1125 = vrot.lane.b32.xlu1 %v1120_v63, %s2789_s27 }
0x170f   :  { %v1149_v0 = vpop.permute.xlu1 %1148 }
0x1710   :  { %v1151_v1 = vmul.f32 %v1149_v0, %v1104_v8  ;;  %v1152_v2 = vmul.f32 %v1149_v0, %v1105_v43 }
0x1712   :  { %v1153_v48 = vadd.f32 %v1151_v1, %v3143_v39  ;;  %v1154_v4 = vadd.f32 %v1152_v2, %v3143_v39 }
0x1714   :  { %1159 = vrot.lane.b32.xlu0 %v1154_v4, %s2745_s12  ;;  %1157 = vrot.lane.b32.xlu1 %v1153_v48, %s2745_s12 }
0x177c   :  { %v1124_v5 = vpop.permute.xlu0 %1123 }
0x177d   :  { %v1129_v6 = vadd.f32 %v1124_v5, %v2877_v12 }
0x1780   :  { %v3202_v7 = vpop.permute.xlu0 %1131  ;;  %v1126_v9 = vpop.permute.xlu1 %1125 }
0x1781   :  { %v1134_v10 = vadd.f32 %v3202_v7, %v1129_v6  ;;  %v1130_v13 = vadd.f32 %v1126_v9, %v2884_v16 }
0x1783   :  { %v2233_v17 = vmul.f32 -1.442695, %v1134_v10  ;;  %v1135_v29 = vadd.f32 %v3202_v7, %v1130_v13 }
0x1785   :  { %2621 = vpow2.f32 %v2233_v17  ;;  %v2234_v25 = vmul.f32 -1.442695, %v1135_v29 }
0x1786   :  { %v1158_v47 = vpop.permute.xlu1 %1157  ;;  %v1160_v3 = vpop.permute.xlu0 %1159 }
0x1787   :  { %2623 = vpow2.f32 %v2234_v25 }
0x178f   :  { %v2622_v39 = vpop.eup %2621 }
0x1790   :  { %v1142_v31 = vadd.f32 1.0, %v2622_v39 }
0x1791   :  { %v2624_v35 = vpop.eup %2623 }
0x1792   :  { %2625 = vrcp.f32 %v1142_v31  ;;  %v1143_v36 = vadd.f32 1.0, %v2624_v35 }
0x1794   :  { %2627 = vrcp.f32 %v1143_v36 }
0x179c   :  { %v2626_v38 = vpop.eup %2625 }
0x179d   :  { %v1163_v40 = vmul.f32 %v2626_v38, %v1158_v47 }
0x179e   :  { %v2628_v45 = vpop.eup %2627 }
0x179f   :  { %v1164_v37 = vmul.f32 %v2628_v45, %v1160_v3  ;;  %1167 = vrot.lane.b32.xlu1 %v1163_v40, %s2793_s30  ;;  %v1178_v48 = vsub.f32 1.0, %v2628_v45 }
0x17a1   :  { %1169 = vrot.lane.b32.xlu0 %v1164_v37, %s2793_s30 }
0x17a5   :  { %1189 = vrot.lane.b32.xlu0 %v1104_v8, %s2744_s11  ;;  %v1177_v8 = vsub.f32 1.0, %v2626_v38 }
0x17a9   :  { %1191 = vrot.lane.b32.xlu0 %v1105_v43, %s2744_s11 }
0x1811   :  { %v1168_v55 = vpop.permute.xlu1 %1167 }
0x1812   :  { %v1173_v50 = vadd.f32 %v1168_v55, %v2877_v12 }
0x1813   :  { %v1170_v54 = vpop.permute.xlu0 %1169 }
0x1814   :  { %2629 = vtanh.f32 %v1173_v50  ;;  %v1174_v56 = vadd.f32 %v1170_v54, %v2884_v16 }
0x1816   :  { %2631 = vtanh.f32 %v1174_v56 }
0x1817   :  { %v1190_v60 = vpop.permute.xlu0 %1189 }
0x1818   :  { %v1195_v43 = vmul.f32 %v2626_v38, %v1190_v60 }
0x181b   :  { %v1192_v1 = vpop.permute.xlu0 %1191 }
0x181c   :  { %v1196_v5 = vmul.f32 %v2628_v45, %v1192_v1 }
0x181e   :  { %v2630_v58 = vpop.eup %2629 }
0x181f   :  { %1181 = vrot.lane.b32.xlu1 %v2630_v58, %s2795_s7 }
0x1820   :  { %v2632_v59 = vpop.eup %2631 }
0x1823   :  { %1183 = vrot.lane.b32.xlu1 %v2632_v59, %s2795_s7 }
0x1891   :  { %v1182_v63 = vpop.permute.xlu1 %1181 }
0x1892   :  { %v1187_v0 = vmul.f32 %v1182_v63, %v1177_v8 }
0x1894   :  { %v1197_v2 = vadd.f32 %v1195_v43, %v1187_v0 }
0x1895   :  { %v1184_v4 = vpop.permute.xlu1 %1183 }
0x1896   :  { %v1188_v6 = vmul.f32 %v1184_v4, %v1178_v48  ;;  %1202 = vperm.xlu1 %2453, %v1197_v2  }
0x1898   :  { %v1198_v9 = vadd.f32 %v1196_v5, %v1188_v6  ;;  %v2797_v6 = vmov 25  }
0x189a   :  { %1207 = vperm.xlu0 %2454, %v1198_v9   ;;  %1241 = vrot.lane.b32.xlu1 %v3065_v18, %s2796_s2 }
0x189b   :  { %2456 = vset.pattern.permute.xlu1 %v2797_v6 }
0x189e   :  { %2455 = vset.pattern.permute.xlu0 %v2797_v6 }
0x1915   :  { %v3215_v10 = vpop.permute.xlu1 %1202 }
0x1916   :  { %v1212_v13 = vmul.f32 %v3065_v18, %v3215_v10 }
0x1918   :  { %1216 = vrot.lane.b32.xlu1 %v1212_v13, %s2779_s17 }
0x1919   :  { %v3220_v17 = vpop.permute.xlu0 %1207  ;;  %v1242_v29 = vpop.permute.xlu1 %1241 }
0x191a   :  { %v1213_v25 = vmul.f32 %v3065_v18, %v3220_v17  ;;  %v1244_v39 = vmul.f32 %v1242_v29, %v1197_v2  ;;  %v1245_v31 = vmul.f32 %v1242_v29, %v1198_v9 }
0x191c   :  { %1218 = vrot.lane.b32.xlu0 %v1213_v25, %s2779_s17  ;;  %1224 = vrot.lane.b32.xlu1 %v3065_v18, %s2789_s27  ;;  %v1246_v35 = vadd.f32 %v1244_v39, %v3172_v61  ;;  %v1247_v36 = vadd.f32 %v1245_v31, %v3172_v61 }
0x1920   :  { %1252 = vrot.lane.b32.xlu1 %v1247_v36, %s2745_s12  ;;  %1250 = vrot.lane.b32.xlu0 %v1246_v35, %s2745_s12 }
0x198a   :  { %v1217_v38 = vpop.permute.xlu1 %1216 }
0x198b   :  { %v1222_v47 = vadd.f32 %v1217_v38, %v2877_v12 }
0x198e   :  { %v1219_v40 = vpop.permute.xlu0 %1218  ;;  %v3232_v45 = vpop.permute.xlu1 %1224 }
0x198f   :  { %v1223_v3 = vadd.f32 %v1219_v40, %v2884_v16  ;;  %v1227_v37 = vadd.f32 %v3232_v45, %v1222_v47 }
0x1991   :  { %v1228_v55 = vadd.f32 %v3232_v45, %v1223_v3  ;;  %v2235_v50 = vmul.f32 -1.442695, %v1227_v37 }
0x1992   :  { %v1251_v60 = vpop.permute.xlu0 %1250  ;;  %v1253_v43 = vpop.permute.xlu1 %1252 }
0x1993   :  { %2633 = vpow2.f32 %v2235_v50  ;;  %v2236_v54 = vmul.f32 -1.442695, %v1228_v55 }
0x1995   :  { %2635 = vpow2.f32 %v2236_v54 }
0x199d   :  { %v2634_v61 = vpop.eup %2633 }
0x199e   :  { %v1235_v56 = vadd.f32 1.0, %v2634_v61 }
0x199f   :  { %v2636_v57 = vpop.eup %2635 }
0x19a0   :  { %v1236_v58 = vadd.f32 1.0, %v2636_v57  ;;  %2637 = vrcp.f32 %v1235_v56 }
0x19a2   :  { %2639 = vrcp.f32 %v1236_v58 }
0x19aa   :  { %v2638_v59 = vpop.eup %2637 }
0x19ab   :  { %v1256_v8 = vmul.f32 %v2638_v59, %v1251_v60 }
0x19ac   :  { %v2640_v63 = vpop.eup %2639 }
0x19ad   :  { %v1257_v0 = vmul.f32 %v2640_v63, %v1253_v43  ;;  %1260 = vrot.lane.b32.xlu0 %v1256_v8, %s2788_s26  ;;  %v1271_v38 = vsub.f32 1.0, %v2640_v63 }
0x19af   :  { %1262 = vrot.lane.b32.xlu1 %v1257_v0, %s2788_s26 }
0x19b3   :  { %1282 = vrot.lane.b32.xlu1 %v1197_v2, %s2744_s11  ;;  %v1270_v2 = vsub.f32 1.0, %v2638_v59 }
0x19b7   :  { %1284 = vrot.lane.b32.xlu1 %v1198_v9, %s2744_s11 }
0x1a1f   :  { %v1261_v1 = vpop.permute.xlu0 %1260 }
0x1a20   :  { %v1266_v48 = vadd.f32 %v1261_v1, %v2877_v12 }
0x1a21   :  { %v1263_v4 = vpop.permute.xlu1 %1262 }
0x1a22   :  { %2641 = vtanh.f32 %v1266_v48  ;;  %v1267_v5 = vadd.f32 %v1263_v4, %v2884_v16 }
0x1a24   :  { %2643 = vtanh.f32 %v1267_v5 }
0x1a25   :  { %v1283_v25 = vpop.permute.xlu1 %1282 }
0x1a26   :  { %v1288_v9 = vmul.f32 %v2638_v59, %v1283_v25 }
0x1a29   :  { %v1285_v35 = vpop.permute.xlu1 %1284 }
0x1a2a   :  { %v1289_v40 = vmul.f32 %v2640_v63, %v1285_v35 }
0x1a2c   :  { %v2642_v13 = vpop.eup %2641 }
0x1a2d   :  { %1274 = vrot.lane.b32.xlu0 %v2642_v13, %s2798_s8 }
0x1a2e   :  { %v2644_v29 = vpop.eup %2643 }
0x1a31   :  { %1276 = vrot.lane.b32.xlu0 %v2644_v29, %s2798_s8 }
0x1a9f   :  { %v1275_v39 = vpop.permute.xlu0 %1274 }
0x1aa0   :  { %v1280_v31 = vmul.f32 %v1275_v39, %v1270_v2 }
0x1aa2   :  { %v1290_v36 = vadd.f32 %v1288_v9, %v1280_v31 }
0x1aa3   :  { %v1277_v47 = vpop.permute.xlu0 %1276 }
0x1aa4   :  { %v1281_v3 = vmul.f32 %v1277_v47, %v1271_v38  ;;  %1295 = vperm.xlu0 %2455, %v1290_v36  }
0x1aa6   :  { %v1291_v37 = vadd.f32 %v1289_v40, %v1281_v3 }
0x1aa8   :  { %1300 = vperm.xlu1 %2456, %v1291_v37  }
0x1aac   :  { %1334 = vrot.lane.b32.xlu1 %v3065_v18, %s2793_s30  ;;  %s2812_s30 = smov [#allocation2]  }
0x1aad   :  { %s2192_s7 = sshll.u32 %s2812_s30, 4  ;;  %s2193_s7 = int_to_ptr.vmem [resolvable:$true] %s2192_s7 }
0x1aae   :  { %p2716_p1 = scmp.lt.s32.totalorder %s2193_s7, %s2193_s7 }
0x1b23   :  { %v3245_v55 = vpop.permute.xlu0 %1295 }
0x1b24   :  { %v1305_v50 = vmul.f32 %v3065_v18, %v3245_v55 }
0x1b26   :  { %1309 = vrot.lane.b32.xlu0 %v1305_v50, %s2769_s6  ;;  %v2799_v50 = vmov 27  }
0x1b27   :  { %v3250_v54 = vpop.permute.xlu1 %1300  ;;  %2462 = vset.pattern.permute.xlu0 %v2799_v50  ;;  %2463 = vset.pattern.permute.xlu1 %v2799_v50 }
0x1b28   :  { %v1306_v61 = vmul.f32 %v3065_v18, %v3250_v54 }
0x1b2a   :  { %1317 = vrot.lane.b32.xlu0 %v3065_v18, %s2779_s17  ;;  %1311 = vrot.lane.b32.xlu1 %v1306_v61, %s2769_s6  ;;  %v2800_v61 = vmov 0.0|0.0  }
0x1b2b   :  { %v1335_v56 = vpop.permute.xlu1 %1334  ;;  %2328 = vmatprep.subr.bf16.mxu1 %v2800_v61 }
0x1b2c   :  { %v1337_v57 = vmul.f32 %v1335_v56, %v1290_v36  ;;  %v1338_v58 = vmul.f32 %v1335_v56, %v1291_v37 }
0x1b2e   :  { %v1339_v59 = vadd.f32 %v1337_v57, %v3202_v7  ;;  %v1340_v60 = vadd.f32 %v1338_v58, %v3202_v7 }
0x1b30   :  { %1345 = vrot.lane.b32.xlu0 %v1340_v60, %s2745_s12  ;;  %1343 = vrot.lane.b32.xlu1 %v1339_v59, %s2745_s12 }
0x1b98   :  { %v1310_v8 = vpop.permute.xlu0 %1309 }
0x1b99   :  { %v1315_v63 = vadd.f32 %v1310_v8, %v2877_v12 }
0x1b9c   :  { %v3262_v43 = vpop.permute.xlu0 %1317  ;;  %v1312_v0 = vpop.permute.xlu1 %1311 }
0x1b9d   :  { %v1320_v18 = vadd.f32 %v3262_v43, %v1315_v63  ;;  %v1316_v1 = vadd.f32 %v1312_v0, %v2884_v16 }
0x1b9f   :  { %v2237_v48 = vmul.f32 -1.442695, %v1320_v18  ;;  %v1321_v4 = vadd.f32 %v3262_v43, %v1316_v1 }
0x1ba1   :  { %2645 = vpow2.f32 %v2237_v48  ;;  %v2238_v5 = vmul.f32 -1.442695, %v1321_v4 }
0x1ba2   :  { %v1344_v2 = vpop.permute.xlu1 %1343  ;;  %v1346_v31 = vpop.permute.xlu0 %1345 }
0x1ba3   :  { %2647 = vpow2.f32 %v2238_v5 }
0x1bab   :  { %v2646_v7 = vpop.eup %2645 }
0x1bac   :  { %v1328_v6 = vadd.f32 1.0, %v2646_v7 }
0x1bad   :  { %v2648_v13 = vpop.eup %2647 }
0x1bae   :  { %2649 = vrcp.f32 %v1328_v6  ;;  %v1329_v29 = vadd.f32 1.0, %v2648_v13 }
0x1bb0   :  { %2651 = vrcp.f32 %v1329_v29  ;;  %v3286_v29 = vld [vmem:[%s3592_s4 + $0x4] ss:$0 sm:$0xff] }
0x1bb8   :  { %v2650_v25 = vpop.eup %2649 }
0x1bb9   :  { %v1349_v39 = vmul.f32 %v2650_v25, %v1344_v2  ;;  %v114_v2 = vlaneseq }
0x1bba   :  { %v2652_v9 = vpop.eup %2651 }
0x1bbb   :  { %v1350_v35 = vmul.f32 %v2652_v9, %v1346_v31  ;;  %1353 = vrot.lane.b32.xlu1 %v1349_v39, %s2796_s2  ;;  %v1364_v0 = vsub.f32 1.0, %v2652_v9  ;;  %v3294_v39 = vand.u32 127, %v114_v2 }
0x1bbd   :  { %1355 = vrot.lane.b32.xlu0 %v1350_v35, %s2796_s2  ;;  %vm179_vm4 = vcmp.eq.s32.totalorder %v3294_v39, 0  ;;  %vm272_vm5 = vcmp.eq.s32.totalorder %v3294_v39, 1  ;;  %vm362_vm6 = vcmp.eq.s32.totalorder %v3294_v39, 2  ;;  %vm455_vm7 = vcmp.eq.s32.totalorder %v3294_v39, 3  ;;  %s2711_s2 = scalar_lea.vmem %s2193_s7, 256 }
0x1bbe   :  { %vm548_vm8 = vcmp.eq.s32.totalorder %v3294_v39, 4  ;;  %vm641_vm9 = vcmp.eq.s32.totalorder %v3294_v39, 5  ;;  %vm734_vm10 = vcmp.eq.s32.totalorder %v3294_v39, 6  ;;  %vm827_vm11 = vcmp.eq.s32.totalorder %v3294_v39, 7  ;;  %p2712_p0 = scmp.ne.s32.totalorder %s2193_s7, %s2711_s2  ;;  %p2717_p2 = scmp.lt.s32.totalorder %s2711_s2, %s2711_s2 }
0x1bbf   :  { %vm920_vm12 = vcmp.eq.s32.totalorder %v3294_v39, 8  ;;  %vm3598_vm13 = vcmp.eq.s32.totalorder %v3294_v39, 9  ;;  %vm3597_vm14 = vcmp.eq.s32.totalorder %v3294_v39, 10  ;;  %vm3596_vm15 = vcmp.eq.s32.totalorder %v3294_v39, 11 }
0x1bc0   :  { %vm3595_vm0 = vcmp.eq.s32.totalorder %v3294_v39, 12  ;;  %vm3594_vm1 = vcmp.eq.s32.totalorder %v3294_v39, 13  ;;  %p2718_p3 = por %p2717_p2, %p2716_p1 }
0x1bc1   :  { %1375 = vrot.lane.b32.xlu0 %v1290_v36, %s2744_s11 }
0x1bc2   :  { %p2719_p4 = pnand %p2718_p3, %p2712_p0 }
0x1bc5   :  { %1377 = vrot.lane.b32.xlu0 %v1291_v37, %s2744_s11  ;;  %v1363_v37 = vsub.f32 1.0, %v2650_v25 }
0x1c2d   :  { %v1354_v38 = vpop.permute.xlu1 %1353 }
0x1c2e   :  { %v1359_v47 = vadd.f32 %v1354_v38, %v2877_v12 }
0x1c2f   :  { %v1356_v40 = vpop.permute.xlu0 %1355 }
0x1c30   :  { %2653 = vtanh.f32 %v1359_v47  ;;  %v1360_v3 = vadd.f32 %v1356_v40, %v2884_v16 }
0x1c32   :  { %2655 = vtanh.f32 %v1360_v3 }
0x1c33   :  { %v1376_v36 = vpop.permute.xlu0 %1375 }
0x1c34   :  { %v1381_v59 = vmul.f32 %v2650_v25, %v1376_v36  ;;  %v1584_v25 = vld [vmem:[%s3592_s4 + $0x5] sm:$0x7] }
0x1c37   :  { %v1378_v8 = vpop.permute.xlu0 %1377 }
0x1c38   :  { %v1382_v1 = vmul.f32 %v2652_v9, %v1378_v8  ;;  %v191_v9 = vsel %vm179_vm4, %v2903_v53, 0.0 }
0x1c39   :  { %v284_v31 = vsel %vm272_vm5, %v2924_v44, %v191_v9 }
0x1c3a   :  { %v2654_v56 = vpop.eup %2653  ;;  %v374_v35 = vsel %vm362_vm6, %v2956_v34, %v284_v31 }
0x1c3b   :  { %1367 = vrot.lane.b32.xlu1 %v2654_v56, %s2801_s0  ;;  %v467_v38 = vsel %vm455_vm7, %v2983_v28, %v374_v35 }
0x1c3c   :  { %v2656_v57 = vpop.eup %2655  ;;  %v560_v53 = vsel %vm548_vm8, %v3012_v24, %v467_v38 }
0x1c3d   :  { %v653_v44 = vsel %vm641_vm9, %v3039_v23, %v560_v53 }
0x1c3e   :  { %v746_v34 = vsel %vm734_vm10, %v3073_v27, %v653_v44 }
0x1c3f   :  { %1369 = vrot.lane.b32.xlu1 %v2656_v57, %s2801_s0  ;;  %v839_v28 = vsel %vm827_vm11, %v3102_v33, %v746_v34  ;;  %v2803_v57 = vmov 97   ;;  %v2804_v34 = vmov 96  }
0x1c40   :  { %v932_v24 = vsel %vm920_vm12, %v3131_v46, %v839_v28  ;;  %v2805_v28 = vmov 98  }
0x1c41   :  { %v1025_v27 = vsel %vm3598_vm13, %v3160_v52, %v932_v24  ;;  %v1682_v24 = vshrl.u32 %v114_v2, 7 }
0x1c42   :  { %v1118_v33 = vsel %vm3597_vm14, %v3190_v62, %v1025_v27 }
0x1c43   :  { %2458 = vrot.lane.b32.xlu1 %v2889_v19, %s2802_s9  ;;  %v1211_v46 = vsel %vm3596_vm15, %v3220_v17, %v1118_v33  ;;  %v1728_v27 = vsub.s32 1, %v1682_v24 }
0x1c44   :  { %v1304_v52 = vsel %vm3595_vm0, %v3250_v54, %v1211_v46 }
0x1cad   :  { %v1368_v58 = vpop.permute.xlu1 %1367 }
0x1cae   :  { %v1373_v60 = vmul.f32 %v1368_v58, %v1363_v37 }
0x1cb0   :  { %v3274_v63 = vadd.f32 %v1381_v59, %v1373_v60 }
0x1cb1   :  { %v1370_v18 = vpop.permute.xlu1 %1369 }
0x1cb2   :  { %v1374_v48 = vmul.f32 %v1370_v18, %v1364_v0  ;;  %1388 = vperm.xlu0 %2462, %v3274_v63  }
0x1cb4   :  { %v3277_v4 = vadd.f32 %v1382_v1, %v1374_v48 }
0x1cb5   :  { %v2459_v5 = vpop.permute.xlu1 %2458 }
0x1cb6   :  { %v2461_v7 = vunpack.i.h.bf16 %v2459_v5  ;;  %v2460_v6 = vunpack.i.l.bf16 %v2459_v5  ;;  %1393 = vperm.xlu1 %2463, %v3277_v4   ;;  %2465 = vset.pattern.permute.xlu0 %v2803_v57 }
0x1cb8   :  { %v3280_v13 = vpack.c.bf16 %v2461_v7, %v2460_v6 }
0x1cba   :  { %2331 = vmatpush3.bf16.xpose.msk.msra.mxu1 %vm2330_vm3, %v3280_v13  ;;  %1427 = vrot.lane.b32.xlu1 %v3286_v29, %s2784_s21  ;;  %s2809_s21 = smov 48  }
0x1cbb   :  { %2464 = vset.pattern.permute.xlu1 %v2803_v57 }
0x1cc1   :  { %2298 = vmatmul.mubr.msk.f32.vlgmr.msra.gmra.mrb[0].mxu1 %vm1591_vm2, %v1584_v25 }
0x1d31   :  { %v3333_v23 = vpop.permute.xlu0 %1388 }
0x1d32   :  { %v1398_v47 = vmul.f32 %v3286_v29, %v3333_v23 }
0x1d34   :  { %1402 = vrot.lane.b32.xlu0 %v1398_v47, %s2759_s23 }
0x1d35   :  { %v1394_v40 = vpop.permute.xlu1 %1393 }
0x1d36   :  { %v3356_v62 = vsel %vm3594_vm1, %v1394_v40, %v1304_v52  ;;  %v1399_v3 = vmul.f32 %v3286_v29, %v1394_v40  ;;  %vm1695_vm1 = vcmask 130048  }
0x1d38   :  { %1410 = vrot.lane.b32.xlu0 %v3286_v29, %s2769_s6  ;;  %1404 = vrot.lane.b32.xlu1 %v1399_v3, %s2759_s23 }
0x1d39   :  { %v1428_v17 = vpop.permute.xlu1 %1427 }
0x1d3a   :  { %v1430_v50 = vmul.f32 %v1428_v17, %v3274_v63  ;;  %v1431_v61 = vmul.f32 %v1428_v17, %v3277_v4  ;;  %v1942_v17 = vsub.s32 2, %v1682_v24 }
0x1d3c   :  { %v1432_v54 = vadd.f32 %v1430_v50, %v3232_v45  ;;  %v1433_v56 = vadd.f32 %v1431_v61, %v3232_v45 }
0x1d3e   :  { %1438 = vrot.lane.b32.xlu0 %v1433_v56, %s2745_s12  ;;  %1436 = vrot.lane.b32.xlu1 %v1432_v54, %s2745_s12 }
0x1d94   :  { %v1665_v6 = vpop.f32.mrb[0].mxu1 }
0x1d95   :  { %v2299_v25 = vpop.f32.mrb[1].mxu1  ;;  %v1729_v33 = vrot.slane %v1665_v6, %v1728_v27 }
0x1da6   :  { %v1403_v36 = vpop.permute.xlu0 %1402 }
0x1da7   :  { %v1408_v37 = vadd.f32 %v1403_v36, %v2877_v12  ;;  %v1943_v36 = vrot.slane %v1665_v6, %v1942_v17 }
0x1daa   :  { %v1411_v58 = vpop.permute.xlu0 %1410  ;;  %v1405_v59 = vpop.permute.xlu1 %1404 }
0x1dab   :  { %v1413_v60 = vadd.f32 %v1411_v58, %v1408_v37  ;;  %v1409_v8 = vadd.f32 %v1405_v59, %v2884_v16 }
0x1dad   :  { %v2239_v0 = vmul.f32 -1.442695, %v1413_v60  ;;  %v1414_v18 = vadd.f32 %v1411_v58, %v1409_v8 }
0x1daf   :  { %2657 = vpow2.f32 %v2239_v0  ;;  %v2240_v1 = vmul.f32 -1.442695, %v1414_v18 }
0x1db0   :  { %v1437_v31 = vpop.permute.xlu1 %1436  ;;  %v1439_v53 = vpop.permute.xlu0 %1438 }
0x1db1   :  { %2659 = vpow2.f32 %v2240_v1 }
0x1db9   :  { %v2658_v45 = vpop.eup %2657 }
0x1dba   :  { %v1421_v48 = vadd.f32 1.0, %v2658_v45 }
0x1dbb   :  { %v2660_v5 = vpop.eup %2659 }
0x1dbc   :  { %2661 = vrcp.f32 %v1421_v48  ;;  %v1422_v7 = vadd.f32 1.0, %v2660_v5 }
0x1dbe   :  { %2663 = vrcp.f32 %v1422_v7 }
0x1dc6   :  { %v3370_v9 = vpop.eup %2661 }
0x1dc7   :  { %v1442_v35 = vmul.f32 %v3370_v9, %v1437_v31 }
0x1dc8   :  { %v3373_v38 = vpop.eup %2663 }
0x1dc9   :  { %v1443_v44 = vmul.f32 %v3373_v38, %v1439_v53  ;;  %1446 = vrot.lane.b32.xlu1 %v1442_v35, %s2783_s20 }
0x1dcb   :  { %1448 = vrot.lane.b32.xlu0 %v1443_v44, %s2783_s20 }
0x1dcd   :  { %1719 = vperm.xlu1 %2464, %v2874_v11  }
0x1dcf   :  { %1723 = vperm.xlu0 %2465, %v2879_v14  }
0x1dd1   :  { %2466 = vset.pattern.permute.xlu1 %v2804_v34 }
0x1dd2   :  { %1674 = vperm.xlu1 %2466, %v2874_v11  }
0x1dd3   :  { %2467 = vset.pattern.permute.xlu0 %v2805_v28 }
0x1dd4   :  { %1933 = vperm.xlu0 %2467, %v2874_v11   ;;  %v3391_v11 = vsub.s32 0, %v1682_v24 }
0x1dd6   :  { %1678 = vperm.xlu1 %2466, %v2879_v14   ;;  %v1684_v50 = vrot.slane %v1665_v6, %v3391_v11 }
0x1dd8   :  { %1468 = vrot.lane.b32.xlu0 %v3274_v63, %s2744_s11  ;;  %v1669_v63 = vld [vmem:[%s3589_s1] sm:$0xff] }
0x1dd9   :  { %vm1671_vm3 = vcmp.gt.f32.partialorder %v1669_v63, 0.5 }
0x1dda   :  { %2468 = vset.pattern.permute.xlu1 %v2805_v28 }
0x1ddb   :  { %1937 = vperm.xlu1 %2468, %v2879_v14   ;;  %v1670_v14 = vld [vmem:[%s3589_s1 + $0x8] sm:$0xff]  ;;  %s2806_s1 = smov 111  }
0x1ddc   :  { %1470 = vrot.lane.b32.xlu0 %v3277_v4, %s2744_s11  ;;  %vm1672_vm15 = vcmp.gt.f32.partialorder %v1670_v14, 0.5 }
0x1e3b   :  { %v1447_v47 = vpop.permute.xlu1 %1446 }
0x1e3d   :  { %v1449_v46 = vpop.permute.xlu0 %1448 }
0x1e4c   :  { %v1720_v52 = vpop.permute.xlu1 %1719 }
0x1e4d   :  { %v1730_v40 = vadd.f32 %v1729_v33, %v1720_v52 }
0x1e4e   :  { %v1724_v3 = vpop.permute.xlu0 %1723 }
0x1e4f   :  { %vm1732_vm2 = vcmp.ge.f32.partialorder %v1730_v40, 0.0  ;;  %v1734_v4 = vmul.f32 0.2, %v1730_v40  ;;  %v1731_v2 = vadd.f32 %v1729_v33, %v1724_v3 }
0x1e51   :  { %vm1733_vm0 = vcmp.ge.f32.partialorder %v1731_v2, 0.0  ;;  %v1735_v61 = vmul.f32 0.2, %v1731_v2  ;;  %v1675_v54 = vpop.permute.xlu1 %1674  ;;  %v1736_v56 = vsel %vm1732_vm2, %v1730_v40, %v1734_v4  ;;  %v1452_v4 = vadd.f32 %v1447_v47, %v2877_v12 }
0x1e52   :  { %v1685_v57 = vadd.f32 %v1684_v50, %v1675_v54  ;;  %v1738_v37 = vsel %vm1671_vm3, %v1736_v56, -1e+30  ;;  %v2807_v54 = vmov 29  }
0x1e53   :  { %v1934_v58 = vpop.permute.xlu0 %1933  ;;  %v1740_v59 = vsel %vm1695_vm1, %v1738_v37, -inf  ;;  %v1737_v60 = vsel %vm1733_vm0, %v1731_v2, %v1735_v61  ;;  %2665 = vtanh.f32 %v1452_v4  ;;  %v1453_v2 = vadd.f32 %v1449_v46, %v2884_v16  ;;  %2469 = vset.pattern.permute.xlu0 %v2807_v54  ;;  %2470 = vset.pattern.permute.xlu1 %v2807_v54 }
0x1e54   :  { %vm1687_vm14 = vcmp.ge.f32.partialorder %v1685_v57, 0.0  ;;  %v1689_v8 = vmul.f32 0.2, %v1685_v57  ;;  %v1944_v0 = vadd.f32 %v1943_v36, %v1934_v58  ;;  %1741 = vmax.xlane.f32.xlu1 %v1740_v59  ;;  %v3403_v18 = vsel %vm1672_vm15, %v1737_v60, -1e+30 }
0x1e55   :  { %v1679_v1 = vpop.permute.xlu1 %1678  ;;  %v1743_v45 = vsel %vm1695_vm1, %v3403_v18, -inf  ;;  %2667 = vtanh.f32 %v1453_v2 }
0x1e56   :  { %vm1946_vm2 = vcmp.ge.f32.partialorder %v1944_v0, 0.0  ;;  %v1948_v48 = vmul.f32 0.2, %v1944_v0  ;;  %v1686_v5 = vadd.f32 %v1684_v50, %v1679_v1  ;;  %1744 = vmax.xlane.f32.xlu0 %v1743_v45  ;;  %v1691_v7 = vsel %vm1687_vm14, %v1685_v57, %v1689_v8 }
0x1e57   :  { %v1693_v6 = vsel %vm1671_vm3, %v1691_v7, -1e+30  ;;  %v1469_v14 = vpop.permute.xlu0 %1468 }
0x1e58   :  { %vm1688_vm13 = vcmp.ge.f32.partialorder %v1686_v5, 0.0  ;;  %v1690_v25 = vmul.f32 0.2, %v1686_v5  ;;  %v1696_v31 = vsel %vm1695_vm1, %v1693_v6, -inf  ;;  %v1950_v35 = vsel %vm1946_vm2, %v1944_v0, %v1948_v48 }
0x1e59   :  { %v3410_v34 = vsel %vm1671_vm3, %v1950_v35, -1e+30  ;;  %v1456_v48 = vsub.f32 1.0, %v3370_v9 }
0x1e5a   :  { %v1938_v53 = vpop.permute.xlu1 %1937  ;;  %1697 = vmax.xlane.f32.xlu0 %v1696_v31  ;;  %v1692_v44 = vsel %vm1688_vm13, %v1686_v5, %v1690_v25  ;;  %v1954_v40 = vsel %vm1695_vm1, %v3410_v34, -inf }
0x1e5b   :  { %v1945_v24 = vadd.f32 %v1943_v36, %v1938_v53  ;;  %v3413_v27 = vsel %vm1672_vm15, %v1692_v44, -1e+30  ;;  %v1471_v56 = vpop.permute.xlu0 %1470  ;;  %v1457_v44 = vsub.f32 1.0, %v3373_v38 }
0x1e5c   :  { %v1699_v33 = vsel %vm1695_vm1, %v3413_v27, -inf }
0x1e5d   :  { %vm1947_vm14 = vcmp.ge.f32.partialorder %v1945_v24, 0.0  ;;  %v1949_v52 = vmul.f32 0.2, %v1945_v24  ;;  %1700 = vmax.xlane.f32.xlu1 %v1699_v33  ;;  %v2666_v50 = vpop.eup %2665  ;;  %v1475_v33 = vmul.f32 %v3373_v38, %v1471_v56 }
0x1e5e   :  { %1955 = vmax.xlane.f32.xlu0 %v1954_v40 }
0x1e5f   :  { %v1951_v3 = vsel %vm1947_vm14, %v1945_v24, %v1949_v52  ;;  %v2668_v61 = vpop.eup %2667 }
0x1e60   :  { %v1953_v17 = vsel %vm1672_vm15, %v1951_v3, -1e+30 }
0x1e61   :  { %v1957_v63 = vsel %vm1695_vm1, %v1953_v17, -inf }
0x1e62   :  { %1958 = vmax.xlane.f32.xlu1 %v1957_v63 }
0x1e73   :  { %1460 = vrot.lane.b32.xlu1 %v2666_v50, %s2806_s1 }
0x1e77   :  { %1462 = vrot.lane.b32.xlu1 %v2668_v61, %s2806_s1 }
0x1e7b   :  { %1520 = vrot.lane.b32.xlu1 %v3286_v29, %s2774_s10  ;;  %s2808_s10 = smov 64  }
0x1ee1   :  { %v1742_v57 = vpop.xlane.xlu1 %1741 }
0x1ee2   :  { %v1746_v36 = vsub.f32 %v1738_v37, %v1742_v57  ;;  %v1474_v37 = vmul.f32 %v3370_v9, %v1469_v14 }
0x1ee3   :  { %v1745_v47 = vpop.xlane.xlu0 %1744 }
0x1ee4   :  { %v1748_v58 = vmul.f32 1.442695, %v1746_v36  ;;  %v1747_v53 = vsub.f32 %v3403_v18, %v1745_v47 }
0x1ee6   :  { %2669 = vpow2.f32 %v1748_v58  ;;  %v1750_v9 = vmul.f32 1.442695, %v1747_v53 }
0x1ee7   :  { %v1698_v46 = vpop.xlane.xlu0 %1697 }
0x1ee8   :  { %v1702_v59 = vsub.f32 %v1693_v6, %v1698_v46 }
0x1eea   :  { %v1704_v60 = vmul.f32 1.442695, %v1702_v59  ;;  %v1701_v8 = vpop.xlane.xlu1 %1700 }
0x1eeb   :  { %v1703_v63 = vsub.f32 %v3413_v27, %v1701_v8  ;;  %v1956_v18 = vpop.xlane.xlu0 %1955 }
0x1eec   :  { %2671 = vpow2.f32 %v1704_v60  ;;  %v1960_v2 = vsub.f32 %v3410_v34, %v1956_v18 }
0x1eed   :  { %2673 = vpow2.f32 %v1750_v9  ;;  %v1706_v4 = vmul.f32 1.442695, %v1703_v63 }
0x1eee   :  { %v1962_v38 = vmul.f32 1.442695, %v1960_v2 }
0x1eef   :  { %v1959_v0 = vpop.xlane.xlu1 %1958  ;;  %2675 = vpow2.f32 %v1706_v4 }
0x1ef0   :  { %v3425_v1 = vpop.eup %2669  ;;  %v1961_v50 = vsub.f32 %v1953_v17, %v1959_v0  ;;  %2677 = vpow2.f32 %v1962_v38  ;;  %v190_v17 = vsel %vm179_vm4, %v2899_v51, 0.0  ;;  %vm3599_vm4 = vcmp.eq.s32.totalorder %v3294_v39, 9 }
0x1ef1   :  { %v1752_v45 = vsel %vm1695_vm1, %v3425_v1, 0.0  ;;  %v283_v36 = vsel %vm272_vm5, %v2919_v42, %v190_v17  ;;  %vm3600_vm5 = vcmp.eq.s32.totalorder %v3294_v39, 10 }
0x1ef2   :  { %1753 = vadd.xlane.f32.xlu1 %v1752_v45  ;;  %v1964_v61 = vmul.f32 1.442695, %v1961_v50  ;;  %v373_v47 = vsel %vm362_vm6, %v2951_v32, %v283_v36  ;;  %vm3601_vm6 = vcmp.eq.s32.totalorder %v3294_v39, 11 }
0x1ef3   :  { %v1461_v5 = vpop.permute.xlu1 %1460  ;;  %v466_v58 = vsel %vm455_vm7, %v2978_v26, %v373_v47  ;;  %vm1478_vm7 = vcmp.eq.s32.totalorder %v3294_v39, 14 }
0x1ef4   :  { %v1466_v7 = vmul.f32 %v1461_v5, %v1456_v48  ;;  %2679 = vpow2.f32 %v1964_v61  ;;  %v559_v46 = vsel %vm548_vm8, %v3007_v22, %v466_v58  ;;  %vm3602_vm8 = vcmp.eq.s32.totalorder %v3294_v39, 12 }
0x1ef5   :  { %v652_v51 = vsel %vm641_vm9, %v3034_v20, %v559_v46  ;;  %vm3603_vm9 = vcmp.eq.s32.totalorder %v3294_v39, 13 }
0x1ef6   :  { %v3431_v25 = vpop.eup %2671  ;;  %v3433_v31 = vadd.f32 %v1474_v37, %v1466_v7  ;;  %v745_v42 = vsel %vm734_vm10, %v3068_v21, %v652_v51  ;;  %vm1571_vm10 = vcmp.eq.s32.totalorder %v3294_v39, 15  ;;  %v2254_v39 = vld [vmem:[%s3592_s4 + $0x3] ss:$0 sm:$0xff] }
0x1ef7   :  { %v1708_v6 = vsel %vm1695_vm1, %v3431_v25, 0.0  ;;  %v1463_v35 = vpop.permute.xlu1 %1462  ;;  %v3444_v40 = vpop.eup %2673  ;;  %v838_v32 = vsel %vm827_vm11, %v3097_v30, %v745_v42  ;;  %vm2184_vm11 = vcmask 261120  }
0x1ef8   :  { %1481 = vperm.xlu0 %2469, %v3433_v31   ;;  %1709 = vadd.xlane.f32.xlu1 %v1708_v6  ;;  %v1467_v24 = vmul.f32 %v1463_v35, %v1457_v44  ;;  %v1755_v3 = vsel %vm1695_vm1, %v3444_v40, 0.0  ;;  %v931_v26 = vsel %vm920_vm12, %v3126_v41, %v838_v32 }
0x1ef9   :  { %v3450_v54 = vpop.eup %2675  ;;  %v1024_v22 = vsel %vm3599_vm4, %v3155_v49, %v931_v26 }
0x1efa   :  { %v3441_v52 = vadd.f32 %v1475_v33, %v1467_v24  ;;  %v1711_v14 = vsel %vm1695_vm1, %v3450_v54, 0.0  ;;  %v3454_v56 = vpop.eup %2677  ;;  %v1117_v20 = vsel %vm3600_vm5, %v3185_v15, %v1024_v22 }
0x1efb   :  { %v1966_v27 = vsel %vm1695_vm1, %v3454_v56, 0.0  ;;  %v1210_v21 = vsel %vm3601_vm6, %v3215_v10, %v1117_v20  ;;  %v1521_v60 = vpop.permute.xlu1 %1520 }
0x1efc   :  { %v1303_v30 = vsel %vm3602_vm8, %v3245_v55, %v1210_v21  ;;  %v1524_v10 = vmul.f32 %v1521_v60, %v3441_v52 }
0x1efd   :  { %v1396_v41 = vsel %vm3603_vm9, %v3333_v23, %v1303_v30 }
0x1efe   :  { %v3458_v57 = vpop.eup %2679  ;;  %v1526_v8 = vadd.f32 %v1524_v10, %v3262_v43  ;;  %v2810_v10 = vmov 31  }
0x1eff   :  { %v1969_v34 = vsel %vm1695_vm1, %v3458_v57, 0.0  ;;  %2482 = vset.pattern.permute.xlu0 %v2810_v10 }
0x1f09   :  { %1486 = vperm.xlu1 %2470, %v3441_v52  }
0x1f0d   :  { %2481 = vset.pattern.permute.xlu1 %v2810_v10 }
0x1f17   :  { %1756 = vadd.xlane.f32.xlu0 %v1755_v3 }
0x1f2d   :  { %1712 = vadd.xlane.f32.xlu1 %v1711_v14 }
0x1f31   :  { %1967 = vadd.xlane.f32.xlu1 %v1966_v27 }
0x1f35   :  { %1970 = vadd.xlane.f32.xlu1 %v1969_v34 }
0x1f46   :  { %2472 = vrot.lane.b32.xlu1 %v2889_v19, %s2808_s10 }
0x1f77   :  { %v1482_v59 = vpop.permute.xlu0 %1481 }
0x1f78   :  { %v3508_v49 = vsel %vm1478_vm7, %v1482_v59, %v1396_v41  ;;  %v1491_v15 = vmul.f32 %v3286_v29, %v1482_v59 }
0x1f7a   :  { %1495 = vrot.lane.b32.xlu0 %v1491_v15, %s2750_s16 }
0x1f7e   :  { %2477 = vrot.lane.b32.xlu0 %v2889_v19, %s2809_s21  ;;  %v1523_v19 = vmul.f32 %v1521_v60, %v3433_v31 }
0x1f7f   :  { %v1754_v55 = vpop.xlane.xlu1 %1753 }
0x1f80   :  { %2681 = vrcp.f32 %v1754_v55  ;;  %v1525_v7 = vadd.f32 %v1523_v19, %v3262_v43 }
0x1f82   :  { %1531 = vrot.lane.b32.xlu0 %v1526_v8, %s2745_s12 }
0x1f85   :  { %v1710_v23 = vpop.xlane.xlu1 %1709 }
0x1f89   :  { %v1487_v0 = vpop.permute.xlu1 %1486 }
0x1f8a   :  { %v2682_v45 = vpop.eup %2681  ;;  %v3519_v48 = vsel %vm1478_vm7, %v1487_v0, %v3356_v62  ;;  %v1492_v5 = vmul.f32 %v3286_v29, %v1487_v0 }
0x1f8b   :  { %v1760_v37 = vmul.f32 %v2682_v45, %v3425_v1 }
0x1f8c   :  { %1497 = vrot.lane.b32.xlu1 %v1492_v5, %s2750_s16 }
0x1f8d   :  { %2304 = vmatprep.mubr.msk.f32.mxu1 %vm1695_vm1, %v1760_v37 }
0x1f90   :  { %1503 = vrot.lane.b32.xlu1 %v3286_v29, %s2759_s23 }
0x1f94   :  { %1529 = vrot.lane.b32.xlu1 %v1525_v7, %s2745_s12  ;;  %s2811_s12 = smov 112  }
0x1fa4   :  { %v1757_v62 = vpop.xlane.xlu0 %1756 }
0x1fa5   :  { %2683 = vrcp.f32 %v1757_v62 }
0x1fa6   :  { %2685 = vrcp.f32 %v1710_v23 }
0x1faf   :  { %v2684_v9 = vpop.eup %2683 }
0x1fb0   :  { %v2686_v3 = vpop.eup %2685  ;;  %v1761_v43 = vmul.f32 %v2684_v9, %v3444_v40 }
0x1fb1   :  { %v1716_v29 = vmul.f32 %v2686_v3, %v3431_v25 }
0x1fba   :  { %v1713_v6 = vpop.xlane.xlu1 %1712 }
0x1fbb   :  { %2687 = vrcp.f32 %v1713_v6 }
0x1fbe   :  { %v1968_v35 = vpop.xlane.xlu1 %1967 }
0x1fbf   :  { %2689 = vrcp.f32 %v1968_v35 }
0x1fc2   :  { %v1971_v53 = vpop.xlane.xlu1 %1970 }
0x1fc3   :  { %2691 = vrcp.f32 %v1971_v53  ;;  %v2096_v53 = vld [vmem:[%s3591_s3] sm:$0xff] }
0x1fc5   :  { %v2688_v63 = vpop.eup %2687 }
0x1fc6   :  { %v2473_v1 = vpop.permute.xlu1 %2472  ;;  %v1717_v4 = vmul.f32 %v2688_v63, %v3450_v54 }
0x1fc7   :  { %v2475_v44 = vunpack.i.h.bf16 %v2473_v1  ;;  %v2474_v24 = vunpack.i.l.bf16 %v2473_v1  ;;  %v2097_v1 = vld [vmem:[%s3591_s3 + $0x8] sm:$0xff] }
0x1fc9   :  { %v2332_v33 = vpack.c.bf16 %v2475_v44, %v2474_v24  ;;  %v2690_v18 = vpop.eup %2689  ;;  %v2344_v44 = vpack.c.bf16 %v2097_v1, %v2096_v53  ;;  %v2074_v24 = vld [vmem:[%s3592_s4 + $0x2] sm:$0x1] }
0x1fca   :  { %v1974_v2 = vmul.f32 %v2690_v18, %v3454_v56  ;;  %v2252_v18 = vld [vmem:[%s3592_s4 + $0x1] ss:$0 sm:$0xff] }
0x1fcb   :  { %2333 = vmatprep.subr.bf16.mxu1 %v2332_v33  ;;  %2345 = vmatprep.subr.bf16.mxu0 %v2344_v44 }
0x1fcc   :  { %2335 = vmatpush3.bf16.msra.mxu1 %v2332_v33  ;;  %2347 = vmatpush3.bf16.msra.mxu0 %v2344_v44  ;;  %v2253_v33 = vmul.f32 -1.442695, %v2074_v24 }
0x1fcd   :  { %2337 = vmatprep.subr.bf16.mxu1 %v3280_v13  ;;  %v2692_v14 = vpop.eup %2691 }
0x1fcf   :  { %2305 = vmatmul.mubr.msk.f32.vlgmr.msra.gmra.mrb[2].mxu1 %vm1695_vm1, %v1761_v43 }
0x1fd0   :  { %2339 = vmatpush3.bf16.msra.mxu1 %v3280_v13  ;;  %2311 = vmatprep.mubr.msk.f32.mxu1 %vm1695_vm1, %v1716_v29  ;;  %v1975_v13 = vmul.f32 %v2692_v14, %v3458_v57 }
0x1fd7   :  { %2312 = vmatmul.mubr.msk.f32.vlgmr.msra.gmra.mrb[2].mxu1 %vm1695_vm1, %v1717_v4 }
0x1fd8   :  { %2318 = vmatprep.mubr.msk.f32.mxu1 %vm1695_vm1, %v1974_v2 }
0x1fec   :  { %v1496_v40 = vpop.permute.xlu0 %1495 }
0x1fed   :  { %v1501_v56 = vadd.f32 %v1496_v40, %v2877_v12 }
0x1ff0   :  { %v2478_v38 = vpop.permute.xlu0 %2477 }
0x1ff1   :  { %v2480_v25 = vunpack.i.h.bf16 %v2478_v38  ;;  %v2479_v50 = vunpack.i.l.bf16 %v2478_v38 }
0x1ff3   :  { %v2340_v61 = vpack.c.bf16 %v2480_v25, %v2479_v50 }
0x1ff4   :  { %v1532_v20 = vpop.permute.xlu0 %1531 }
0x1ff5   :  { %2341 = vmatprep.subr.bf16.mxu1 %v2340_v61 }
0x1ff6   :  { %2343 = vmatpush3.bf16.msra.mxu1 %v2340_v61 }
0x1ff9   :  { %2319 = vmatmul.mubr.msk.f32.vlgmr.msra.gmra.mrb[2].mxu1 %vm1695_vm1, %v1975_v13 }
0x1ffe   :  { %v1498_v54 = vpop.permute.xlu1 %1497 }
0x1fff   :  { %v1502_v27 = vadd.f32 %v1498_v54, %v2884_v16 }
0x2002   :  { %v1504_v34 = vpop.permute.xlu1 %1503 }
0x2003   :  { %v1506_v17 = vadd.f32 %v1504_v34, %v1501_v56  ;;  %v1507_v36 = vadd.f32 %v1504_v34, %v1502_v27 }
0x2005   :  { %v2241_v47 = vmul.f32 -1.442695, %v1506_v17  ;;  %v2242_v58 = vmul.f32 -1.442695, %v1507_v36 }
0x2006   :  { %v1530_v26 = vpop.permute.xlu1 %1529 }
0x2007   :  { %2693 = vpow2.f32 %v2241_v47 }
0x2008   :  { %2695 = vpow2.f32 %v2242_v58 }
0x2011   :  { %v2694_v46 = vpop.eup %2693 }
0x2012   :  { %v2696_v51 = vpop.eup %2695  ;;  %v1514_v42 = vadd.f32 1.0, %v2694_v46 }
0x2013   :  { %v1515_v32 = vadd.f32 1.0, %v2696_v51 }
0x2014   :  { %2697 = vrcp.f32 %v1514_v42 }
0x2015   :  { %2699 = vrcp.f32 %v1515_v32 }
0x201e   :  { %v2698_v57 = vpop.eup %2697 }
0x201f   :  { %v2700_v22 = vpop.eup %2699  ;;  %v1535_v21 = vmul.f32 %v2698_v57, %v1530_v26 }
0x2020   :  { %v1536_v30 = vmul.f32 %v2700_v22, %v1532_v20  ;;  %v1550_v7 = vsub.f32 1.0, %v2700_v22 }
0x2021   :  { %1539 = vrot.lane.b32.xlu1 %v1535_v21, %s2792_s29 }
0x2022   :  { %1541 = vrot.lane.b32.xlu0 %v1536_v30, %s2792_s29 }
0x2026   :  { %1561 = vrot.lane.b32.xlu0 %v3433_v31, %s2744_s11 }
0x202a   :  { %1563 = vrot.lane.b32.xlu0 %v3441_v52, %s2744_s11  ;;  %v1549_v52 = vsub.f32 1.0, %v2698_v57 }
0x2093   :  { %v1540_v41 = vpop.permute.xlu1 %1539 }
0x2094   :  { %v1545_v59 = vadd.f32 %v1540_v41, %v2877_v12  ;;  %v1542_v15 = vpop.permute.xlu0 %1541 }
0x2095   :  { %v1546_v60 = vadd.f32 %v1542_v15, %v2884_v16 }
0x2096   :  { %2701 = vtanh.f32 %v1545_v59 }
0x2097   :  { %2703 = vtanh.f32 %v1546_v60 }
0x2098   :  { %v1562_v0 = vpop.permute.xlu0 %1561  ;;  %2705 = vpow2.f32 %v2253_v33 }
0x2099   :  { %v1567_v5 = vmul.f32 %v2698_v57, %v1562_v0 }
0x209c   :  { %v1564_v37 = vpop.permute.xlu0 %1563 }
0x209d   :  { %v1568_v6 = vmul.f32 %v2700_v22, %v1564_v37 }
0x20a0   :  { %v2702_v55 = vpop.eup %2701 }
0x20a1   :  { %1553 = vrot.lane.b32.xlu1 %v2702_v55, %s2811_s12  ;;  %v2704_v8 = vpop.eup %2703 }
0x20a2   :  { %v2706_v9 = vpop.eup %2705 }
0x20a3   :  { %v2078_v3 = vadd.f32 1.0, %v2706_v9 }
0x20a5   :  { %1555 = vrot.lane.b32.xlu1 %v2704_v8, %s2811_s12  ;;  %2707 = vrcp.f32 %v2078_v3 }
0x20af   :  { %v2708_v43 = vpop.eup %2707 }
0x20b0   :  { %v2087_v63 = vsub.f32 1.0, %v2708_v43  ;;  %v2084_v4 = vrot.slane %v2708_v43, %v3391_v11 }
0x20b2   :  { %v2091_v40 = vrot.slane %v2087_v63, %v3391_v11 }
0x20cc   :  { %v2320_v31 = vpop.f32.mrb[2].mxu1 }
0x20cd   :  { %v2054_v23 = vpop.f32.mrb[3].mxu1  ;;  %v2066_v2 = vmul.f32 0.33333334, %v2320_v31 }
0x20ce   :  { %v2065_v29 = vmul.f32 0.33333334, %v2054_v23 }
0x20cf   :  { %v2073_v50 = vadd.f32 %v2252_v18, %v2066_v2 }
0x20d1   :  { %v2086_v27 = vmul.f32 %v2084_v4, %v2073_v50 }
0x2113   :  { %v1554_v45 = vpop.permute.xlu1 %1553 }
0x2114   :  { %v1559_v12 = vmul.f32 %v1554_v45, %v1549_v52 }
0x2116   :  { %v1569_v19 = vadd.f32 %v1567_v5, %v1559_v12 }
0x2117   :  { %v1556_v16 = vpop.permute.xlu1 %1555 }
0x2118   :  { %v1560_v62 = vmul.f32 %v1556_v16, %v1550_v7  ;;  %1574 = vperm.xlu1 %2481, %v1569_v19  }
0x211a   :  { %v1570_v35 = vadd.f32 %v1568_v6, %v1560_v62 }
0x211c   :  { %1579 = vperm.xlu0 %2482, %v1570_v35  }
0x2120   :  { %2483 = vset.pattern.permute.xlu0 %v2805_v28  ;;  %v2072_v28 = vadd.f32 %v2252_v18, %v2065_v29 }
0x2122   :  { %v2085_v61 = vmul.f32 %v2084_v4, %v2072_v28 }
0x2197   :  { %v1575_v38 = vpop.permute.xlu1 %1574 }
0x2198   :  { %v1582_v25 = vsel %vm1571_vm10, %v1575_v38, %v3508_v49 }
0x2199   :  { %v2092_v14 = vmul.f32 %v2091_v40, %v1582_v25 }
0x219b   :  { %v2094_v13 = vadd.f32 %v2092_v14, %v2085_v61  ;;  %v1580_v54 = vpop.permute.xlu0 %1579 }
0x219c   :  { %v1583_v56 = vsel %vm1571_vm10, %v1580_v54, %v3519_v48 }
0x219d   :  { %v2093_v34 = vmul.f32 %v2091_v40, %v1583_v56  ;;  %2325 = vmatprep.mubr.msk.f32.mxu0 %vm1695_vm1, %v2094_v13 }
0x219f   :  { %v2095_v17 = vadd.f32 %v2093_v34, %v2086_v27 }
0x21a1   :  { %2326 = vmatmul.mubr.msk.f32.vlgmr.msra.gmra.mrb[4].mxu0 %vm1695_vm1, %v2095_v17 }
0x2274   :  { %v2327_v11 = vpop.f32.mrb[4].mxu0 }
0x2275   :  { %v2181_v49 = vadd.f32 %v2327_v11, %v2254_v39  ;;  %v2175_v36 = vpop.f32.mrb[5].mxu0 }
0x2276   :  { %v2176_v47 = vadd.f32 %v2254_v39, %v2175_v36 }
0x2277   :  { %2186 = vst.msk [vmem:[#allocation2 + $0x8] sm:$0xff] %vm2184_vm11, %v2181_v49 }
0x2278   :  { %2185 = vst.msk [vmem:[#allocation2] sm:$0xff] %vm2184_vm11, %v2176_v47 }
0x2279   :  { %2722 = shalt.err (!%p2719_p4)
}
0x227a   :  { %s2723_s4 = scalar_lea.hbm %s3593_s5, 256 }
0x227b   :  { %p2724_p5 = scmp.ne.s32.totalorder %s3593_s5, %s2723_s4  ;;  %p2727_p6 = scmp.lt.u32.totalorder %s2723_s4, %s3593_s5 }
0x227d   :  { %p2729_p7 = pnand %p2727_p6, %p2724_p5 }
0x227f   :  { %2732 = shalt.err (!%p2729_p7)
}
0x2280   :  { %s2813_s17 = smov 128  }
0x2281   :  { %2198 = dma.vmem_to_hbm [thread:$0]  %s2193_s7, 256, %s3593_s5, [#allocation3], %s2813_s17, %s2813_s17, %s2758_s22  }
0x2282   :  { %2733 = dma.done.wait [#allocation3], 256  }
0x2283   :  { %2734 = vsyncadd [#allocation3], 4294967040 }
0x2284   :  { %2202 = vsyncpa [#allocation3], 1 }

</bundles_post_ra>
